<compile_context>
chip_gen: v7x
topology: tpu7x:2x2x1
jax: 0.10.0
libtpu: 0.0.40
codegen_flags: <defaults>
</compile_context>

<pallas_src>
import functools
import math

import jax
import jax.numpy as jnp
from jax import lax
from jax.experimental import pallas as pl
from jax.experimental.pallas import tpu as pltpu


def _softplus(v):
    # numerically stable softplus: max(v, 0) + log1p(exp(-|v|))
    return jnp.maximum(v, 0.0) + jnp.log1p(jnp.exp(-jnp.abs(v)))


# ---------------------------------------------------------------------------
# Kernels
# ---------------------------------------------------------------------------
def _train_kernel(prior_ref,                               # SMEM (2,): [log s0, 1/s0^2]
                  x_ref,                                   # (B, TK)
                  wmu_ref, wrho_ref, weps_ref, pwmu_ref,   # (TN, TK)
                  bmu_r_ref, brho_r_ref, beps_r_ref,       # (1, TN) (row layout, fwd)
                  bmu_c_ref, brho_c_ref, pbmu_c_ref,       # (TN, 1) (col layout, KL)
                  out_ref,                                 # (B, TN)
                  klrows_ref,                              # (TN, 1) per-row KL partials
                  acc_ref,                                 # VMEM scratch (B, TN) f32
                  *, mxu_dtype):
    k = pl.program_id(1)
    nk = pl.num_programs(1)
    log_s0 = prior_ref[0]
    inv_var0 = prior_ref[1]

    wmu = wmu_ref[...]
    s1 = _softplus(wrho_ref[...])              # posterior sigma (reused for KL)
    w = wmu + s1 * weps_ref[...]               # reparameterized weight sample

    @pl.when(k == 0)
    def _():
        acc_ref[...] = jnp.zeros_like(acc_ref)
        # bias KL for this out_features tile (added once per n-tile)
        sb = _softplus(brho_c_ref[...])
        db = bmu_c_ref[...] - pbmu_c_ref[...]
        klrows_ref[...] = 0.5 * (2.0 * (log_s0 - jnp.log(sb))
                                 + (db * db + sb * sb) * inv_var0 - 1.0)

    # x @ w.T without a transpose: contract dim 1 of x with dim 1 of w.
    acc_ref[...] += lax.dot_general(
        x_ref[...].astype(mxu_dtype), w.astype(mxu_dtype),
        dimension_numbers=(((1,), (1,)), ((), ())),
        preferred_element_type=jnp.float32)

    # weight KL for this (n, k) tile, reduced over K, accumulated per output row.
    dw = wmu - pwmu_ref[...]
    kl_tile = 0.5 * (2.0 * (log_s0 - jnp.log(s1))
                     + (dw * dw + s1 * s1) * inv_var0 - 1.0)
    klrows_ref[...] += jnp.sum(kl_tile, axis=1, keepdims=True)

    @pl.when(k == nk - 1)
    def _():
        b = bmu_r_ref[...] + _softplus(brho_r_ref[...]) * beps_r_ref[...]
        out_ref[...] = (acc_ref[...] + b).astype(out_ref.dtype)


def _sample_kernel(x_ref, wmu_ref, wrho_ref, weps_ref,
                   bmu_r_ref, brho_r_ref, beps_r_ref,
                   out_ref, acc_ref, *, mxu_dtype):
    k = pl.program_id(1)
    nk = pl.num_programs(1)

    @pl.when(k == 0)
    def _():
        acc_ref[...] = jnp.zeros_like(acc_ref)

    w = wmu_ref[...] + _softplus(wrho_ref[...]) * weps_ref[...]
    acc_ref[...] += lax.dot_general(
        x_ref[...].astype(mxu_dtype), w.astype(mxu_dtype),
        dimension_numbers=(((1,), (1,)), ((), ())),
        preferred_element_type=jnp.float32)

    @pl.when(k == nk - 1)
    def _():
        b = bmu_r_ref[...] + _softplus(brho_r_ref[...]) * beps_r_ref[...]
        out_ref[...] = (acc_ref[...] + b).astype(out_ref.dtype)


def _eval_kernel(x_ref, wmu_ref, bmu_r_ref, out_ref, acc_ref, *, mxu_dtype):
    # mu-only path: no rho/eps reads, no softplus, no KL.
    k = pl.program_id(1)
    nk = pl.num_programs(1)

    @pl.when(k == 0)
    def _():
        acc_ref[...] = jnp.zeros_like(acc_ref)

    acc_ref[...] += lax.dot_general(
        x_ref[...].astype(mxu_dtype), wmu_ref[...].astype(mxu_dtype),
        dimension_numbers=(((1,), (1,)), ((), ())),
        preferred_element_type=jnp.float32)

    @pl.when(k == nk - 1)
    def _():
        out_ref[...] = (acc_ref[...] + bmu_r_ref[...]).astype(out_ref.dtype)


# ---------------------------------------------------------------------------
# Wrappers
# ---------------------------------------------------------------------------
def _pick_tile(dim, candidates=(512, 256, 128)):
    # Largest lane/sublane-aligned tile that evenly divides `dim`; otherwise the
    # whole dim (full-array block is always legal). Tiles kept modest so
    # (4 weight-like inputs x 2 pipeline buffers) stays far under v7x's 64 MiB VMEM.
    for c in candidates:
        if c <= dim and dim % c == 0:
            return c
    return dim


def _common_specs(batch, TN, TK):
    x_spec = pl.BlockSpec((batch, TK), lambda n, k: (0, k))
    w_spec = pl.BlockSpec((TN, TK), lambda n, k: (n, k))
    brow_spec = pl.BlockSpec((1, TN), lambda n, k: (0, n))
    out_spec = pl.BlockSpec((batch, TN), lambda n, k: (0, n))
    return x_spec, w_spec, brow_spec, out_spec


_COMPILER_PARAMS = pltpu.CompilerParams(
    dimension_semantics=("parallel", "arbitrary"))


def prob_linear_train(x, w_mu, w_rho, eps_w, pw_mu,
                      b_mu, b_rho, eps_b, pb_mu, rho_prior,
                      *, mxu_dtype=jnp.float32):
    """Sampled forward + fused Gaussian KL (training path). Returns (out, kl)."""
    batch, K = x.shape
    N = w_mu.shape[0]
    TN, TK = _pick_tile(N), _pick_tile(K)
    grid = (N // TN, K // TK)

    # Prior rho is a constant fill of rho_prior in the module -> two SMEM scalars.
    sigma0 = max(rho_prior, 0.0) + math.log1p(math.exp(-abs(rho_prior)))
    prior_scalars = jnp.array([math.log(sigma0), 1.0 / (sigma0 * sigma0)],
                              jnp.float32)

    b_mu_r, b_rho_r, eps_b_r = (v.reshape(1, N) for v in (b_mu, b_rho, eps_b))
    b_mu_c, b_rho_c, pb_mu_c = (v.reshape(N, 1) for v in (b_mu, b_rho, pb_mu))

    x_spec, w_spec, brow_spec, out_spec = _common_specs(batch, TN, TK)
    bcol_spec = pl.BlockSpec((TN, 1), lambda n, k: (n, 0))
    klrow_spec = pl.BlockSpec((TN, 1), lambda n, k: (n, 0))

    out, kl_rows = pl.pallas_call(
        functools.partial(_train_kernel, mxu_dtype=mxu_dtype),
        grid=grid,
        in_specs=[
            pl.BlockSpec(memory_space=pltpu.MemorySpace.SMEM),  # prior scalars
            x_spec,
            w_spec, w_spec, w_spec, w_spec,                     # w_mu, w_rho, eps_w, pw_mu
            brow_spec, brow_spec, brow_spec,                    # b_mu, b_rho, eps_b (rows)
            bcol_spec, bcol_spec, bcol_spec,                    # b_mu, b_rho, pb_mu (cols)
        ],
        out_specs=[out_spec, klrow_spec],
        out_shape=[
            jax.ShapeDtypeStruct((batch, N), x.dtype),
            jax.ShapeDtypeStruct((N, 1), jnp.float32),
        ],
        scratch_shapes=[pltpu.VMEM((batch, TN), jnp.float32)],
        compiler_params=_COMPILER_PARAMS,
    )(prior_scalars, x, w_mu, w_rho, eps_w, pw_mu,
      b_mu_r, b_rho_r, eps_b_r, b_mu_c, b_rho_c, pb_mu_c)
    return out, jnp.sum(kl_rows)


def prob_linear_sample(x, w_mu, w_rho, eps_w, b_mu, b_rho, eps_b,
                       *, mxu_dtype=jnp.float32):
    """Sampled forward, no KL (sample=True, not training)."""
    batch, K = x.shape
    N = w_mu.shape[0]
    TN, TK = _pick_tile(N), _pick_tile(K)
    grid = (N // TN, K // TK)
    b_mu_r, b_rho_r, eps_b_r = (v.reshape(1, N) for v in (b_mu, b_rho, eps_b))
    x_spec, w_spec, brow_spec, out_spec = _common_specs(batch, TN, TK)
    return pl.pallas_call(
        functools.partial(_sample_kernel, mxu_dtype=mxu_dtype),
        grid=grid,
        in_specs=[x_spec, w_spec, w_spec, w_spec,
                  brow_spec, brow_spec, brow_spec],
        out_specs=out_spec,
        out_shape=jax.ShapeDtypeStruct((batch, N), x.dtype),
        scratch_shapes=[pltpu.VMEM((batch, TN), jnp.float32)],
        compiler_params=_COMPILER_PARAMS,
    )(x, w_mu, w_rho, eps_w, b_mu_r, b_rho_r, eps_b_r)


def prob_linear_eval(x, w_mu, b_mu, *, mxu_dtype=jnp.float32):
    """Deterministic mu-only forward (eval path)."""
    batch, K = x.shape
    N = w_mu.shape[0]
    TN, TK = _pick_tile(N), _pick_tile(K)
    grid = (N // TN, K // TK)
    b_mu_r = b_mu.reshape(1, N)
    x_spec, w_spec, brow_spec, out_spec = _common_specs(batch, TN, TK)
    return pl.pallas_call(
        functools.partial(_eval_kernel, mxu_dtype=mxu_dtype),
        grid=grid,
        in_specs=[x_spec, w_spec, brow_spec],
        out_specs=out_spec,
        out_shape=jax.ShapeDtypeStruct((batch, N), x.dtype),
        scratch_shapes=[pltpu.VMEM((batch, TN), jnp.float32)],
        compiler_params=_COMPILER_PARAMS,
    )(x, w_mu, b_mu_r)


def prob_linear_forward(x, params, eps_w=None, eps_b=None,
                        *, training=False, sample=False, mxu_dtype=jnp.float32):
    """Mirror of ProbLinear.forward. Returns (out, kl_div); kl_div = 0 unless training."""
    if training:
        return prob_linear_train(
            x, params["w_mu"], params["w_rho"], eps_w, params["pw_mu"],
            params["b_mu"], params["b_rho"], eps_b, params["pb_mu"],
            params["rho_prior"], mxu_dtype=mxu_dtype)
    if sample:
        out = prob_linear_sample(
            x, params["w_mu"], params["w_rho"], eps_w,
            params["b_mu"], params["b_rho"], eps_b, mxu_dtype=mxu_dtype)
    else:
        out = prob_linear_eval(x, params["w_mu"], params["b_mu"],
                               mxu_dtype=mxu_dtype)
    return out, jnp.float32(0.0)


# ---------------------------------------------------------------------------
# Parameter init (mirrors ProbLinear.__init__; prior = fixed copy of posterior init,
# prior rho is the constant rho_prior by construction)
# ---------------------------------------------------------------------------
def init_prob_linear(key, in_features, out_features, rho_prior):
    sigma_weights = 1.0 / math.sqrt(in_features)
    w_mu = sigma_weights * jax.random.truncated_normal(
        key, -2.0, 2.0, (out_features, in_features), dtype=jnp.float32)
    b_mu = jnp.zeros((out_features,), jnp.float32)
    w_rho = jnp.full((out_features, in_features), rho_prior, jnp.float32)
    b_rho = jnp.full((out_features,), rho_prior, jnp.float32)
    return dict(w_mu=w_mu, w_rho=w_rho, b_mu=b_mu, b_rho=b_rho,
                pw_mu=w_mu, pb_mu=b_mu, rho_prior=float(rho_prior))


if __name__ == "__main__":
    key = jax.random.PRNGKey(0)
    k_init, k_rho, k_pw, k_pb, k_x, k_ew, k_eb = jax.random.split(key, 7)

    in_features, out_features, batch = 256, 256, 8
    rho_prior = math.log(math.exp(0.1) - 1.0)      # softplus(rho_prior) = 0.1

    p = init_prob_linear(k_init, in_features, out_features, rho_prior)
    # perturb posterior rho and prior mu so the KL check is non-trivial
    p["w_rho"] = p["w_rho"] + 0.1 * jax.random.normal(k_rho, p["w_rho"].shape)
    p["pw_mu"] = p["pw_mu"] + 0.01 * jax.random.normal(k_pw, p["pw_mu"].shape)
    p["pb_mu"] = p["pb_mu"] + 0.01 * jax.random.normal(k_pb, p["pb_mu"].shape)

    x = jax.random.normal(k_x, (batch, in_features), jnp.float32)
    eps_w = jax.random.normal(k_ew, (out_features, in_features), jnp.float32)
    eps_b = jax.random.normal(k_eb, (out_features,), jnp.float32)

    # --- Pallas kernels ---
    out_train, kl = prob_linear_forward(x, p, eps_w, eps_b, training=True)
    out_sample, _ = prob_linear_forward(x, p, eps_w, eps_b, sample=True)
    out_eval, _ = prob_linear_forward(x, p)
    out_bf16, kl_bf16 = prob_linear_forward(x, p, eps_w, eps_b, training=True,
                                            mxu_dtype=jnp.bfloat16)
    jax.block_until_ready((out_train, kl, out_sample, out_eval, out_bf16, kl_bf16))

    # --- pure-JAX reference ---
    sigma_w = jax.nn.softplus(p["w_rho"])
    sigma_b = jax.nn.softplus(p["b_rho"])
    w_s = p["w_mu"] + sigma_w * eps_w
    b_s = p["b_mu"] + sigma_b * eps_b
    ref_sampled = x @ w_s.T + b_s
    ref_eval = x @ p["w_mu"].T + p["b_mu"]
    sigma0 = jax.nn.softplus(jnp.float32(rho_prior))

    def ref_kl_gauss(mu, sig, mu0, sig0):
        b1, b0 = sig * sig, sig0 * sig0
        return 0.5 * (jnp.log(b0 / b1) + (mu - mu0) ** 2 / b0 + b1 / b0 - 1.0)

    ref_kl = (ref_kl_gauss(p["w_mu"], sigma_w, p["pw_mu"], sigma0).sum()
              + ref_kl_gauss(p["b_mu"], sigma_b, p["pb_mu"], sigma0).sum())

    assert jnp.allclose(out_train, ref_sampled, atol=1e-3, rtol=1e-4)
    assert jnp.allclose(out_sample, ref_sampled, atol=1e-3, rtol=1e-4)
    assert jnp.allclose(out_eval, ref_eval, atol=1e-3, rtol=1e-4)
    assert jnp.allclose(kl, ref_kl, atol=1e-2, rtol=1e-3)
    assert jnp.allclose(out_bf16, ref_sampled, atol=2e-1, rtol=2e-2)
    assert jnp.allclose(kl_bf16, ref_kl, atol=1e-2, rtol=1e-3)

    print("KERNEL_OK")
</pallas_src>

<mosaic_0001>
module attributes {stable_mosaic.version = 11 : i64} {
  func.func @_train_kernel(%arg0: i32, %arg1: i32, %arg2: memref<2xf32, #tpu.memory_space<smem>>, %arg3: memref<8x256xf32, #tpu.memory_space<vmem>>, %arg4: memref<256x256xf32, #tpu.memory_space<vmem>>, %arg5: memref<256x256xf32, #tpu.memory_space<vmem>>, %arg6: memref<256x256xf32, #tpu.memory_space<vmem>>, %arg7: memref<256x256xf32, #tpu.memory_space<vmem>>, %arg8: memref<1x256xf32, #tpu.memory_space<vmem>>, %arg9: memref<1x256xf32, #tpu.memory_space<vmem>>, %arg10: memref<1x256xf32, #tpu.memory_space<vmem>>, %arg11: memref<256x1xf32, #tpu.memory_space<vmem>>, %arg12: memref<256x1xf32, #tpu.memory_space<vmem>>, %arg13: memref<256x1xf32, #tpu.memory_space<vmem>>, %arg14: memref<8x256xf32, #tpu.memory_space<vmem>>, %arg15: memref<256x1xf32, #tpu.memory_space<vmem>>, %arg16: memref<8x256xf32, #tpu.memory_space<vmem>>) attributes {dimension_semantics = [#tpu.dimension_semantics<parallel>, #tpu.dimension_semantics<arbitrary>], iteration_bounds = array<i64: 1, 1>, scalar_prefetch = 0 : i64, scratch_operands = 1 : i64, tpu.core_type = #tpu.core_type<tc>, window_params = [{transform_indices = @transform_0, window_bounds = array<i64: 2>}, {transform_indices = @transform_1, window_bounds = array<i64: 8, 256>}, {transform_indices = @transform_2, window_bounds = array<i64: 256, 256>}, {transform_indices = @transform_3, window_bounds = array<i64: 256, 256>}, {transform_indices = @transform_4, window_bounds = array<i64: 256, 256>}, {transform_indices = @transform_5, window_bounds = array<i64: 256, 256>}, {transform_indices = @transform_6, window_bounds = array<i64: 1, 256>}, {transform_indices = @transform_7, window_bounds = array<i64: 1, 256>}, {transform_indices = @transform_8, window_bounds = array<i64: 1, 256>}, {transform_indices = @transform_9, window_bounds = array<i64: 256, 1>}, {transform_indices = @transform_10, window_bounds = array<i64: 256, 1>}, {transform_indices = @transform_11, window_bounds = array<i64: 256, 1>}, {transform_indices = @transform_12, window_bounds = array<i64: 8, 256>}, {transform_indices = @transform_13, window_bounds = array<i64: 256, 1>}]} {
    %c0 = arith.constant 0 : index
    %0 = memref.load %arg2[%c0] : memref<2xf32, #tpu.memory_space<smem>>
    %c1 = arith.constant 1 : index
    %1 = memref.load %arg2[%c1] : memref<2xf32, #tpu.memory_space<smem>>
    %c0_0 = arith.constant 0 : index
    %c0_1 = arith.constant 0 : index
    %2 = vector.load %arg4[%c0_0, %c0_1] : memref<256x256xf32, #tpu.memory_space<vmem>>, vector<256x256xf32>
    %c0_2 = arith.constant 0 : index
    %c0_3 = arith.constant 0 : index
    %3 = vector.load %arg5[%c0_2, %c0_3] : memref<256x256xf32, #tpu.memory_space<vmem>>, vector<256x256xf32>
    %cst = arith.constant 0.000000e+00 : f32
    %4 = vector.broadcast %cst : f32 to vector<256x256xf32>
    %5 = arith.maximumf %3, %4 : vector<256x256xf32>
    %6 = math.absf %3 : vector<256x256xf32>
    %cst_4 = arith.constant 0.000000e+00 : f32
    %7 = vector.broadcast %cst_4 : f32 to vector<256x256xf32>
    %8 = arith.subf %7, %6 : vector<256x256xf32>
    %9 = math.exp %8 : vector<256x256xf32>
    %10 = math.log1p %9 : vector<256x256xf32>
    %11 = arith.addf %5, %10 : vector<256x256xf32>
    %c0_5 = arith.constant 0 : index
    %c0_6 = arith.constant 0 : index
    %12 = vector.load %arg6[%c0_5, %c0_6] : memref<256x256xf32, #tpu.memory_space<vmem>>, vector<256x256xf32>
    %13 = arith.mulf %11, %12 : vector<256x256xf32>
    %14 = arith.addf %2, %13 : vector<256x256xf32>
    %c0_i32 = arith.constant 0 : i32
    %15 = arith.cmpi eq, %arg1, %c0_i32 : i32
    %16 = arith.extui %15 : i1 to i32
    %c0_i32_7 = arith.constant 0 : i32
    %17 = arith.cmpi ne, %16, %c0_i32_7 : i32
    scf.if %17 {
      %cst_27 = arith.constant 0.000000e+00 : f32
      %48 = vector.broadcast %cst_27 : f32 to vector<8x256xf32>
      %c0_28 = arith.constant 0 : index
      %c0_29 = arith.constant 0 : index
      %49 = vector.load %arg16[%c0_28, %c0_29] : memref<8x256xf32, #tpu.memory_space<vmem>>, vector<8x256xf32>
      tpu.vector_store %arg16[%c0_28, %c0_29], %48 {strides = array<i32>} : memref<8x256xf32, #tpu.memory_space<vmem>>, vector<8x256xf32>,
      %c0_30 = arith.constant 0 : index
      %c0_31 = arith.constant 0 : index
      %50 = vector.load %arg12[%c0_30, %c0_31] : memref<256x1xf32, #tpu.memory_space<vmem>>, vector<256x1xf32>
      %cst_32 = arith.constant 0.000000e+00 : f32
      %51 = vector.broadcast %cst_32 : f32 to vector<256x1xf32>
      %52 = arith.maximumf %50, %51 : vector<256x1xf32>
      %53 = math.absf %50 : vector<256x1xf32>
      %cst_33 = arith.constant 0.000000e+00 : f32
      %54 = vector.broadcast %cst_33 : f32 to vector<256x1xf32>
      %55 = arith.subf %54, %53 : vector<256x1xf32>
      %56 = math.exp %55 : vector<256x1xf32>
      %57 = math.log1p %56 : vector<256x1xf32>
      %58 = arith.addf %52, %57 : vector<256x1xf32>
      %c0_34 = arith.constant 0 : index
      %c0_35 = arith.constant 0 : index
      %59 = vector.load %arg11[%c0_34, %c0_35] : memref<256x1xf32, #tpu.memory_space<vmem>>, vector<256x1xf32>
      %c0_36 = arith.constant 0 : index
      %c0_37 = arith.constant 0 : index
      %60 = vector.load %arg13[%c0_36, %c0_37] : memref<256x1xf32, #tpu.memory_space<vmem>>, vector<256x1xf32>
      %61 = arith.subf %59, %60 : vector<256x1xf32>
      %62 = math.log %58 : vector<256x1xf32>
      %63 = vector.broadcast %0 : f32 to vector<256x1xf32>
      %64 = arith.subf %63, %62 : vector<256x1xf32>
      %cst_38 = arith.constant 2.000000e+00 : f32
      %65 = vector.broadcast %cst_38 : f32 to vector<256x1xf32>
      %66 = arith.mulf %65, %64 : vector<256x1xf32>
      %67 = arith.mulf %61, %61 : vector<256x1xf32>
      %68 = arith.mulf %58, %58 : vector<256x1xf32>
      %69 = arith.addf %67, %68 : vector<256x1xf32>
      %70 = vector.broadcast %1 : f32 to vector<256x1xf32>
      %71 = arith.mulf %69, %70 : vector<256x1xf32>
      %72 = arith.addf %66, %71 : vector<256x1xf32>
      %cst_39 = arith.constant 1.000000e+00 : f32
      %73 = vector.broadcast %cst_39 : f32 to vector<256x1xf32>
      %74 = arith.subf %72, %73 : vector<256x1xf32>
      %cst_40 = arith.constant 5.000000e-01 : f32
      %75 = vector.broadcast %cst_40 : f32 to vector<256x1xf32>
      %76 = arith.mulf %75, %74 : vector<256x1xf32>
      %c0_41 = arith.constant 0 : index
      %c0_42 = arith.constant 0 : index
      %77 = vector.load %arg15[%c0_41, %c0_42] : memref<256x1xf32, #tpu.memory_space<vmem>>, vector<256x1xf32>
      tpu.vector_store %arg15[%c0_41, %c0_42], %76 {strides = array<i32>} : memref<256x1xf32, #tpu.memory_space<vmem>>, vector<256x1xf32>,
    } else {
    }
    %c0_8 = arith.constant 0 : index
    %c0_9 = arith.constant 0 : index
    %18 = vector.load %arg16[%c0_8, %c0_9] : memref<8x256xf32, #tpu.memory_space<vmem>>, vector<8x256xf32>
    %c0_10 = arith.constant 0 : index
    %c0_11 = arith.constant 0 : index
    %19 = vector.load %arg3[%c0_10, %c0_11] : memref<8x256xf32, #tpu.memory_space<vmem>>, vector<8x256xf32>
    %cst_12 = arith.constant dense<0.000000e+00> : vector<8x256xf32>
    %20 = tpu.matmul %19, %14, %cst_12 {dimension_numbers = #tpu.dot_dimension_numbers<[1], [1], [0], [0], [0, 0, 1, 0], [], []>} : vector<8x256xf32>, vector<256x256xf32>, vector<8x256xf32> -> vector<8x256xf32>
    %21 = arith.addf %18, %20 : vector<8x256xf32>
    %c0_13 = arith.constant 0 : index
    %c0_14 = arith.constant 0 : index
    %22 = vector.load %arg16[%c0_13, %c0_14] : memref<8x256xf32, #tpu.memory_space<vmem>>, vector<8x256xf32>
    tpu.vector_store %arg16[%c0_13, %c0_14], %21 {strides = array<i32>} : memref<8x256xf32, #tpu.memory_space<vmem>>, vector<8x256xf32>,
    %c0_15 = arith.constant 0 : index
    %c0_16 = arith.constant 0 : index
    %23 = vector.load %arg7[%c0_15, %c0_16] : memref<256x256xf32, #tpu.memory_space<vmem>>, vector<256x256xf32>
    %24 = arith.subf %2, %23 : vector<256x256xf32>
    %25 = math.log %11 : vector<256x256xf32>
    %26 = vector.broadcast %0 : f32 to vector<256x256xf32>
    %27 = arith.subf %26, %25 : vector<256x256xf32>
    %cst_17 = arith.constant 2.000000e+00 : f32
    %28 = vector.broadcast %cst_17 : f32 to vector<256x256xf32>
    %29 = arith.mulf %28, %27 : vector<256x256xf32>
    %30 = arith.mulf %24, %24 : vector<256x256xf32>
    %31 = arith.mulf %11, %11 : vector<256x256xf32>
    %32 = arith.addf %30, %31 : vector<256x256xf32>
    %33 = vector.broadcast %1 : f32 to vector<256x256xf32>
    %34 = arith.mulf %32, %33 : vector<256x256xf32>
    %35 = arith.addf %29, %34 : vector<256x256xf32>
    %cst_18 = arith.constant 1.000000e+00 : f32
    %36 = vector.broadcast %cst_18 : f32 to vector<256x256xf32>
    %37 = arith.subf %35, %36 : vector<256x256xf32>
    %cst_19 = arith.constant 5.000000e-01 : f32
    %38 = vector.broadcast %cst_19 : f32 to vector<256x256xf32>
    %39 = arith.mulf %38, %37 : vector<256x256xf32>
    %c0_20 = arith.constant 0 : index
    %c0_21 = arith.constant 0 : index
    %40 = vector.load %arg15[%c0_20, %c0_21] : memref<256x1xf32, #tpu.memory_space<vmem>>, vector<256x1xf32>
    %cst_22 = arith.constant dense<0.000000e+00> : vector<256xf32>
    %41 = vector.multi_reduction <add>, %39, %cst_22 [1] : vector<256x256xf32> to vector<256xf32>
    %42 = vector.shape_cast %41 : vector<256xf32> to vector<256x1xf32>
    %43 = arith.addf %40, %42 : vector<256x1xf32>
    %c0_23 = arith.constant 0 : index
    %c0_24 = arith.constant 0 : index
    %44 = vector.load %arg15[%c0_23, %c0_24] : memref<256x1xf32, #tpu.memory_space<vmem>>, vector<256x1xf32>
    tpu.vector_store %arg15[%c0_23, %c0_24], %43 {strides = array<i32>} : memref<256x1xf32, #tpu.memory_space<vmem>>, vector<256x1xf32>,
    %c0_i32_25 = arith.constant 0 : i32
    %45 = arith.cmpi eq, %arg1, %c0_i32_25 : i32
    %46 = arith.extui %45 : i1 to i32
    %c0_i32_26 = arith.constant 0 : i32
    %47 = arith.cmpi ne, %46, %c0_i32_26 : i32
    scf.if %47 {
      %c0_27 = arith.constant 0 : index
      %c0_28 = arith.constant 0 : index
      %48 = vector.load %arg8[%c0_27, %c0_28] : memref<1x256xf32, #tpu.memory_space<vmem>>, vector<1x256xf32>
      %c0_29 = arith.constant 0 : index
      %c0_30 = arith.constant 0 : index
      %49 = vector.load %arg9[%c0_29, %c0_30] : memref<1x256xf32, #tpu.memory_space<vmem>>, vector<1x256xf32>
      %cst_31 = arith.constant 0.000000e+00 : f32
      %50 = vector.broadcast %cst_31 : f32 to vector<1x256xf32>
      %51 = arith.maximumf %49, %50 : vector<1x256xf32>
      %52 = math.absf %49 : vector<1x256xf32>
      %cst_32 = arith.constant 0.000000e+00 : f32
      %53 = vector.broadcast %cst_32 : f32 to vector<1x256xf32>
      %54 = arith.subf %53, %52 : vector<1x256xf32>
      %55 = math.exp %54 : vector<1x256xf32>
      %56 = math.log1p %55 : vector<1x256xf32>
      %57 = arith.addf %51, %56 : vector<1x256xf32>
      %c0_33 = arith.constant 0 : index
      %c0_34 = arith.constant 0 : index
      %58 = vector.load %arg10[%c0_33, %c0_34] : memref<1x256xf32, #tpu.memory_space<vmem>>, vector<1x256xf32>
      %59 = arith.mulf %57, %58 : vector<1x256xf32>
      %60 = arith.addf %48, %59 : vector<1x256xf32>
      %c0_35 = arith.constant 0 : index
      %c0_36 = arith.constant 0 : index
      %61 = vector.load %arg16[%c0_35, %c0_36] : memref<8x256xf32, #tpu.memory_space<vmem>>, vector<8x256xf32>
      %62 = vector.broadcast %60 : vector<1x256xf32> to vector<8x256xf32>
      %63 = arith.addf %61, %62 : vector<8x256xf32>
      %c0_37 = arith.constant 0 : index
      %c0_38 = arith.constant 0 : index
      %64 = vector.load %arg14[%c0_37, %c0_38] : memref<8x256xf32, #tpu.memory_space<vmem>>, vector<8x256xf32>
      tpu.vector_store %arg14[%c0_37, %c0_38], %63 {strides = array<i32>} : memref<8x256xf32, #tpu.memory_space<vmem>>, vector<8x256xf32>,
    } else {
    }
    return
  }
  func.func @transform_0(%arg0: i32, %arg1: i32) -> i32 {
    %c0_i32 = arith.constant 0 : i32
    %c0_i32_0 = arith.constant 0 : i32
    return %c0_i32 : i32
  }
  func.func @transform_1(%arg0: i32, %arg1: i32) -> (i32, i32) {
    %c0_i32 = arith.constant 0 : i32
    %c0_i32_0 = arith.constant 0 : i32
    return %c0_i32, %arg1 : i32, i32
  }
  func.func @transform_2(%arg0: i32, %arg1: i32) -> (i32, i32) {
    %c0_i32 = arith.constant 0 : i32
    return %arg0, %arg1 : i32, i32
  }
  func.func @transform_3(%arg0: i32, %arg1: i32) -> (i32, i32) {
    %c0_i32 = arith.constant 0 : i32
    return %arg0, %arg1 : i32, i32
  }
  func.func @transform_4(%arg0: i32, %arg1: i32) -> (i32, i32) {
    %c0_i32 = arith.constant 0 : i32
    return %arg0, %arg1 : i32, i32
  }
  func.func @transform_5(%arg0: i32, %arg1: i32) -> (i32, i32) {
    %c0_i32 = arith.constant 0 : i32
    return %arg0, %arg1 : i32, i32
  }
  func.func @transform_6(%arg0: i32, %arg1: i32) -> (i32, i32) {
    %c0_i32 = arith.constant 0 : i32
    %c0_i32_0 = arith.constant 0 : i32
    return %c0_i32, %arg0 : i32, i32
  }
  func.func @transform_7(%arg0: i32, %arg1: i32) -> (i32, i32) {
    %c0_i32 = arith.constant 0 : i32
    %c0_i32_0 = arith.constant 0 : i32
    return %c0_i32, %arg0 : i32, i32
  }
  func.func @transform_8(%arg0: i32, %arg1: i32) -> (i32, i32) {
    %c0_i32 = arith.constant 0 : i32
    %c0_i32_0 = arith.constant 0 : i32
    return %c0_i32, %arg0 : i32, i32
  }
  func.func @transform_9(%arg0: i32, %arg1: i32) -> (i32, i32) {
    %c0_i32 = arith.constant 0 : i32
    %c0_i32_0 = arith.constant 0 : i32
    return %arg0, %c0_i32 : i32, i32
  }
  func.func @transform_10(%arg0: i32, %arg1: i32) -> (i32, i32) {
    %c0_i32 = arith.constant 0 : i32
    %c0_i32_0 = arith.constant 0 : i32
    return %arg0, %c0_i32 : i32, i32
  }
  func.func @transform_11(%arg0: i32, %arg1: i32) -> (i32, i32) {
    %c0_i32 = arith.constant 0 : i32
    %c0_i32_0 = arith.constant 0 : i32
    return %arg0, %c0_i32 : i32, i32
  }
  func.func @transform_12(%arg0: i32, %arg1: i32) -> (i32, i32) {
    %c0_i32 = arith.constant 0 : i32
    %c0_i32_0 = arith.constant 0 : i32
    return %c0_i32, %arg0 : i32, i32
  }
  func.func @transform_13(%arg0: i32, %arg1: i32) -> (i32, i32) {
    %c0_i32 = arith.constant 0 : i32
    %c0_i32_0 = arith.constant 0 : i32
    return %arg0, %c0_i32 : i32, i32
  }
}

</mosaic_0001>

<bundles_post_ra>
// kernel: tpu_custom_call.1
= control target key start
LH: loop header
LB: loop body
LE: loop exit
PB: predicated region body
PF: predicated region fallthrough
CT: control target
= control target key end

     0   :  { %19 = vsyncpa [#allocation6], 0  ;;  %s7894_s0 = inlined_call_operand.vmem [shape: f32[2], index: 0, kind: input, shape index: {}]   ;;  %s7895_s1 = inlined_call_operand.vmem [shape: f32[8,256], index: 1, kind: input, shape index: {}]   ;;  %s7896_s2 = inlined_call_operand.vmem [shape: f32[256,256], index: 2, kind: input, shape index: {}]   ;;  %s7897_s3 = inlined_call_operand.hbm [shape: f32[256,256], index: 3, kind: input, shape index: {}]   ;;  %s7898_s4 = inlined_call_operand.hbm [shape: f32[256,256], index: 4, kind: input, shape index: {}]   ;;  %s7899_s5 = inlined_call_operand.hbm [shape: f32[256,256], index: 5, kind: input, shape index: {}]   ;;  %s7900_s6 = inlined_call_operand.vmem [shape: f32[1,256], index: 6, kind: input, shape index: {}]   ;;  %s7901_s7 = inlined_call_operand.vmem [shape: f32[1,256], index: 7, kind: input, shape index: {}]   ;;  %s7902_s8 = inlined_call_operand.vmem [shape: f32[1,256], index: 8, kind: input, shape index: {}]   ;;  %s7903_s9 = inlined_call_operand.vmem [shape: f32[256,1], index: 9, kind: input, shape index: {}]   ;;  %s7904_s10 = inlined_call_operand.vmem [shape: f32[256,1], index: 10, kind: input, shape index: {}]   ;;  %s7905_s11 = inlined_call_operand.vmem [shape: f32[256,1], index: 11, kind: input, shape index: {}]   ;;  %s7906_s12 = inlined_call_operand.hbm [shape: f32[8,256], index: 12, kind: output, shape index: {0}]   ;;  %s7907_s13 = inlined_call_operand.vmem [shape: f32[256,1], index: 13, kind: output, shape index: {1}]  }
   0x1   :  { %20 = vsyncpa [#allocation4], 0 }
   0x2   :  { %21 = vsyncpa [#allocation9], 0 }
   0x3   :  { %22 = vsyncpa [#allocation5], 0  ;;  %s29_s27 = sshll.u32 %s7894_s0, 4  ;;  %s4407_s28 = smov [#allocation8]   ;;  %s30_s27 = int_to_ptr.vmem [resolvable:$true] %s29_s27 }
   0x4   :  { %s54_s29 = sshll.u32 %s4407_s28, 4  ;;  %s4299_s15 = scalar_lea.hbm %s7898_s4, 8192  ;;  %s55_s29 = int_to_ptr.vmem [resolvable:$true] %s54_s29 }
   0x5   :  { %p4300_p0 = scmp.ne.s32.totalorder %s7898_s4, %s4299_s15  ;;  %p4303_p1 = scmp.lt.u32.totalorder %s4299_s15, %s7898_s4 }
   0x7   :  { %p4305_p2 = pnand %p4303_p1, %p4300_p0 }
   0x9   :  { %4308 = shalt.err (!%p4305_p2)
}
   0xa   :  { %s4309_s20 = scalar_lea.vmem %s55_s29, 8192  ;;  %p4314_p4 = scmp.lt.s32.totalorder %s55_s29, %s55_s29 }
   0xb   :  { %p4310_p3 = scmp.ne.s32.totalorder %s55_s29, %s4309_s20  ;;  %p4315_p5 = scmp.lt.s32.totalorder %s4309_s20, %s4309_s20 }
   0xd   :  { %p4316_p6 = por %p4315_p5, %p4314_p4 }
   0xf   :  { %p4317_p7 = pnand %p4316_p6, %p4310_p3 }
  0x11   :  { %4320 = shalt.err (!%p4317_p7)
}
  0x12   :  { %s4408_s0 = smov 256   ;;  %s4409_s21 = smov 16  }
  0x13   :  { %60 = dma.hbm_to_vmem [thread:$0]  %s7898_s4, 8192, %s55_s29, [#allocation9], %s4408_s0, %s4408_s0, %s4409_s21  }
  0x14   :  { %s4321_s24 = scalar_lea.vmem %s30_s27, 16  ;;  %p4326_p9 = scmp.lt.s32.totalorder %s30_s27, %s30_s27 }
  0x15   :  { %p4322_p8 = scmp.ne.s32.totalorder %s30_s27, %s4321_s24  ;;  %p4327_p10 = scmp.lt.s32.totalorder %s4321_s24, %s4321_s24 }
  0x17   :  { %p4328_p11 = por %p4327_p10, %p4326_p9 }
  0x19   :  { %p4329_p12 = pnand %p4328_p11, %p4322_p8 }
  0x1b   :  { %4332 = shalt.err (!%p4329_p12)
}
  0x1c   :  { %s4410_s25 = smov [#allocation3]   ;;  %s4411_s26 = smov [#allocation7]  }
  0x1d   :  { %32 = dma.vmem_to_smem %s30_s27, 16, %s4410_s25, [#allocation6]  }
  0x1e   :  { %s42_s28 = sshll.u32 %s4411_s26, 4  ;;  %s4412_s30 = smov [#allocation10]   ;;  %s43_s28 = int_to_ptr.vmem [resolvable:$true] %s42_s28 }
  0x1f   :  { %s66_s14 = sshll.u32 %s4412_s30, 4  ;;  %s4333_s4 = scalar_lea.hbm %s7897_s3, 8192  ;;  %s4502_s14 = int_to_ptr.vmem [resolvable:$true] %s66_s14 }
  0x20   :  { %p4334_p13 = scmp.ne.s32.totalorder %s7897_s3, %s4333_s4  ;;  %p4337_p0 = scmp.lt.u32.totalorder %s4333_s4, %s7897_s3 }
  0x22   :  { %p4339_p1 = pnand %p4337_p0, %p4334_p13 }
  0x24   :  { %4342 = shalt.err (!%p4339_p1)
}
  0x25   :  { %s4343_s27 = scalar_lea.vmem %s43_s28, 8192  ;;  %p4348_p3 = scmp.lt.s32.totalorder %s43_s28, %s43_s28 }
  0x26   :  { %p4344_p2 = scmp.ne.s32.totalorder %s43_s28, %s4343_s27  ;;  %p4349_p4 = scmp.lt.s32.totalorder %s4343_s27, %s4343_s27 }
  0x28   :  { %p4350_p5 = por %p4349_p4, %p4348_p3 }
  0x2a   :  { %p4351_p6 = pnand %p4350_p5, %p4344_p2 }
  0x2c   :  { %4354 = shalt.err (!%p4351_p6)
}
  0x2d   :  { %48 = dma.hbm_to_vmem [thread:$0]  %s7897_s3, 8192, %s43_s28, [#allocation4], %s4408_s0, %s4408_s0, %s4409_s21  }
  0x2e   :  { %s4355_s25 = scalar_lea.hbm %s7899_s5, 8192 }
  0x2f   :  { %p4356_p7 = scmp.ne.s32.totalorder %s7899_s5, %s4355_s25  ;;  %p4359_p8 = scmp.lt.u32.totalorder %s4355_s25, %s7899_s5 }
  0x31   :  { %p4361_p9 = pnand %p4359_p8, %p4356_p7 }
  0x33   :  { %4364 = shalt.err (!%p4361_p9)
}
  0x34   :  { %s4365_s4 = scalar_lea.vmem %s4502_s14, 8192  ;;  %p4370_p11 = scmp.lt.s32.totalorder %s4502_s14, %s4502_s14 }
  0x35   :  { %p4366_p10 = scmp.ne.s32.totalorder %s4502_s14, %s4365_s4  ;;  %p4371_p12 = scmp.lt.s32.totalorder %s4365_s4, %s4365_s4 }
  0x37   :  { %p4372_p13 = por %p4371_p12, %p4370_p11 }
  0x39   :  { %p4373_p0 = pnand %p4372_p13, %p4366_p10 }
  0x3b   :  { %4376 = shalt.err (!%p4373_p0)
}
  0x3c   :  { %72 = dma.hbm_to_vmem [thread:$0]  %s7899_s5, 8192, %s4502_s14, [#allocation9], %s4408_s0, %s4408_s0, %s4409_s21  }
  0x3d   :  { %4399 = dma.done.wait [#allocation6], 16  }
  0x3e   :  { %4400 = vsyncadd [#allocation6], 4294967280 }
  0x3f   :  { %4401 = dma.done.wait [#allocation4], 8192  }
  0x40   :  { %4402 = vsyncadd [#allocation4], 4294959104 }
  0x41   :  { %4403 = dma.done.wait [#allocation9], 16384  }
  0x42   :  { %4404 = vsyncadd [#allocation9], 4294950912 }
  0x43   :  { %97 = sfence }
  0x44   :  { %v4539_v0 = vld [vmem:[#allocation7 + $0x8] sm:$0xff]  ;;  %v4541_v1 = vld [vmem:[#allocation7 + $0x18] sm:$0xff]  ;;  %v4545_v5 = vld [vmem:[#allocation7] sm:$0xff]  ;;  %s6055_s3 = sld [smem:[#allocation3]]  ;;  %s6059_s28 = sld [smem:[#allocation3 + $0x1]] }
  0x45   :  { %v293_v2 = vand.u32 2147483647, %v4539_v0  ;;  %v295_v3 = vand.u32 2147483647, %v4541_v1  ;;  %v4547_v6 = vld [vmem:[#allocation7 + $0x10] sm:$0xff]  ;;  %v4552_v7 = vld [vmem:[%s7896_s2 + $0x8] sm:$0xff] }
  0x46   :  { %v2461_v9 = vld [vmem:[#allocation10 + $0x8] sm:$0xff]  ;;  %v292_v10 = vand.u32 2147483647, %v4545_v5  ;;  %v2463_v12 = vld [vmem:[#allocation10 + $0x18] sm:$0xff]  ;;  %v294_v13 = vand.u32 2147483647, %v4547_v6 }
  0x47   :  { %v357_v4 = vsub.f32 0.0, %v293_v2  ;;  %v359_v8 = vsub.f32 0.0, %v295_v3  ;;  %v2460_v14 = vld [vmem:[#allocation10] sm:$0xff]  ;;  %v4559_v15 = vld [vmem:[%s7896_s2 + $0x18] sm:$0xff]  ;;  %v229_v16 = vmax.f32 %v4539_v0, 0.0  ;;  %v2525_v21 = vsub.f32 %v4552_v7, %v2461_v9  ;;  %v2462_v23 = vld [vmem:[#allocation10 + $0x10] sm:$0xff] }
  0x48   :  { %v4565_v18 = vld [vmem:[%s7896_s2] sm:$0xff]  ;;  %v356_v19 = vsub.f32 0.0, %v292_v10  ;;  %v358_v22 = vsub.f32 0.0, %v294_v13  ;;  %v4569_v24 = vld [vmem:[#allocation7 + $0x28] sm:$0xff]  ;;  %v4571_v25 = vld [vmem:[#allocation7 + $0x38] sm:$0xff]  ;;  %v2527_v26 = vsub.f32 %v4559_v15, %v2463_v12  ;;  %s4413_s15 = smov [#allocation11]  }
  0x49   :  { %v422_v11 = vmul.f32 1.442695, %v357_v4  ;;  %v426_v17 = vmul.f32 1.442695, %v359_v8  ;;  %v2524_v28 = vsub.f32 %v4565_v18, %v2460_v14  ;;  %v4578_v29 = vld [vmem:[%s7896_s2 + $0x10] sm:$0xff]  ;;  %v2465_v32 = vld [vmem:[#allocation10 + $0x28] sm:$0xff]  ;;  %v4588_v39 = vmul.f32 %v2525_v21, %v2525_v21 }
  0x4a   :  { %v420_v27 = vmul.f32 1.442695, %v356_v19  ;;  %v424_v30 = vmul.f32 1.442695, %v358_v22  ;;  %v297_v31 = vand.u32 2147483647, %v4569_v24  ;;  %v2526_v34 = vsub.f32 %v4578_v29, %v2462_v23 }
  0x4b   :  { %3716 = vpow2.f32 %v422_v11  ;;  %v299_v35 = vand.u32 2147483647, %v4571_v25  ;;  %v2467_v36 = vld [vmem:[#allocation10 + $0x38] sm:$0xff]  ;;  %v4584_v37 = vld [vmem:[#allocation7 + $0x20] sm:$0xff]  ;;  %v4586_v38 = vld [vmem:[#allocation7 + $0x30] sm:$0xff]  ;;  %v4591_v42 = vmul.f32 %v2527_v26, %v2527_v26  ;;  %v4593_v43 = vmul.f32 %v2524_v28, %v2524_v28  ;;  %s3533_s16 = sshll.u32 %s4413_s15, 4  ;;  %s3534_s16 = int_to_ptr.vmem [resolvable:$true] %s3533_s16 }
  0x4c   :  { %3718 = vpow2.f32 %v426_v17  ;;  %v361_v41 = vsub.f32 0.0, %v297_v31  ;;  %v4598_v44 = vld [vmem:[%s7896_s2 + $0x28] sm:$0xff]  ;;  %v4603_v45 = vld [vmem:[%s7896_s2 + $0x38] sm:$0xff]  ;;  %v296_v47 = vand.u32 2147483647, %v4584_v37  ;;  %v2464_v52 = vld [vmem:[#allocation10 + $0x20] sm:$0xff]  ;;  %v4609_v53 = vmul.f32 %v2526_v34, %v2526_v34  ;;  %p4382_p2 = scmp.lt.s32.totalorder %s3534_s16, %s3534_s16 }
  0x4d   :  { %3720 = vpow2.f32 %v420_v27  ;;  %v363_v46 = vsub.f32 0.0, %v299_v35  ;;  %v2529_v49 = vsub.f32 %v4598_v44, %v2465_v32  ;;  %v2531_v50 = vsub.f32 %v4603_v45, %v2467_v36  ;;  %v2466_v57 = vld [vmem:[#allocation10 + $0x30] sm:$0xff]  ;;  %v4616_v59 = vld [vmem:[%s7896_s2 + $0x20] sm:$0xff]  ;;  %v4631_v12 = vld [vmem:[#allocation7 + $0x48] sm:$0xff]  ;;  %s4377_s17 = scalar_lea.vmem %s3534_s16, 256 }
  0x4e   :  { %3722 = vpow2.f32 %v424_v30  ;;  %v430_v48 = vmul.f32 1.442695, %v361_v41  ;;  %v298_v51 = vand.u32 2147483647, %v4586_v38  ;;  %v360_v56 = vsub.f32 0.0, %v296_v47  ;;  %v4622_v62 = vld [vmem:[%s7896_s2 + $0x30] sm:$0xff]  ;;  %p4378_p1 = scmp.ne.s32.totalorder %s3534_s16, %s4377_s17  ;;  %p4383_p3 = scmp.lt.s32.totalorder %s4377_s17, %s4377_s17 }
  0x4f   :  { %v434_v55 = vmul.f32 1.442695, %v363_v46  ;;  %v2528_v3 = vsub.f32 %v4616_v59, %v2464_v52  ;;  %v4626_v8 = vmul.f32 %v2529_v49, %v2529_v49  ;;  %v4628_v9 = vmul.f32 %v2531_v50, %v2531_v50  ;;  %v4633_v19 = vld [vmem:[#allocation7 + $0x58] sm:$0xff]  ;;  %v2469_v41 = vld [vmem:[#allocation10 + $0x48] sm:$0xff] }
  0x50   :  { %3724 = vpow2.f32 %v430_v48  ;;  %v362_v61 = vsub.f32 0.0, %v298_v51  ;;  %v428_v2 = vmul.f32 1.442695, %v360_v56  ;;  %v2530_v11 = vsub.f32 %v4622_v62, %v2466_v57  ;;  %v2471_v50 = vld [vmem:[#allocation10 + $0x58] sm:$0xff]  ;;  %p4384_p4 = por %p4383_p3, %p4382_p2 }
  0x51   :  { %3726 = vpow2.f32 %v434_v55  ;;  %v4637_v30 = vmul.f32 %v2528_v3, %v2528_v3  ;;  %v301_v31 = vand.u32 2147483647, %v4631_v12  ;;  %v4645_v55 = vld [vmem:[%s7896_s2 + $0x48] sm:$0xff]  ;;  %v303_v56 = vand.u32 2147483647, %v4633_v19 }
  0x52   :  { %v432_v10 = vmul.f32 1.442695, %v362_v61  ;;  %3728 = vpow2.f32 %v428_v2  ;;  %v4640_v49 = vmul.f32 %v2530_v11, %v2530_v11  ;;  %v4651_v61 = vld [vmem:[%s7896_s2 + $0x58] sm:$0xff]  ;;  %v2533_v3 = vsub.f32 %v4645_v55, %v2469_v41  ;;  %p4385_p5 = pnand %p4384_p4, %p4378_p1 }
  0x53   :  { %v365_v2 = vsub.f32 0.0, %v301_v31  ;;  %v8001_v41 = vmax.f32 %v4547_v6, 0.0 }
  0x54   :  { %3730 = vpow2.f32 %v432_v10 }
  0x55   :  { %v3717_v4 = vpop.eup %3716  ;;  %v438_v63 = vmul.f32 1.442695, %v365_v2 }
  0x56   :  { %v3719_v13 = vpop.eup %3718  ;;  %v557_v14 = vadd.f32 1.0, %v3717_v4  ;;  %v560_v17 = vmul.f32 -0.5, %v3717_v4  ;;  %v563_v28 = vand.u32 2147483647, %v3717_v4 }
  0x57   :  { %v575_v22 = vadd.f32 1.0, %v3719_v13  ;;  %v578_v23 = vmul.f32 -0.5, %v3719_v13  ;;  %v3721_v27 = vpop.eup %3720  ;;  %v581_v35 = vand.u32 2147483647, %v3719_v13 }
  0x58   :  { %3732 = vlog2.f32 %v557_v14  ;;  %v3723_v32 = vpop.eup %3722  ;;  %v561_v34 = vadd.f32 1.0, %v560_v17  ;;  %v548_v36 = vadd.f32 1.0, %v3721_v27  ;;  %v551_v47 = vmul.f32 -0.5, %v3721_v27 }
  0x59   :  { %3734 = vlog2.f32 %v575_v22  ;;  %v579_v46 = vadd.f32 1.0, %v578_v23  ;;  %v566_v48 = vadd.f32 1.0, %v3723_v32  ;;  %v554_v51 = vand.u32 2147483647, %v3721_v27 }
  0x5a   :  { %3736 = vlog2.f32 %v548_v36  ;;  %v569_v52 = vmul.f32 -0.5, %v3723_v32  ;;  %v572_v57 = vand.u32 2147483647, %v3723_v32  ;;  %v3725_v10 = vpop.eup %3724  ;;  %v562_v11 = vmul.f32 %v3717_v4, %v561_v34 }
  0x5b   :  { %3738 = vlog2.f32 %v566_v48  ;;  %vm4654_vm0 = vcmp.lt.f32.partialorder %v563_v28, 0.0004427343  ;;  %vm4658_vm1 = vcmp.lt.f32.partialorder %v581_v35, 0.0004427343  ;;  %v4663_v22 = vsub.f32 %v4651_v61, %v2471_v50  ;;  %v3727_v23 = vpop.eup %3726 }
  0x5c   :  { %v580_v36 = vmul.f32 %v3719_v13, %v579_v46  ;;  %v552_v48 = vadd.f32 1.0, %v551_v47  ;;  %v570_v26 = vadd.f32 1.0, %v569_v52  ;;  %v593_v31 = vadd.f32 1.0, %v3725_v10  ;;  %v4669_v21 = vpop.eup %3728 }
  0x5d   :  { %vm4665_vm2 = vcmp.lt.f32.partialorder %v554_v51, 0.0004427343  ;;  %v596_v4 = vmul.f32 -0.5, %v3725_v10  ;;  %v599_v28 = vand.u32 2147483647, %v3725_v10  ;;  %v611_v34 = vadd.f32 1.0, %v3727_v23 }
  0x5e   :  { %vm4671_vm3 = vcmp.lt.f32.partialorder %v572_v57, 0.0004427343  ;;  %3740 = vlog2.f32 %v593_v31  ;;  %v367_v50 = vsub.f32 0.0, %v303_v56  ;;  %v4675_v13 = vpop.eup %3730  ;;  %v614_v46 = vmul.f32 -0.5, %v3727_v23 }
  0x5f   :  { %3742 = vlog2.f32 %v611_v34  ;;  %v584_v47 = vadd.f32 1.0, %v4669_v21  ;;  %v4678_v51 = vmul.f32 %v2533_v3, %v2533_v3  ;;  %v553_v60 = vmul.f32 %v3721_v27, %v552_v48  ;;  %v1189_v27 = vld [vmem:[#allocation8 + $0x8] sm:$0xff] }
  0x60   :  { %v571_v58 = vmul.f32 %v3723_v32, %v570_v26  ;;  %v617_v54 = vand.u32 2147483647, %v3727_v23  ;;  %v602_v57 = vadd.f32 1.0, %v4675_v13  ;;  %v597_v20 = vadd.f32 1.0, %v596_v4 }
  0x61   :  { %7993 = vst [vmem:[#allocation16_spill] sm:$0xff] %v4678_v51  ;;  %vm4681_vm4 = vcmp.lt.f32.partialorder %v599_v28, 0.0004427343  ;;  %3744 = vlog2.f32 %v584_v47  ;;  %v587_v31 = vmul.f32 -0.5, %v4669_v21  ;;  %v442_v3 = vmul.f32 1.442695, %v367_v50 }
  0x62   :  { %v3733_v52 = vpop.eup %3732  ;;  %3746 = vlog2.f32 %v602_v57  ;;  %v615_v32 = vadd.f32 1.0, %v614_v46  ;;  %v605_v48 = vmul.f32 -0.5, %v4675_v13  ;;  %v1191_v47 = vld [vmem:[#allocation8 + $0x18] sm:$0xff]  ;;  %vm4695_vm5 = vcmp.lt.f32.partialorder %v617_v54, 0.0004427343 }
  0x63   :  { %v3735_v40 = vpop.eup %3734  ;;  %v559_v33 = vmul.f32 0.6931472, %v3733_v52  ;;  %3748 = vpow2.f32 %v438_v63  ;;  %v598_v63 = vmul.f32 %v3725_v10, %v597_v20  ;;  %v590_v46 = vand.u32 2147483647, %v4669_v21  ;;  %v1190_v20 = vld [vmem:[#allocation8 + $0x10] sm:$0xff] }
  0x64   :  { %v577_v2 = vmul.f32 0.6931472, %v3735_v40  ;;  %v3737_v34 = vpop.eup %3736  ;;  %3750 = vpow2.f32 %v442_v3  ;;  %v606_v10 = vadd.f32 1.0, %v605_v48  ;;  %v608_v3 = vand.u32 2147483647, %v4675_v13 }
  0x65   :  { %v565_v26 = vsel %vm4654_vm0, %v562_v11, %v559_v33  ;;  %v3739_v4 = vpop.eup %3738  ;;  %v550_v52 = vmul.f32 0.6931472, %v3737_v34  ;;  %v7998_v33 = vmax.f32 %v4541_v1, 0.0  ;;  %v8000_v1 = vmax.f32 %v4545_v5, 0.0 }
  0x66   :  { %v583_v28 = vsel %vm4658_vm1, %v580_v36, %v577_v2  ;;  %v4693_v40 = vadd.f32 %v565_v26, %v229_v16  ;;  %v568_v14 = vmul.f32 0.6931472, %v3739_v4  ;;  %v1188_v16 = vld [vmem:[#allocation8] sm:$0xff]  ;;  %v588_v36 = vadd.f32 1.0, %v587_v31  ;;  %v4771_v4 = vld [vmem:[#allocation7 + $0x50] sm:$0xff] }
  0x67   :  { %v4701_v11 = vadd.f32 %v583_v28, %v7998_v33  ;;  %v556_v0 = vsel %vm4665_vm2, %v553_v60, %v550_v52  ;;  %v616_v31 = vmul.f32 %v3727_v23, %v615_v32  ;;  %vm4722_vm6 = vcmp.lt.f32.partialorder %v590_v46, 0.0004427343  ;;  %v1193_v52 = vld [vmem:[#allocation8 + $0x28] sm:$0xff] }
  0x68   :  { %v1253_v17 = vmul.f32 %v1189_v27, %v4693_v40  ;;  %v574_v57 = vsel %vm4671_vm3, %v571_v58, %v568_v14  ;;  %v4712_v2 = vadd.f32 %v556_v0, %v8000_v1  ;;  %v3741_v34 = vpop.eup %3740  ;;  %v589_v23 = vmul.f32 %v4669_v21, %v588_v36  ;;  %v1195_v21 = vld [vmem:[#allocation8 + $0x38] sm:$0xff] }
  0x69   :  { %7999 = vst [vmem:[#allocation17_spill] sm:$0xff] %v4701_v11  ;;  %v1255_v54 = vmul.f32 %v1191_v47, %v4701_v11  ;;  %v4717_v60 = vadd.f32 %v574_v57, %v8001_v41  ;;  %v3743_v27 = vpop.eup %3742  ;;  %v595_v5 = vmul.f32 0.6931472, %v3741_v34  ;;  %v607_v33 = vmul.f32 %v4675_v13, %v606_v10  ;;  %v1194_v41 = vld [vmem:[#allocation8 + $0x30] sm:$0xff] }
  0x6a   :  { %v1317_v26 = vadd.f32 %v1253_v17, %v4552_v7  ;;  %v1252_v58 = vmul.f32 %v1188_v16, %v4712_v2  ;;  %v2910_v7 = vmul.f32 %v4693_v40, %v4693_v40  ;;  %v613_v48 = vmul.f32 0.6931472, %v3743_v27 }
  0x6b   :  { %v1319_v35 = vadd.f32 %v1255_v54, %v4559_v15  ;;  %v1254_v6 = vmul.f32 %v1190_v20, %v4717_v60  ;;  %v3745_v32 = vpop.eup %3744  ;;  %v601_v15 = vsel %vm4681_vm4, %v598_v63, %v595_v5  ;;  %v8004_v0 = vmax.f32 %v4569_v24, 0.0  ;;  %v4755_v20 = vld [vmem:[#allocation7 + $0x40] sm:$0xff] }
  0x6c   :  { %v1316_v47 = vadd.f32 %v1252_v58, %v4565_v18  ;;  %v3747_v14 = vpop.eup %3746  ;;  %v619_v17 = vsel %vm4695_vm5, %v616_v31, %v613_v48  ;;  %vm4741_vm7 = vcmp.lt.f32.partialorder %v608_v3, 0.0004427343  ;;  %v2912_v13 = vmul.f32 %v4701_v11, %v4701_v11 }
  0x6d   :  { %v3645_v28 = vpack.c.bf16 %v1319_v35, %v1317_v26  ;;  %v1318_v46 = vadd.f32 %v1254_v6, %v4578_v29  ;;  %v4739_v16 = vadd.f32 %v601_v15, %v8004_v0  ;;  %v3749_v18 = vpop.eup %3748  ;;  %v8007_v56 = vmax.f32 %v4571_v25, 0.0  ;;  %v1192_v26 = vld [vmem:[#allocation8 + $0x20] sm:$0xff]  ;;  %v4789_v0 = vld [vmem:[#allocation7 + $0x68] sm:$0xff] }
  0x6e   :  { %v586_v50 = vmul.f32 0.6931472, %v3745_v32  ;;  %v604_v63 = vmul.f32 0.6931472, %v3747_v14  ;;  %v4752_v24 = vadd.f32 %v2910_v7, %v4588_v39  ;;  %v629_v1 = vadd.f32 1.0, %v3749_v18  ;;  %v3751_v3 = vpop.eup %3750 }
  0x6f   :  { %3646 = vmatprep.subr.bf16.mxu0 %v3645_v28  ;;  %v4749_v29 = vadd.f32 %v619_v17, %v8007_v56  ;;  %v3647_v54 = vpack.c.bf16 %v1318_v46, %v1316_v47  ;;  %v1257_v57 = vmul.f32 %v1193_v52, %v4739_v16  ;;  %v632_v31 = vmul.f32 -0.5, %v3749_v18  ;;  %v2468_v46 = vld [vmem:[#allocation10 + $0x40] sm:$0xff]  ;;  %v2470_v17 = vld [vmem:[#allocation10 + $0x50] sm:$0xff] }
  0x70   :  { %v592_v34 = vsel %vm4722_vm6, %v589_v23, %v586_v50  ;;  %v610_v25 = vsel %vm4741_vm7, %v607_v33, %v604_v63  ;;  %v8008_v27 = vmax.f32 %v4584_v37, 0.0  ;;  %v8009_v58 = vmax.f32 %v4586_v38, 0.0  ;;  %v4791_v63 = vld [vmem:[#allocation7 + $0x78] sm:$0xff] }
  0x71   :  { %v1259_v10 = vmul.f32 %v1195_v21, %v4749_v29  ;;  %3648 = vmatpush1.bf16.xpose.msra.mxu0 %v3647_v54  ;;  %v1321_v39 = vadd.f32 %v1257_v57, %v4598_v44  ;;  %3752 = vlog2.f32 %v629_v1  ;;  %v2911_v7 = vmul.f32 %v4717_v60, %v4717_v60  ;;  %v4808_v57 = vld [vmem:[#allocation7 + $0x60] sm:$0xff]  ;;  %v4906_v54 = vld [vmem:[#allocation7 + $0x90] sm:$0xff] }
  0x72   :  { %v4765_v35 = vadd.f32 %v592_v34, %v8008_v27  ;;  %v4769_v5 = vadd.f32 %v610_v25, %v8009_v58  ;;  %v647_v48 = vadd.f32 1.0, %v3751_v3  ;;  %v300_v23 = vand.u32 2147483647, %v4755_v20 }
  0x73   :  { %v1323_v6 = vadd.f32 %v1259_v10, %v4603_v45  ;;  %v635_v32 = vand.u32 2147483647, %v3749_v18  ;;  %v650_v28 = vmul.f32 -0.5, %v3751_v3  ;;  %v633_v47 = vadd.f32 1.0, %v632_v31 }
  0x74   :  { %v1256_v44 = vmul.f32 %v1192_v26, %v4765_v35  ;;  %v1258_v37 = vmul.f32 %v1194_v41, %v4769_v5  ;;  %3754 = vlog2.f32 %v647_v48  ;;  %v302_v15 = vand.u32 2147483647, %v4771_v4 }
  0x75   :  { %v3649_v38 = vpack.c.bf16 %v1323_v6, %v1321_v39  ;;  %v4781_v52 = vadd.f32 %v2912_v13, %v4591_v42  ;;  %v4787_v14 = vmul.f32 %v4663_v22, %v4663_v22  ;;  %v651_v21 = vadd.f32 1.0, %v650_v28  ;;  %v4804_v22 = vld [vmem:[%s7896_s2 + $0x50] sm:$0xff] }
  0x76   :  { %v1320_v33 = vadd.f32 %v1256_v44, %v4616_v59  ;;  %v1322_v45 = vadd.f32 %v1258_v37, %v4622_v62  ;;  %v653_v36 = vand.u32 2147483647, %v3751_v3  ;;  %v364_v56 = vsub.f32 0.0, %v300_v23  ;;  %v4799_v62 = vld [vmem:[%s7896_s2 + $0x40] sm:$0xff]  ;;  %v4818_v39 = vld [vmem:[#allocation7 + $0x70] sm:$0xff]  ;;  %v2473_v44 = vld [vmem:[#allocation10 + $0x68] sm:$0xff] }
  0x77   :  { %8010 = vst [vmem:[#allocation18_spill] sm:$0xff] %v4781_v52  ;;  %8011 = vst [vmem:[#allocation19_spill] sm:$0xff] %v4787_v14  ;;  %3650 = vmatprep.subr.bf16.mxu0 %v3649_v38  ;;  %v366_v50 = vsub.f32 0.0, %v302_v15  ;;  %v4794_v42 = vadd.f32 %v2911_v7, %v4609_v53  ;;  %v634_v1 = vmul.f32 %v3749_v18, %v633_v47  ;;  %vm4810_vm8 = vcmp.lt.f32.partialorder %v635_v32, 0.0004427343  ;;  %v2475_v37 = vld [vmem:[#allocation10 + $0x78] sm:$0xff] }
  0x78   :  { %v3651_v59 = vpack.c.bf16 %v1322_v45, %v1320_v33  ;;  %v436_v10 = vmul.f32 1.442695, %v364_v56  ;;  %v2532_v25 = vsub.f32 %v4799_v62, %v2468_v46  ;;  %v2534_v26 = vsub.f32 %v4804_v22, %v2470_v17  ;;  %v4835_v33 = vld [vmem:[%s7896_s2 + $0x68] sm:$0xff]  ;;  %v2472_v17 = vld [vmem:[#allocation10 + $0x60] sm:$0xff]  ;;  %v4981_v52 = vld [vmem:[%s7896_s2 + $0x90] sm:$0xff] }
  0x79   :  { %8012 = vst [vmem:[#allocation20_spill] sm:$0xff] %v4794_v42  ;;  %v440_v34 = vmul.f32 1.442695, %v366_v50  ;;  %v305_v41 = vand.u32 2147483647, %v4789_v0  ;;  %v652_v27 = vmul.f32 %v3751_v3, %v651_v21  ;;  %v1197_v56 = vld [vmem:[#allocation8 + $0x48] sm:$0xff] }
  0x7a   :  { %3652 = vmatpush1.bf16.xpose.msra.mxu0 %v3651_v59  ;;  %v307_v31 = vand.u32 2147483647, %v4791_v63  ;;  %vm4820_vm9 = vcmp.lt.f32.partialorder %v653_v36, 0.0004427343  ;;  %3756 = vpow2.f32 %v436_v10  ;;  %v304_v58 = vand.u32 2147483647, %v4808_v57 }
  0x7b   :  { %v3753_v7 = vpop.eup %3752  ;;  %3758 = vpow2.f32 %v440_v34  ;;  %v369_v48 = vsub.f32 0.0, %v305_v41  ;;  %v306_v3 = vand.u32 2147483647, %v4818_v39  ;;  %v4828_v47 = vmul.f32 %v2532_v25, %v2532_v25  ;;  %v4842_v50 = vld [vmem:[%s7896_s2 + $0x78] sm:$0xff]  ;;  %v4845_v25 = vld [vmem:[#allocation7 + $0x88] sm:$0xff]  ;;  %v4855_v53 = vld [vmem:[%s7896_s2 + $0x60] sm:$0xff] }
  0x7c   :  { %v371_v23 = vsub.f32 0.0, %v307_v31  ;;  %v631_v32 = vmul.f32 0.6931472, %v3753_v7  ;;  %v368_v38 = vsub.f32 0.0, %v304_v58  ;;  %v4830_v15 = vmul.f32 %v2534_v26, %v2534_v26  ;;  %v2474_v58 = vld [vmem:[#allocation10 + $0x70] sm:$0xff]  ;;  %v4857_v7 = vld [vmem:[#allocation7 + $0x98] sm:$0xff] }
  0x7d   :  { %8017 = vst [vmem:[#allocation21_spill] sm:$0xff] %v4828_v47  ;;  %v446_v45 = vmul.f32 1.442695, %v369_v48  ;;  %v2537_v59 = vsub.f32 %v4835_v33, %v2473_v44  ;;  %v370_v10 = vsub.f32 0.0, %v306_v3  ;;  %v8019_v41 = vmax.f32 %v4631_v12, 0.0  ;;  %v4867_v3 = vld [vmem:[%s7896_s2 + $0x70] sm:$0xff] }
  0x7e   :  { %8018 = vst [vmem:[#allocation22_spill] sm:$0xff] %v4830_v15  ;;  %v450_v46 = vmul.f32 1.442695, %v371_v23  ;;  %v3755_v21 = vpop.eup %3754  ;;  %v637_v36 = vsel %vm4810_vm8, %v634_v1, %v631_v32  ;;  %v444_v34 = vmul.f32 1.442695, %v368_v38  ;;  %v2539_v1 = vsub.f32 %v4842_v50, %v2475_v37  ;;  %v1199_v32 = vld [vmem:[#allocation8 + $0x58] sm:$0xff] }
  0x7f   :  { %v649_v26 = vmul.f32 0.6931472, %v3755_v21  ;;  %v4849_v31 = vadd.f32 %v637_v36, %v8019_v41  ;;  %3760 = vpow2.f32 %v446_v45  ;;  %v448_v23 = vmul.f32 1.442695, %v370_v10  ;;  %v2477_v18 = vld [vmem:[#allocation10 + $0x88] sm:$0xff] }
  0x80   :  { %3762 = vpow2.f32 %v450_v46  ;;  %v2536_v44 = vsub.f32 %v4855_v53, %v2472_v17  ;;  %v309_v38 = vand.u32 2147483647, %v4845_v25  ;;  %v8021_v45 = vmax.f32 %v4633_v19, 0.0  ;;  %v4886_v41 = vld [vmem:[%s7896_s2 + $0x88] sm:$0xff] }
  0x81   :  { %8020 = vst [vmem:[#allocation23_spill] sm:$0xff] %v4849_v31  ;;  %v655_v12 = vsel %vm4820_vm9, %v652_v27, %v649_v26  ;;  %v1261_v37 = vmul.f32 %v1197_v56, %v4849_v31  ;;  %3764 = vpow2.f32 %v444_v34  ;;  %v2538_v17 = vsub.f32 %v4867_v3, %v2474_v58  ;;  %v2479_v56 = vld [vmem:[#allocation10 + $0x98] sm:$0xff] }
  0x82   :  { %v4872_v46 = vadd.f32 %v655_v12, %v8021_v45  ;;  %3766 = vpow2.f32 %v448_v23  ;;  %v311_v27 = vand.u32 2147483647, %v4857_v7  ;;  %v4876_v21 = vmul.f32 %v2537_v59, %v2537_v59 }
  0x83   :  { %v4878_v36 = vmul.f32 %v2539_v1, %v2539_v1  ;;  %v373_v10 = vsub.f32 0.0, %v309_v38  ;;  %v1325_v19 = vadd.f32 %v1261_v37, %v4645_v55  ;;  %v4889_v1 = vmul.f32 %v2536_v44, %v2536_v44 }
  0x84   :  { %8022 = vst [vmem:[#allocation24_spill] sm:$0xff] %v4872_v46  ;;  %8023 = vst [vmem:[#allocation25_spill] sm:$0xff] %v4876_v21  ;;  %v3757_v34 = vpop.eup %3756  ;;  %v1263_v26 = vmul.f32 %v1199_v32, %v4872_v46  ;;  %v375_v23 = vsub.f32 0.0, %v311_v27  ;;  %v2541_v38 = vsub.f32 %v4886_v41, %v2477_v18  ;;  %v4893_v37 = vmul.f32 %v2538_v17, %v2538_v17  ;;  %v4898_v27 = vld [vmem:[%s7896_s2 + $0x98] sm:$0xff] }
  0x85   :  { %8024 = vst [vmem:[#allocation26_spill] sm:$0xff] %v4878_v36  ;;  %v3759_v59 = vpop.eup %3758  ;;  %v620_v12 = vadd.f32 1.0, %v3757_v34  ;;  %8025 = vst [vmem:[#allocation27_spill] sm:$0xff] %v4889_v1  ;;  %v454_v45 = vmul.f32 1.442695, %v373_v10  ;;  %v623_v48 = vmul.f32 -0.5, %v3757_v34  ;;  %v2543_v18 = vsub.f32 %v4898_v27, %v2479_v56 }
  0x86   :  { %v1327_v32 = vadd.f32 %v1263_v26, %v4651_v61  ;;  %v638_v55 = vadd.f32 1.0, %v3759_v59  ;;  %8026 = vst [vmem:[#allocation28_spill] sm:$0xff] %v4893_v37  ;;  %v626_v28 = vand.u32 2147483647, %v3757_v34  ;;  %v458_v58 = vmul.f32 1.442695, %v375_v23 }
  0x87   :  { %3768 = vlog2.f32 %v620_v12  ;;  %v641_v6 = vmul.f32 -0.5, %v3759_v59  ;;  %v4902_v61 = vld [vmem:[#allocation7 + $0x80] sm:$0xff]  ;;  %v644_v17 = vand.u32 2147483647, %v3759_v59  ;;  %v4904_v12 = vmul.f32 %v2541_v38, %v2541_v38 }
  0x88   :  { %v3653_v10 = vpack.c.bf16 %v1327_v32, %v1325_v19  ;;  %3770 = vlog2.f32 %v638_v55  ;;  %v624_v44 = vadd.f32 1.0, %v623_v48  ;;  %vm4910_vm10 = vcmp.lt.f32.partialorder %v626_v28, 0.0004427343 }
  0x89   :  { %v3761_v26 = vpop.eup %3760  ;;  %3772 = vpow2.f32 %v454_v45  ;;  %8027 = vst [vmem:[#allocation29_spill] sm:$0xff] %v4904_v12  ;;  %v642_v12 = vadd.f32 1.0, %v641_v6  ;;  %v308_v13 = vand.u32 2147483647, %v4902_v61  ;;  %vm4915_vm11 = vcmp.lt.f32.partialorder %v644_v17, 0.0004427343 }
  0x8a   :  { %v3763_v21 = vpop.eup %3762  ;;  %3654 = vmatprep.subr.bf16.mxu0 %v3653_v10  ;;  %v665_v23 = vadd.f32 1.0, %v3761_v26  ;;  %v668_v19 = vmul.f32 -0.5, %v3761_v26  ;;  %3774 = vpow2.f32 %v458_v58  ;;  %v671_v10 = vand.u32 2147483647, %v3761_v26 }
  0x8b   :  { %v3765_v55 = vpop.eup %3764  ;;  %v683_v1 = vadd.f32 1.0, %v3763_v21  ;;  %v686_v45 = vmul.f32 -0.5, %v3763_v21  ;;  %v689_v37 = vand.u32 2147483647, %v3763_v21  ;;  %v625_v47 = vmul.f32 %v3757_v34, %v624_v44 }
  0x8c   :  { %v3767_v38 = vpop.eup %3766  ;;  %3776 = vlog2.f32 %v665_v23  ;;  %v656_v36 = vadd.f32 1.0, %v3765_v55  ;;  %v659_v32 = vmul.f32 -0.5, %v3765_v55  ;;  %v669_v28 = vadd.f32 1.0, %v668_v19 }
  0x8d   :  { %3778 = vlog2.f32 %v683_v1  ;;  %v674_v51 = vadd.f32 1.0, %v3767_v38  ;;  %v687_v31 = vadd.f32 1.0, %v686_v45  ;;  %v662_v58 = vand.u32 2147483647, %v3765_v55 }
  0x8e   :  { %3780 = vlog2.f32 %v656_v36  ;;  %v677_v14 = vmul.f32 -0.5, %v3767_v38  ;;  %v660_v6 = vadd.f32 1.0, %v659_v32  ;;  %v310_v23 = vand.u32 2147483647, %v4906_v54 }
  0x8f   :  { %3782 = vlog2.f32 %v674_v51  ;;  %v372_v15 = vsub.f32 0.0, %v308_v13  ;;  %v643_v46 = vmul.f32 %v3759_v59, %v642_v12  ;;  %vm4920_vm12 = vcmp.lt.f32.partialorder %v671_v10, 0.0004427343  ;;  %v2476_v10 = vld [vmem:[#allocation10 + $0x80] sm:$0xff] }
  0x90   :  { %v680_v1 = vand.u32 2147483647, %v3767_v38  ;;  %v4924_v19 = vmul.f32 %v2543_v18, %v2543_v18  ;;  %v670_v34 = vmul.f32 %v3761_v26, %v669_v28  ;;  %vm4926_vm13 = vcmp.lt.f32.partialorder %v689_v37, 0.0004427343 }
  0x91   :  { %v3769_v17 = vpop.eup %3768  ;;  %v452_v51 = vmul.f32 1.442695, %v372_v15  ;;  %v688_v45 = vmul.f32 %v3763_v21, %v687_v31  ;;  %vm4932_vm14 = vcmp.lt.f32.partialorder %v662_v58, 0.0004427343  ;;  %v678_v12 = vadd.f32 1.0, %v677_v14  ;;  %v1198_v58 = vld [vmem:[#allocation8 + $0x50] sm:$0xff] }
  0x92   :  { %8034 = vst [vmem:[#allocation30_spill] sm:$0xff] %v4924_v19  ;;  %v3771_v36 = vpop.eup %3770  ;;  %v622_v42 = vmul.f32 0.6931472, %v3769_v17  ;;  %v1196_v17 = vld [vmem:[#allocation8 + $0x40] sm:$0xff]  ;;  %v661_v26 = vmul.f32 %v3765_v55, %v660_v6  ;;  %v374_v28 = vsub.f32 0.0, %v310_v23  ;;  %v8039_v31 = vmax.f32 %v4755_v20, 0.0 }
  0x93   :  { %v4930_v32 = vpop.eup %3772  ;;  %v640_v13 = vmul.f32 0.6931472, %v3771_v36  ;;  %vm4947_vm15 = vcmp.lt.f32.partialorder %v680_v1, 0.0004427343  ;;  %3784 = vpow2.f32 %v452_v51  ;;  %v8042_v55 = vmax.f32 %v4771_v4, 0.0 }
  0x94   :  { %v628_v18 = vsel %vm4910_vm10, %v625_v47, %v622_v42  ;;  %v701_v37 = vadd.f32 1.0, %v4930_v32  ;;  %v4939_v19 = vpop.eup %3774  ;;  %v4954_v42 = vld [vmem:[%s7896_s2 + $0x80] sm:$0xff]  ;;  %v704_v20 = vmul.f32 -0.5, %v4930_v32  ;;  %v679_v1 = vmul.f32 %v3767_v38, %v678_v12 }
  0x95   :  { %v646_v15 = vsel %vm4915_vm11, %v643_v46, %v640_v13  ;;  %v4945_v21 = vadd.f32 %v628_v18, %v8039_v31  ;;  %v4962_v46 = vsub.f32 %v4954_v42, %v2476_v10  ;;  %v719_v36 = vadd.f32 1.0, %v4939_v19 }
  0x96   :  { %v3777_v47 = vpop.eup %3776  ;;  %v4958_v56 = vadd.f32 %v646_v15, %v8042_v55  ;;  %3786 = vlog2.f32 %v701_v37  ;;  %v722_v4 = vmul.f32 -0.5, %v4939_v19  ;;  %v456_v15 = vmul.f32 1.442695, %v374_v28  ;;  %v2478_v37 = vld [vmem:[#allocation10 + $0x90] sm:$0xff]  ;;  %v1201_v55 = vld [vmem:[#allocation8 + $0x68] sm:$0xff]  ;;  %v1203_v28 = vld [vmem:[#allocation8 + $0x78] sm:$0xff] }
  0x97   :  { %v3779_v48 = vpop.eup %3778  ;;  %v1260_v6 = vmul.f32 %v1196_v17, %v4945_v21  ;;  %v667_v23 = vmul.f32 0.6931472, %v3777_v47  ;;  %3788 = vlog2.f32 %v719_v36  ;;  %v725_v14 = vand.u32 2147483647, %v4939_v19 }
  0x98   :  { %v3781_v13 = vpop.eup %3780  ;;  %v1262_v51 = vmul.f32 %v1198_v58, %v4958_v56  ;;  %v685_v18 = vmul.f32 0.6931472, %v3779_v48  ;;  %v8043_v58 = vmax.f32 %v4789_v0, 0.0  ;;  %v705_v48 = vadd.f32 1.0, %v704_v20 }
  0x99   :  { %v1324_v31 = vadd.f32 %v1260_v6, %v4799_v62  ;;  %v673_v10 = vsel %vm4920_vm12, %v670_v34, %v667_v23  ;;  %v658_v11 = vmul.f32 0.6931472, %v3781_v13  ;;  %v3783_v17 = vpop.eup %3782  ;;  %v8045_v62 = vmax.f32 %v4791_v63, 0.0  ;;  %v4998_v63 = vld [vmem:[#allocation7 + $0xb8] sm:$0xff] }
  0x9a   :  { %v1326_v38 = vadd.f32 %v1262_v51, %v4804_v22  ;;  %v691_v12 = vsel %vm4926_vm13, %v688_v45, %v685_v18  ;;  %v4976_v47 = vadd.f32 %v673_v10, %v8043_v58  ;;  %v676_v44 = vmul.f32 0.6931472, %v3783_v17  ;;  %v1200_v45 = vld [vmem:[#allocation8 + $0x60] sm:$0xff]  ;;  %v4996_v51 = vld [vmem:[#allocation7 + $0xa8] sm:$0xff] }
  0x9b   :  { %v4985_v34 = vadd.f32 %v691_v12, %v8045_v62  ;;  %v664_v22 = vsel %vm4932_vm14, %v661_v26, %v658_v11  ;;  %v2542_v0 = vsub.f32 %v4981_v52, %v2478_v37  ;;  %v8046_v20 = vmax.f32 %v4808_v57, 0.0  ;;  %v1202_v26 = vld [vmem:[#allocation8 + $0x70] sm:$0xff]  ;;  %v5054_v12 = vld [vmem:[%s7896_s2 + $0xa8] sm:$0xff] }
  0x9c   :  { %8044 = vst [vmem:[#allocation31_spill] sm:$0xff] %v4976_v47  ;;  %v3655_v6 = vpack.c.bf16 %v1326_v38, %v1324_v31  ;;  %v1265_v23 = vmul.f32 %v1201_v55, %v4976_v47  ;;  %v707_v13 = vand.u32 2147483647, %v4930_v32  ;;  %v682_v11 = vsel %vm4947_vm15, %v679_v1, %v676_v44 }
  0x9d   :  { %v4993_v36 = vadd.f32 %v664_v22, %v8046_v20  ;;  %v1267_v59 = vmul.f32 %v1203_v28, %v4985_v34  ;;  %v723_v18 = vadd.f32 1.0, %v722_v4  ;;  %3790 = vpow2.f32 %v456_v15  ;;  %v3785_v17 = vpop.eup %3784 }
  0x9e   :  { %3656 = vmatpush1.bf16.xpose.msra.mxu0 %v3655_v6  ;;  %v1329_v37 = vadd.f32 %v1265_v23, %v4835_v33  ;;  %v8048_v57 = vmax.f32 %v4818_v39, 0.0  ;;  %v706_v55 = vmul.f32 %v4930_v32, %v705_v48  ;;  %v313_v1 = vand.u32 2147483647, %v4996_v51  ;;  %v1205_v23 = vld [vmem:[#allocation8 + $0x88] sm:$0xff] }
  0x9f   :  { %8047 = vst [vmem:[#allocation32_spill] sm:$0xff] %v4993_v36  ;;  %v1264_v10 = vmul.f32 %v1200_v45, %v4993_v36  ;;  %v1331_v38 = vadd.f32 %v1267_v59, %v4842_v50  ;;  %v315_v4 = vand.u32 2147483647, %v4998_v63  ;;  %vm5016_vm0 = vcmp.lt.f32.partialorder %v707_v13, 0.0004427343 }
  0xa0   :  { %v5006_v31 = vadd.f32 %v682_v11, %v8048_v57  ;;  %v3787_v15 = vpop.eup %3786  ;;  %v692_v58 = vadd.f32 1.0, %v3785_v17  ;;  %v724_v50 = vmul.f32 %v4939_v19, %v723_v18  ;;  %v377_v48 = vsub.f32 0.0, %v313_v1  ;;  %v5037_v18 = vld [vmem:[#allocation7 + $0xa0] sm:$0xff] }
  0xa1   :  { %v1328_v39 = vadd.f32 %v1264_v10, %v4855_v53  ;;  %v3657_v32 = vpack.c.bf16 %v1331_v38, %v1329_v37  ;;  %v703_v28 = vmul.f32 0.6931472, %v3787_v15  ;;  %v695_v22 = vmul.f32 -0.5, %v3785_v17  ;;  %v3789_v45 = vpop.eup %3788  ;;  %v5039_v37 = vld [vmem:[#allocation7 + $0xb0] sm:$0xff]  ;;  %v2483_v38 = vld [vmem:[#allocation10 + $0xb8] sm:$0xff] }
  0xa2   :  { %v1266_v33 = vmul.f32 %v1202_v26, %v5006_v31  ;;  %3792 = vlog2.f32 %v692_v58  ;;  %v379_v44 = vsub.f32 0.0, %v315_v4  ;;  %vm5024_vm1 = vcmp.lt.f32.partialorder %v725_v14, 0.0004427343  ;;  %v1207_v14 = vld [vmem:[#allocation8 + $0x98] sm:$0xff]  ;;  %v5126_v26 = vld [vmem:[#allocation7 + $0xd0] sm:$0xff] }
  0xa3   :  { %3658 = vmatprep.subr.bf16.mxu0 %v3657_v32  ;;  %v709_v53 = vsel %vm5016_vm0, %v706_v55, %v703_v28  ;;  %v5030_v20 = vmul.f32 %v4962_v46, %v4962_v46  ;;  %v462_v19 = vmul.f32 1.442695, %v377_v48  ;;  %v8054_v59 = vmax.f32 %v4845_v25, 0.0  ;;  %v2481_v55 = vld [vmem:[#allocation10 + $0xa8] sm:$0xff]  ;;  %v5059_v58 = vld [vmem:[%s7896_s2 + $0xb8] sm:$0xff] }
  0xa4   :  { %v1330_v62 = vadd.f32 %v1266_v33, %v4867_v3  ;;  %v721_v3 = vmul.f32 0.6931472, %v3789_v45  ;;  %v5041_v57 = vmul.f32 %v2542_v0, %v2542_v0  ;;  %v466_v46 = vmul.f32 1.442695, %v379_v44 }
  0xa5   :  { %8053 = vst [vmem:[#allocation33_spill] sm:$0xff] %v5030_v20  ;;  %v5034_v11 = vadd.f32 %v709_v53, %v8054_v59  ;;  %3794 = vpow2.f32 %v462_v19  ;;  %v696_v4 = vadd.f32 1.0, %v695_v22  ;;  %v698_v15 = vand.u32 2147483647, %v3785_v17  ;;  %v2480_v22 = vld [vmem:[#allocation10 + $0xa0] sm:$0xff] }
  0xa6   :  { %v3659_v13 = vpack.c.bf16 %v1330_v62, %v1328_v39  ;;  %8056 = vst [vmem:[#allocation35_spill] sm:$0xff] %v5041_v57  ;;  %v727_v25 = vsel %vm5024_vm1, %v724_v50, %v721_v3  ;;  %v8057_v39 = vmax.f32 %v4857_v7, 0.0  ;;  %3796 = vpow2.f32 %v466_v46  ;;  %v5074_v59 = vld [vmem:[%s7896_s2 + $0xa0] sm:$0xff]  ;;  %v5076_v46 = vld [vmem:[#allocation7 + $0xc8] sm:$0xff] }
  0xa7   :  { %8055 = vst [vmem:[#allocation34_spill] sm:$0xff] %v5034_v11  ;;  %v1269_v1 = vmul.f32 %v1205_v23, %v5034_v11  ;;  %v3791_v33 = vpop.eup %3790  ;;  %v312_v32 = vand.u32 2147483647, %v5037_v18  ;;  %v314_v28 = vand.u32 2147483647, %v5039_v37  ;;  %v2545_v7 = vsub.f32 %v5054_v12, %v2481_v55  ;;  %v2482_v23 = vld [vmem:[#allocation10 + $0xb0] sm:$0xff] }
  0xa8   :  { %3660 = vmatpush1.bf16.xpose.msra.mxu0 %v3659_v13  ;;  %v5049_v0 = vadd.f32 %v727_v25, %v8057_v39  ;;  %v710_v50 = vadd.f32 1.0, %v3791_v33  ;;  %v713_v48 = vmul.f32 -0.5, %v3791_v33  ;;  %v2547_v62 = vsub.f32 %v5059_v58, %v2483_v38  ;;  %v5118_v13 = vld [vmem:[%s7896_s2 + $0xd8] sm:$0xff] }
  0xa9   :  { %v1333_v45 = vadd.f32 %v1269_v1, %v4886_v41  ;;  %v376_v53 = vsub.f32 0.0, %v312_v32  ;;  %v378_v6 = vsub.f32 0.0, %v314_v28  ;;  %v697_v19 = vmul.f32 %v3785_v17, %v696_v4  ;;  %v5082_v41 = vld [vmem:[%s7896_s2 + $0xb0] sm:$0xff] }
  0xaa   :  { %8058 = vst [vmem:[#allocation36_spill] sm:$0xff] %v5049_v0  ;;  %v1271_v44 = vmul.f32 %v1207_v14, %v5049_v0  ;;  %vm5067_vm2 = vcmp.lt.f32.partialorder %v698_v15, 0.0004427343  ;;  %3798 = vlog2.f32 %v710_v50  ;;  %v716_v3 = vand.u32 2147483647, %v3791_v33  ;;  %v5085_v14 = vld [vmem:[#allocation7 + $0xd8] sm:$0xff] }
  0xab   :  { %v460_v17 = vmul.f32 1.442695, %v376_v53  ;;  %v464_v38 = vmul.f32 1.442695, %v378_v6  ;;  %v2544_v25 = vsub.f32 %v5074_v59, %v2480_v22  ;;  %v714_v4 = vadd.f32 1.0, %v713_v48  ;;  %v1204_v53 = vld [vmem:[#allocation8 + $0x80] sm:$0xff] }
  0xac   :  { %v1335_v55 = vadd.f32 %v1271_v44, %v4898_v27  ;;  %v3793_v1 = vpop.eup %3792  ;;  %v5087_v15 = vmul.f32 %v2545_v7, %v2545_v7  ;;  %v5089_v39 = vmul.f32 %v2547_v62, %v2547_v62  ;;  %v2546_v32 = vsub.f32 %v5082_v41, %v2482_v23  ;;  %v2485_v23 = vld [vmem:[#allocation10 + $0xc8] sm:$0xff]  ;;  %v2484_v7 = vld [vmem:[#allocation10 + $0xc0] sm:$0xff] }
  0xad   :  { %v694_v28 = vmul.f32 0.6931472, %v3793_v1  ;;  %3800 = vpow2.f32 %v460_v17  ;;  %v317_v50 = vand.u32 2147483647, %v5076_v46  ;;  %v319_v22 = vand.u32 2147483647, %v5085_v14 }
  0xae   :  { %8061 = vst [vmem:[#allocation37_spill] sm:$0xff] %v5087_v15  ;;  %8062 = vst [vmem:[#allocation38_spill] sm:$0xff] %v5089_v39  ;;  %v3661_v27 = vpack.c.bf16 %v1335_v55, %v1333_v45  ;;  %3802 = vpow2.f32 %v464_v38  ;;  %vm5098_vm3 = vcmp.lt.f32.partialorder %v716_v3, 0.0004427343  ;;  %v5102_v62 = vmul.f32 %v2544_v25, %v2544_v25  ;;  %v2487_v55 = vld [vmem:[#allocation10 + $0xd8] sm:$0xff] }
  0xaf   :  { %v3795_v6 = vpop.eup %3794  ;;  %v700_v48 = vsel %vm5067_vm2, %v697_v19, %v694_v28  ;;  %v381_v45 = vsub.f32 0.0, %v317_v50  ;;  %v715_v17 = vmul.f32 %v3791_v33, %v714_v4  ;;  %v8066_v1 = vmax.f32 %v4902_v61, 0.0  ;;  %v5113_v19 = vld [vmem:[%s7896_s2 + $0xc8] sm:$0xff]  ;;  %v5121_v28 = vld [vmem:[#allocation7 + $0xc0] sm:$0xff] }
  0xb0   :  { %3662 = vmatprep.subr.bf16.mxu0 %v3661_v27  ;;  %8065 = vst [vmem:[#allocation39_spill] sm:$0xff] %v5102_v62  ;;  %v737_v44 = vadd.f32 1.0, %v3795_v6  ;;  %v5108_v27 = vmul.f32 %v2546_v32, %v2546_v32  ;;  %v3797_v3 = vpop.eup %3796  ;;  %v740_v33 = vmul.f32 -0.5, %v3795_v6  ;;  %v383_v25 = vsub.f32 0.0, %v319_v22 }
  0xb1   :  { %v5106_v38 = vadd.f32 %v700_v48, %v8066_v1  ;;  %v470_v4 = vmul.f32 1.442695, %v381_v45  ;;  %v2549_v50 = vsub.f32 %v5113_v19, %v2485_v23  ;;  %v2551_v48 = vsub.f32 %v5118_v13, %v2487_v55 }
  0xb2   :  { %8068 = vst [vmem:[#allocation41_spill] sm:$0xff] %v5108_v27  ;;  %3804 = vlog2.f32 %v737_v44  ;;  %v743_v1 = vand.u32 2147483647, %v3795_v6  ;;  %v755_v10 = vadd.f32 1.0, %v3797_v3  ;;  %v758_v45 = vmul.f32 -0.5, %v3797_v3 }
  0xb3   :  { %8067 = vst [vmem:[#allocation40_spill] sm:$0xff] %v5106_v38  ;;  %3806 = vpow2.f32 %v470_v4  ;;  %v1268_v22 = vmul.f32 %v1204_v53, %v5106_v38  ;;  %v474_v61 = vmul.f32 1.442695, %v383_v25  ;;  %v316_v44 = vand.u32 2147483647, %v5121_v28  ;;  %v1206_v53 = vld [vmem:[#allocation8 + $0x90] sm:$0xff] }
  0xb4   :  { %v3799_v62 = vpop.eup %3798  ;;  %v741_v32 = vadd.f32 1.0, %v740_v33  ;;  %3808 = vlog2.f32 %v755_v10  ;;  %v761_v55 = vand.u32 2147483647, %v3797_v3  ;;  %v5132_v27 = vmul.f32 %v2549_v50, %v2549_v50  ;;  %v2486_v38 = vld [vmem:[#allocation10 + $0xd0] sm:$0xff] }
  0xb5   :  { %v712_v39 = vmul.f32 0.6931472, %v3799_v62  ;;  %3810 = vpow2.f32 %v474_v61  ;;  %v318_v4 = vand.u32 2147483647, %v5126_v26  ;;  %vm5137_vm4 = vcmp.lt.f32.partialorder %v743_v1, 0.0004427343 }
  0xb6   :  { %8069 = vst [vmem:[#allocation42_spill] sm:$0xff] %v5132_v27  ;;  %v5141_v62 = vmul.f32 %v2551_v48, %v2551_v48  ;;  %v380_v10 = vsub.f32 0.0, %v316_v44  ;;  %v8073_v61 = vmax.f32 %v4906_v54, 0.0  ;;  %v1332_v23 = vadd.f32 %v1268_v22, %v4954_v42  ;;  %v5159_v42 = vld [vmem:[%s7896_s2 + $0xc0] sm:$0xff]  ;;  %v1214_v44 = vld [vmem:[#allocation8 + $0xd0] sm:$0xff] }
  0xb7   :  { %v3801_v20 = vpop.eup %3800  ;;  %v718_v15 = vsel %vm5098_vm3, %v715_v17, %v712_v39  ;;  %v759_v27 = vadd.f32 1.0, %v758_v45  ;;  %v742_v39 = vmul.f32 %v3795_v6, %v741_v32  ;;  %v382_v57 = vsub.f32 0.0, %v318_v4  ;;  %v5165_v6 = vld [vmem:[%s7896_s2 + $0xd0] sm:$0xff] }
  0xb8   :  { %8072 = vst [vmem:[#allocation43_spill] sm:$0xff] %v5141_v62  ;;  %v5143_v33 = vpop.eup %3802  ;;  %v5147_v50 = vadd.f32 %v718_v15, %v8073_v61  ;;  %v728_v11 = vadd.f32 1.0, %v3801_v20  ;;  %v731_v17 = vmul.f32 -0.5, %v3801_v20  ;;  %vm5152_vm5 = vcmp.lt.f32.partialorder %v761_v55, 0.0004427343 }
  0xb9   :  { %v746_v1 = vadd.f32 1.0, %v5143_v33  ;;  %v734_v54 = vand.u32 2147483647, %v3801_v20  ;;  %v749_v15 = vmul.f32 -0.5, %v5143_v33  ;;  %v468_v32 = vmul.f32 1.442695, %v380_v10 }
  0xba   :  { %8074 = vst [vmem:[#allocation44_spill] sm:$0xff] %v5147_v50  ;;  %v1270_v48 = vmul.f32 %v1206_v53, %v5147_v50  ;;  %3812 = vlog2.f32 %v728_v11  ;;  %v2548_v22 = vsub.f32 %v5159_v42, %v2484_v7  ;;  %v760_v55 = vmul.f32 %v3797_v3, %v759_v27  ;;  %v5171_v50 = vld [vmem:[#allocation7 + $0xe8] sm:$0xff] }
  0xbb   :  { %3814 = vlog2.f32 %v746_v1  ;;  %v472_v4 = vmul.f32 1.442695, %v382_v57  ;;  %v2550_v53 = vsub.f32 %v5165_v6, %v2486_v38  ;;  %v732_v1 = vadd.f32 1.0, %v731_v17  ;;  %v1209_v38 = vld [vmem:[#allocation8 + $0xa8] sm:$0xff] }
  0xbc   :  { %v3805_v45 = vpop.eup %3804  ;;  %v1334_v11 = vadd.f32 %v1270_v48, %v4981_v52  ;;  %v752_v0 = vand.u32 2147483647, %v5143_v33  ;;  %3816 = vpow2.f32 %v468_v32  ;;  %vm5173_vm6 = vcmp.lt.f32.partialorder %v734_v54, 0.0004427343  ;;  %v5180_v48 = vld [vmem:[#allocation7 + $0xf8] sm:$0xff] }
  0xbd   :  { %v3807_v61 = vpop.eup %3806  ;;  %v739_v62 = vmul.f32 0.6931472, %v3805_v45  ;;  %v750_v3 = vadd.f32 1.0, %v749_v15  ;;  %3818 = vpow2.f32 %v472_v4  ;;  %v8079_v54 = vmax.f32 %v4996_v51, 0.0 }
  0xbe   :  { %v3663_v47 = vpack.c.bf16 %v1334_v11, %v1332_v23  ;;  %v773_v7 = vadd.f32 1.0, %v3807_v61  ;;  %v3809_v27 = vpop.eup %3808  ;;  %v776_v17 = vmul.f32 -0.5, %v3807_v61  ;;  %v321_v11 = vand.u32 2147483647, %v5171_v50 }
  0xbf   :  { %v745_v57 = vsel %vm5137_vm4, %v742_v39, %v739_v62  ;;  %v3811_v32 = vpop.eup %3810  ;;  %v757_v23 = vmul.f32 0.6931472, %v3809_v27  ;;  %v733_v52 = vmul.f32 %v3801_v20, %v732_v1  ;;  %vm5187_vm7 = vcmp.lt.f32.partialorder %v752_v0, 0.0004427343 }
  0xc0   :  { %3664 = vmatpush1.bf16.xpose.msra.mxu0 %v3663_v47  ;;  %v5184_v45 = vadd.f32 %v745_v57, %v8079_v54  ;;  %3820 = vlog2.f32 %v773_v7  ;;  %v791_v62 = vadd.f32 1.0, %v3811_v32  ;;  %v5191_v39 = vmul.f32 %v2548_v22, %v2548_v22  ;;  %v1211_v47 = vld [vmem:[#allocation8 + $0xb8] sm:$0xff] }
  0xc1   :  { %v763_v15 = vsel %vm5152_vm5, %v760_v55, %v757_v23  ;;  %v779_v51 = vand.u32 2147483647, %v3807_v61  ;;  %v323_v27 = vand.u32 2147483647, %v5180_v48  ;;  %v8084_v7 = vmax.f32 %v4998_v63, 0.0 }
  0xc2   :  { %8080 = vst [vmem:[#allocation45_spill] sm:$0xff] %v5184_v45  ;;  %8083 = vst [vmem:[#allocation46_spill] sm:$0xff] %v5191_v39  ;;  %v1273_v4 = vmul.f32 %v1209_v38, %v5184_v45  ;;  %v777_v20 = vadd.f32 1.0, %v776_v17  ;;  %3822 = vlog2.f32 %v791_v62  ;;  %v794_v0 = vmul.f32 -0.5, %v3811_v32 }
  0xc3   :  { %v5199_v57 = vadd.f32 %v763_v15, %v8084_v7  ;;  %v751_v22 = vmul.f32 %v5143_v33, %v750_v3  ;;  %v797_v54 = vand.u32 2147483647, %v3811_v32  ;;  %v385_v55 = vsub.f32 0.0, %v321_v11 }
  0xc4   :  { %v3813_v1 = vpop.eup %3812  ;;  %v1337_v39 = vadd.f32 %v1273_v4, %v5054_v12  ;;  %v387_v36 = vsub.f32 0.0, %v323_v27  ;;  %vm5205_vm8 = vcmp.lt.f32.partialorder %v779_v51, 0.0004427343  ;;  %v5209_v17 = vmul.f32 %v2550_v53, %v2550_v53  ;;  %v1210_v53 = vld [vmem:[#allocation8 + $0xb0] sm:$0xff] }
  0xc5   :  { %8085 = vst [vmem:[#allocation47_spill] sm:$0xff] %v5199_v57  ;;  %v3815_v23 = vpop.eup %3814  ;;  %v1275_v38 = vmul.f32 %v1211_v47, %v5199_v57  ;;  %v730_v45 = vmul.f32 0.6931472, %v3813_v1  ;;  %v478_v62 = vmul.f32 1.442695, %v385_v55  ;;  %v1208_v47 = vld [vmem:[#allocation8 + $0xa0] sm:$0xff]  ;;  %v778_v7 = vmul.f32 %v3807_v61, %v777_v20 }
  0xc6   :  { %v748_v63 = vmul.f32 0.6931472, %v3815_v23  ;;  %8088 = vst [vmem:[#allocation48_spill] sm:$0xff] %v5209_v17  ;;  %v5211_v33 = vpop.eup %3816  ;;  %v795_v12 = vadd.f32 1.0, %v794_v0  ;;  %v8089_v51 = vmax.f32 %v5037_v18, 0.0  ;;  %v2489_v55 = vld [vmem:[#allocation10 + $0xe8] sm:$0xff] }
  0xc7   :  { %v1339_v3 = vadd.f32 %v1275_v38, %v5059_v58  ;;  %v736_v11 = vsel %vm5173_vm6, %v733_v52, %v730_v45  ;;  %vm5222_vm9 = vcmp.lt.f32.partialorder %v797_v54, 0.0004427343  ;;  %v764_v58 = vadd.f32 1.0, %v5211_v33  ;;  %v3819_v10 = vpop.eup %3818  ;;  %v2491_v20 = vld [vmem:[#allocation10 + $0xf8] sm:$0xff]  ;;  %v5236_v23 = vld [vmem:[%s7896_s2 + $0xe8] sm:$0xff] }
  0xc8   :  { %v754_v4 = vsel %vm5187_vm7, %v751_v22, %v748_v63  ;;  %v5220_v27 = vadd.f32 %v736_v11, %v8089_v51  ;;  %v8093_v61 = vmax.f32 %v5039_v37, 0.0  ;;  %3824 = vpow2.f32 %v478_v62 }
  0xc9   :  { %v3665_v52 = vpack.c.bf16 %v1339_v3, %v1337_v39  ;;  %v482_v25 = vmul.f32 1.442695, %v387_v36  ;;  %3826 = vlog2.f32 %v764_v58  ;;  %v767_v22 = vmul.f32 -0.5, %v5211_v33  ;;  %v5242_v36 = vld [vmem:[%s7896_s2 + $0xf8] sm:$0xff] }
  0xca   :  { %8090 = vst [vmem:[#allocation49_spill] sm:$0xff] %v5220_v27  ;;  %v5229_v45 = vadd.f32 %v754_v4, %v8093_v61  ;;  %v3821_v18 = vpop.eup %3820  ;;  %v1272_v0 = vmul.f32 %v1208_v47, %v5220_v27  ;;  %v782_v54 = vadd.f32 1.0, %v3819_v10  ;;  %v796_v38 = vmul.f32 %v3811_v32, %v795_v12  ;;  %v5247_v47 = vld [vmem:[#allocation7 + $0xe0] sm:$0xff]  ;;  %v5249_v4 = vld [vmem:[#allocation7 + $0xf0] sm:$0xff] }
  0xcb   :  { %3666 = vmatprep.subr.bf16.mxu0 %v3665_v52  ;;  %v775_v39 = vmul.f32 0.6931472, %v3821_v18  ;;  %v2553_v63 = vsub.f32 %v5236_v23, %v2489_v55  ;;  %v785_v3 = vmul.f32 -0.5, %v3819_v10  ;;  %v2555_v11 = vsub.f32 %v5242_v36, %v2491_v20 }
  0xcc   :  { %8094 = vst [vmem:[#allocation50_spill] sm:$0xff] %v5229_v45  ;;  %v1274_v37 = vmul.f32 %v1210_v53, %v5229_v45  ;;  %v1336_v62 = vadd.f32 %v1272_v0, %v5074_v59  ;;  %3828 = vlog2.f32 %v782_v54  ;;  %v3823_v51 = vpop.eup %3822  ;;  %v1213_v53 = vld [vmem:[#allocation8 + $0xc8] sm:$0xff]  ;;  %v770_v58 = vand.u32 2147483647, %v5211_v33 }
  0xcd   :  { %v781_v12 = vsel %vm5205_vm8, %v778_v7, %v775_v39  ;;  %3830 = vpow2.f32 %v482_v25  ;;  %v793_v55 = vmul.f32 0.6931472, %v3823_v51  ;;  %v8095_v59 = vmax.f32 %v5076_v46, 0.0  ;;  %v1215_v7 = vld [vmem:[#allocation8 + $0xd8] sm:$0xff]  ;;  %v5268_v46 = vld [vmem:[#allocation7 + $0x108] sm:$0xff] }
  0xce   :  { %v1338_v32 = vadd.f32 %v1274_v37, %v5082_v41  ;;  %v768_v61 = vadd.f32 1.0, %v767_v22  ;;  %v788_v20 = vand.u32 2147483647, %v3819_v10  ;;  %v5259_v0 = vmul.f32 %v2553_v63, %v2553_v63  ;;  %v5437_v45 = vld [vmem:[%s7896_s2 + $0x128] sm:$0xff] }
  0xcf   :  { %v5257_v52 = vadd.f32 %v781_v12, %v8095_v59  ;;  %v320_v54 = vand.u32 2147483647, %v5247_v47  ;;  %v322_v41 = vand.u32 2147483647, %v5249_v4  ;;  %v799_v15 = vsel %vm5222_vm9, %v796_v38, %v793_v55  ;;  %v5275_v12 = vld [vmem:[#allocation7 + $0x118] sm:$0xff] }
  0xd0   :  { %v3667_v18 = vpack.c.bf16 %v1338_v32, %v1336_v62  ;;  %8097 = vst [vmem:[#allocation52_spill] sm:$0xff] %v5259_v0  ;;  %v786_v37 = vadd.f32 1.0, %v785_v3  ;;  %v5266_v39 = vmul.f32 %v2555_v11, %v2555_v11  ;;  %v8099_v22 = vmax.f32 %v5085_v14, 0.0  ;;  %v2488_v14 = vld [vmem:[#allocation10 + $0xe0] sm:$0xff]  ;;  %v2495_v3 = vld [vmem:[#allocation10 + $0x118] sm:$0xff] }
  0xd1   :  { %8096 = vst [vmem:[#allocation51_spill] sm:$0xff] %v5257_v52  ;;  %v1277_v25 = vmul.f32 %v1213_v53, %v5257_v52  ;;  %v384_v51 = vsub.f32 0.0, %v320_v54  ;;  %v386_v32 = vsub.f32 0.0, %v322_v41  ;;  %v769_v38 = vmul.f32 %v5211_v33, %v768_v61 }
  0xd2   :  { %8098 = vst [vmem:[#allocation53_spill] sm:$0xff] %v5266_v39  ;;  %3668 = vmatpush1.bf16.xpose.msra.mxu0 %v3667_v18  ;;  %v5272_v63 = vadd.f32 %v799_v15, %v8099_v22  ;;  %vm5279_vm10 = vcmp.lt.f32.partialorder %v770_v58, 0.0004427343  ;;  %vm5283_vm11 = vcmp.lt.f32.partialorder %v788_v20, 0.0004427343  ;;  %v5287_v53 = vpop.eup %3824  ;;  %v787_v41 = vmul.f32 %v3819_v10, %v786_v37 }
  0xd3   :  { %v1341_v1 = vadd.f32 %v1277_v25, %v5113_v19  ;;  %v476_v59 = vmul.f32 1.442695, %v384_v51  ;;  %v480_v18 = vmul.f32 1.442695, %v386_v32  ;;  %v325_v54 = vand.u32 2147483647, %v5268_v46  ;;  %v3827_v19 = vpop.eup %3826 }
  0xd4   :  { %8100 = vst [vmem:[#allocation54_spill] sm:$0xff] %v5272_v63  ;;  %v1279_v55 = vmul.f32 %v1215_v7, %v5272_v63  ;;  %v809_v33 = vadd.f32 1.0, %v5287_v53  ;;  %v327_v61 = vand.u32 2147483647, %v5275_v12  ;;  %v766_v15 = vmul.f32 0.6931472, %v3827_v19 }
  0xd5   :  { %v5298_v25 = vld [vmem:[%s7896_s2 + $0xe0] sm:$0xff]  ;;  %3832 = vpow2.f32 %v476_v59  ;;  %v2490_v7 = vld [vmem:[#allocation10 + $0xf0] sm:$0xff]  ;;  %v389_v22 = vsub.f32 0.0, %v325_v54  ;;  %v812_v10 = vmul.f32 -0.5, %v5287_v53  ;;  %v8105_v54 = vmax.f32 %v5121_v28, 0.0 }
  0xd6   :  { %v1343_v20 = vadd.f32 %v1279_v55, %v5118_v13  ;;  %v3829_v51 = vpop.eup %3828  ;;  %3834 = vlog2.f32 %v809_v33  ;;  %v2552_v37 = vsub.f32 %v5298_v25, %v2488_v14  ;;  %v391_v32 = vsub.f32 0.0, %v327_v61  ;;  %v1212_v19 = vld [vmem:[#allocation8 + $0xc0] sm:$0xff]  ;;  %v5307_v59 = vld [vmem:[%s7896_s2 + $0xf0] sm:$0xff] }
  0xd7   :  { %v3831_v58 = vpop.eup %3830  ;;  %v772_v13 = vsel %vm5279_vm10, %v769_v38, %v766_v15  ;;  %v784_v55 = vmul.f32 0.6931472, %v3829_v51  ;;  %3836 = vpow2.f32 %v480_v18  ;;  %v815_v15 = vand.u32 2147483647, %v5287_v53 }
  0xd8   :  { %v3669_v62 = vpack.c.bf16 %v1343_v20, %v1341_v1  ;;  %v5311_v33 = vadd.f32 %v772_v13, %v8105_v54  ;;  %v827_v14 = vadd.f32 1.0, %v3831_v58  ;;  %v830_v61 = vmul.f32 -0.5, %v3831_v58  ;;  %v2493_v20 = vld [vmem:[#allocation10 + $0x108] sm:$0xff] }
  0xd9   :  { %v2554_v1 = vsub.f32 %v5307_v59, %v2490_v7  ;;  %v790_v38 = vsel %vm5283_vm11, %v787_v41, %v784_v55  ;;  %v486_v51 = vmul.f32 1.442695, %v389_v22  ;;  %v490_v0 = vmul.f32 1.442695, %v391_v32  ;;  %v5325_v7 = vld [vmem:[%s7896_s2 + $0x108] sm:$0xff]  ;;  %v5330_v41 = vld [vmem:[%s7896_s2 + $0x118] sm:$0xff] }
  0xda   :  { %8106 = vst [vmem:[#allocation55_spill] sm:$0xff] %v5311_v33  ;;  %3670 = vmatprep.subr.bf16.mxu0 %v3669_v62  ;;  %v8107_v18 = vmax.f32 %v5126_v26, 0.0  ;;  %v1276_v13 = vmul.f32 %v1212_v19, %v5311_v33  ;;  %v813_v54 = vadd.f32 1.0, %v812_v10  ;;  %3838 = vlog2.f32 %v827_v14  ;;  %v5333_v22 = vld [vmem:[#allocation7 + $0x100] sm:$0xff]  ;;  %v5335_v32 = vld [vmem:[#allocation7 + $0x110] sm:$0xff]  ;;  %v5380_v33 = vld [vmem:[#allocation7 + $0x138] sm:$0xff] }
  0xdb   :  { %v831_v62 = vadd.f32 1.0, %v830_v61  ;;  %v833_v11 = vand.u32 2147483647, %v3831_v58  ;;  %3840 = vpow2.f32 %v486_v51  ;;  %v2557_v26 = vsub.f32 %v5325_v7, %v2493_v20  ;;  %v2492_v20 = vld [vmem:[#allocation10 + $0x100] sm:$0xff]  ;;  %v2494_v51 = vld [vmem:[#allocation10 + $0x110] sm:$0xff] }
  0xdc   :  { %v5319_v28 = vadd.f32 %v790_v38, %v8107_v18  ;;  %v1340_v55 = vadd.f32 %v1276_v13, %v5159_v42  ;;  %3842 = vpow2.f32 %v490_v0  ;;  %v2559_v19 = vsub.f32 %v5330_v41, %v2495_v3 }
  0xdd   :  { %v5340_v14 = vmul.f32 %v2552_v37, %v2552_v37  ;;  %v5342_v61 = vmul.f32 %v2554_v1, %v2554_v1  ;;  %vm5347_vm12 = vcmp.lt.f32.partialorder %v815_v15, 0.0004427343  ;;  %v324_v42 = vand.u32 2147483647, %v5333_v22 }
  0xde   :  { %8108 = vst [vmem:[#allocation56_spill] sm:$0xff] %v5319_v28  ;;  %v1278_v10 = vmul.f32 %v1214_v44, %v5319_v28  ;;  %v326_v44 = vand.u32 2147483647, %v5335_v32  ;;  %v814_v37 = vmul.f32 %v5287_v53, %v813_v54  ;;  %v832_v1 = vmul.f32 %v3831_v58, %v831_v62  ;;  %v5371_v62 = vld [vmem:[%s7896_s2 + $0x110] sm:$0xff] }
  0xdf   :  { %8109 = vst [vmem:[#allocation57_spill] sm:$0xff] %v5340_v14  ;;  %8110 = vst [vmem:[#allocation58_spill] sm:$0xff] %v5342_v61  ;;  %v3833_v0 = vpop.eup %3832  ;;  %vm5354_vm13 = vcmp.lt.f32.partialorder %v833_v11, 0.0004427343  ;;  %v5358_v13 = vmul.f32 %v2557_v26, %v2557_v26  ;;  %v5360_v38 = vmul.f32 %v2559_v19, %v2559_v19  ;;  %v5365_v14 = vld [vmem:[%s7896_s2 + $0x100] sm:$0xff]  ;;  %v388_v26 = vsub.f32 0.0, %v324_v42 }
  0xe0   :  { %v1342_v18 = vadd.f32 %v1278_v10, %v5165_v6  ;;  %v3835_v6 = vpop.eup %3834  ;;  %v800_v10 = vadd.f32 1.0, %v3833_v0  ;;  %v5375_v19 = vld [vmem:[#allocation7 + $0x128] sm:$0xff]  ;;  %v2558_v53 = vsub.f32 %v5371_v62, %v2494_v51  ;;  %v803_v61 = vmul.f32 -0.5, %v3833_v0 }
  0xe1   :  { %8115 = vst [vmem:[#allocation59_spill] sm:$0xff] %v5358_v13  ;;  %8116 = vst [vmem:[#allocation60_spill] sm:$0xff] %v5360_v38  ;;  %v3837_v58 = vpop.eup %3836  ;;  %v811_v54 = vmul.f32 0.6931472, %v3835_v6  ;;  %v390_v13 = vsub.f32 0.0, %v326_v44  ;;  %v1217_v38 = vld [vmem:[#allocation8 + $0xe8] sm:$0xff] }
  0xe2   :  { %v3671_v15 = vpack.c.bf16 %v1342_v18, %v1340_v55  ;;  %v2556_v55 = vsub.f32 %v5365_v14, %v2492_v20  ;;  %3844 = vlog2.f32 %v800_v10  ;;  %v818_v18 = vadd.f32 1.0, %v3837_v58 }
  0xe3   :  { %v817_v6 = vsel %vm5347_vm12, %v814_v37, %v811_v54  ;;  %v484_v52 = vmul.f32 1.442695, %v388_v26  ;;  %v8117_v20 = vmax.f32 %v5171_v50, 0.0  ;;  %v329_v51 = vand.u32 2147483647, %v5375_v19 }
  0xe4   :  { %3672 = vmatpush1.bf16.xpose.msra.mxu0 %v3671_v15  ;;  %v3839_v11 = vpop.eup %3838  ;;  %3846 = vlog2.f32 %v818_v18  ;;  %v806_v37 = vand.u32 2147483647, %v3833_v0  ;;  %v821_v10 = vmul.f32 -0.5, %v3837_v58  ;;  %v488_v28 = vmul.f32 1.442695, %v390_v13 }
  0xe5   :  { %v5385_v17 = vadd.f32 %v817_v6, %v8117_v20  ;;  %v3841_v15 = vpop.eup %3840  ;;  %v829_v39 = vmul.f32 0.6931472, %v3839_v11  ;;  %3848 = vpow2.f32 %v484_v52  ;;  %v1219_v6 = vld [vmem:[#allocation8 + $0xf8] sm:$0xff]  ;;  %v804_v18 = vadd.f32 1.0, %v803_v61 }
  0xe6   :  { %v3843_v54 = vpop.eup %3842  ;;  %v845_v63 = vadd.f32 1.0, %v3841_v15  ;;  %v848_v42 = vmul.f32 -0.5, %v3841_v15  ;;  %v824_v20 = vand.u32 2147483647, %v3837_v58  ;;  %v8119_v27 = vmax.f32 %v5180_v48, 0.0 }
  0xe7   :  { %8118 = vst [vmem:[#allocation61_spill] sm:$0xff] %v5385_v17  ;;  %v1281_v26 = vmul.f32 %v1217_v38, %v5385_v17  ;;  %v835_v50 = vsel %vm5354_vm13, %v832_v1, %v829_v39  ;;  %v863_v44 = vadd.f32 1.0, %v3843_v54  ;;  %v851_v11 = vand.u32 2147483647, %v3841_v15  ;;  %v5418_v17 = vld [vmem:[#allocation7 + $0x130] sm:$0xff] }
  0xe8   :  { %v5394_v57 = vadd.f32 %v835_v50, %v8119_v27  ;;  %3850 = vlog2.f32 %v845_v63  ;;  %v866_v52 = vmul.f32 -0.5, %v3843_v54  ;;  %vm5396_vm14 = vcmp.lt.f32.partialorder %v806_v37, 0.0004427343  ;;  %v5409_v37 = vld [vmem:[#allocation7 + $0x120] sm:$0xff] }
  0xe9   :  { %v822_v38 = vadd.f32 1.0, %v821_v10  ;;  %3852 = vlog2.f32 %v863_v44  ;;  %v5400_v13 = vmul.f32 %v2556_v55, %v2556_v55  ;;  %v1345_v61 = vadd.f32 %v1281_v26, %v5236_v23 }
  0xea   :  { %v1283_v1 = vmul.f32 %v1219_v6, %v5394_v57  ;;  %v849_v3 = vadd.f32 1.0, %v848_v42  ;;  %3854 = vpow2.f32 %v488_v28  ;;  %v805_v48 = vmul.f32 %v3833_v0, %v804_v18 }
  0xeb   :  { %8122 = vst [vmem:[#allocation62_spill] sm:$0xff] %v5400_v13  ;;  %vm5404_vm15 = vcmp.lt.f32.partialorder %v824_v20, 0.0004427343  ;;  %v331_v63 = vand.u32 2147483647, %v5380_v33  ;;  %v393_v39 = vsub.f32 0.0, %v329_v51  ;;  %v823_v0 = vmul.f32 %v3837_v58, %v822_v38 }
  0xec   :  { %v3845_v10 = vpop.eup %3844  ;;  %v1347_v55 = vadd.f32 %v1283_v1, %v5242_v36  ;;  %vm5412_vm0 = vcmp.lt.f32.partialorder %v851_v11, 0.0004427343  ;;  %v867_v23 = vadd.f32 1.0, %v866_v52  ;;  %v869_v42 = vand.u32 2147483647, %v3843_v54  ;;  %v2497_v51 = vld [vmem:[#allocation10 + $0x128] sm:$0xff] }
  0xed   :  { %v802_v28 = vmul.f32 0.6931472, %v3845_v10  ;;  %v395_v26 = vsub.f32 0.0, %v331_v63  ;;  %v494_v50 = vmul.f32 1.442695, %v393_v39  ;;  %v850_v20 = vmul.f32 %v3841_v15, %v849_v3  ;;  %v1216_v10 = vld [vmem:[#allocation8 + $0xe0] sm:$0xff] }
  0xee   :  { %v3847_v6 = vpop.eup %3846  ;;  %v3673_v18 = vpack.c.bf16 %v1347_v55, %v1345_v61  ;;  %v5416_v13 = vmul.f32 %v2558_v53, %v2558_v53  ;;  %v328_v36 = vand.u32 2147483647, %v5409_v37  ;;  %v8128_v38 = vmax.f32 %v5247_v47, 0.0  ;;  %v1218_v39 = vld [vmem:[#allocation8 + $0xf0] sm:$0xff] }
  0xef   :  { %v5421_v11 = vpop.eup %3848  ;;  %v808_v52 = vsel %vm5396_vm14, %v805_v48, %v802_v28  ;;  %v820_v1 = vmul.f32 0.6931472, %v3847_v6  ;;  %3856 = vpow2.f32 %v494_v50  ;;  %v498_v58 = vmul.f32 1.442695, %v395_v26  ;;  %v2499_v48 = vld [vmem:[#allocation10 + $0x138] sm:$0xff] }
  0xf0   :  { %8127 = vst [vmem:[#allocation63_spill] sm:$0xff] %v5416_v13  ;;  %3674 = vmatprep.subr.bf16.mxu0 %v3673_v18  ;;  %v5427_v15 = vadd.f32 %v808_v52, %v8128_v38  ;;  %v868_v53 = vmul.f32 %v3843_v54, %v867_v23  ;;  %vm5429_vm1 = vcmp.lt.f32.partialorder %v869_v42, 0.0004427343  ;;  %v836_v3 = vadd.f32 1.0, %v5421_v11  ;;  %v5451_v26 = vld [vmem:[%s7896_s2 + $0x138] sm:$0xff]  ;;  %v1225_v13 = vld [vmem:[#allocation8 + $0x128] sm:$0xff] }
  0xf1   :  { %v826_v63 = vsel %vm5404_vm15, %v823_v0, %v820_v1  ;;  %3858 = vpow2.f32 %v498_v58  ;;  %v2561_v47 = vsub.f32 %v5437_v45, %v2497_v51  ;;  %v330_v54 = vand.u32 2147483647, %v5418_v17 }
  0xf2   :  { %8129 = vst [vmem:[#allocation64_spill] sm:$0xff] %v5427_v15  ;;  %v3851_v55 = vpop.eup %3850  ;;  %v8132_v23 = vmax.f32 %v5249_v4, 0.0  ;;  %v1280_v28 = vmul.f32 %v1216_v10, %v5427_v15  ;;  %3860 = vlog2.f32 %v836_v3  ;;  %v392_v27 = vsub.f32 0.0, %v328_v36  ;;  %v1221_v3 = vld [vmem:[#allocation8 + $0x108] sm:$0xff] }
  0xf3   :  { %v3853_v0 = vpop.eup %3852  ;;  %v847_v50 = vmul.f32 0.6931472, %v3851_v55  ;;  %v839_v6 = vmul.f32 -0.5, %v5421_v11  ;;  %v2563_v18 = vsub.f32 %v5451_v26, %v2499_v48  ;;  %v394_v58 = vsub.f32 0.0, %v330_v54 }
  0xf4   :  { %v5445_v42 = vadd.f32 %v826_v63, %v8132_v23  ;;  %v3855_v4 = vpop.eup %3854  ;;  %v1344_v1 = vadd.f32 %v1280_v28, %v5298_v25  ;;  %v865_v10 = vmul.f32 0.6931472, %v3853_v0  ;;  %v842_v36 = vand.u32 2147483647, %v5421_v11  ;;  %v1223_v25 = vld [vmem:[#allocation8 + $0x118] sm:$0xff] }
  0xf5   :  { %v853_v38 = vsel %vm5412_vm0, %v850_v20, %v847_v50  ;;  %v854_v63 = vadd.f32 1.0, %v3855_v4  ;;  %v492_v54 = vmul.f32 1.442695, %v392_v27  ;;  %v8135_v44 = vmax.f32 %v5275_v12, 0.0 }
  0xf6   :  { %v1282_v52 = vmul.f32 %v1218_v39, %v5445_v42  ;;  %v871_v23 = vsel %vm5429_vm1, %v868_v53, %v865_v10  ;;  %v8133_v39 = vmax.f32 %v5268_v46, 0.0  ;;  %v840_v28 = vadd.f32 1.0, %v839_v6  ;;  %v2498_v6 = vld [vmem:[#allocation10 + $0x130] sm:$0xff] }
  0xf7   :  { %v5471_v20 = vadd.f32 %v871_v23, %v8135_v44  ;;  %3862 = vlog2.f32 %v854_v63  ;;  %v857_v0 = vmul.f32 -0.5, %v3855_v4  ;;  %vm5475_vm2 = vcmp.lt.f32.partialorder %v842_v36, 0.0004427343 }
  0xf8   :  { %v1346_v48 = vadd.f32 %v1282_v52, %v5307_v59  ;;  %v5467_v51 = vadd.f32 %v853_v38, %v8133_v39  ;;  %3864 = vpow2.f32 %v492_v54  ;;  %v496_v59 = vmul.f32 1.442695, %v394_v58  ;;  %v2496_v52 = vld [vmem:[#allocation10 + $0x120] sm:$0xff]  ;;  %v5500_v39 = vld [vmem:[#allocation7 + $0x158] sm:$0xff] }
  0xf9   :  { %8136 = vst [vmem:[#allocation66_spill] sm:$0xff] %v5471_v20  ;;  %v3857_v61 = vpop.eup %3856  ;;  %v1287_v53 = vmul.f32 %v1223_v25, %v5471_v20  ;;  %v5479_v27 = vmul.f32 %v2561_v47, %v2561_v47  ;;  %v5481_v12 = vmul.f32 %v2563_v18, %v2563_v18  ;;  %v860_v10 = vand.u32 2147483647, %v3855_v4  ;;  %v5489_v47 = vld [vmem:[%s7896_s2 + $0x120] sm:$0xff]  ;;  %v5494_v18 = vld [vmem:[%s7896_s2 + $0x130] sm:$0xff] }
  0xfa   :  { %8134 = vst [vmem:[#allocation65_spill] sm:$0xff] %v5467_v51  ;;  %v3675_v50 = vpack.c.bf16 %v1346_v48, %v1344_v1  ;;  %v1285_v55 = vmul.f32 %v1221_v3, %v5467_v51  ;;  %v881_v38 = vadd.f32 1.0, %v3857_v61  ;;  %v884_v3 = vmul.f32 -0.5, %v3857_v61 }
  0xfb   :  { %8139 = vst [vmem:[#allocation67_spill] sm:$0xff] %v5479_v27  ;;  %8140 = vst [vmem:[#allocation68_spill] sm:$0xff] %v5481_v12  ;;  %v3859_v58 = vpop.eup %3858  ;;  %v1351_v63 = vadd.f32 %v1287_v53, %v5330_v41  ;;  %v841_v36 = vmul.f32 %v5421_v11, %v840_v28  ;;  %v858_v48 = vadd.f32 1.0, %v857_v0  ;;  %3866 = vpow2.f32 %v496_v59 }
  0xfc   :  { %3676 = vmatpush1.bf16.xpose.msra.mxu0 %v3675_v50  ;;  %v1349_v1 = vadd.f32 %v1285_v55, %v5325_v7  ;;  %v5496_v7 = vld [vmem:[#allocation7 + $0x148] sm:$0xff]  ;;  %v3861_v55 = vpop.eup %3860  ;;  %3868 = vlog2.f32 %v881_v38  ;;  %v899_v23 = vadd.f32 1.0, %v3859_v58  ;;  %v2560_v41 = vsub.f32 %v5489_v47, %v2496_v52 }
  0xfd   :  { %v2562_v11 = vsub.f32 %v5494_v18, %v2498_v6  ;;  %v838_v54 = vmul.f32 0.6931472, %v3861_v55  ;;  %v887_v44 = vand.u32 2147483647, %v3857_v61  ;;  %v902_v28 = vmul.f32 -0.5, %v3859_v58 }
  0xfe   :  { %v3677_v25 = vpack.c.bf16 %v1351_v63, %v1349_v1  ;;  %vm5502_vm3 = vcmp.lt.f32.partialorder %v860_v10, 0.0004427343  ;;  %v885_v50 = vadd.f32 1.0, %v884_v3  ;;  %3870 = vlog2.f32 %v899_v23  ;;  %v1220_v10 = vld [vmem:[#allocation8 + $0x100] sm:$0xff] }
  0xff   :  { %v333_v59 = vand.u32 2147483647, %v5496_v7  ;;  %v844_v53 = vsel %vm5475_vm2, %v841_v36, %v838_v54  ;;  %v859_v52 = vmul.f32 %v3855_v4, %v858_v48  ;;  %v905_v6 = vand.u32 2147483647, %v3859_v58  ;;  %v2501_v48 = vld [vmem:[#allocation10 + $0x148] sm:$0xff] }
 0x100   :  { %3678 = vmatprep.subr.bf16.mxu0 %v3677_v25  ;;  %v335_v38 = vand.u32 2147483647, %v5500_v39  ;;  %v8143_v1 = vmax.f32 %v5333_v22, 0.0  ;;  %v5514_v55 = vmul.f32 %v2560_v41, %v2560_v41  ;;  %v5516_v27 = vmul.f32 %v2562_v11, %v2562_v11 }
 0x101   :  { %v397_v3 = vsub.f32 0.0, %v333_v59  ;;  %v3863_v23 = vpop.eup %3862  ;;  %vm5518_vm4 = vcmp.lt.f32.partialorder %v887_v44, 0.0004427343  ;;  %v903_v46 = vadd.f32 1.0, %v902_v28  ;;  %vm5525_vm5 = vcmp.lt.f32.partialorder %v905_v6, 0.0004427343 }
 0x102   :  { %v5512_v63 = vadd.f32 %v844_v53, %v8143_v1  ;;  %8145 = vst [vmem:[#allocation70_spill] sm:$0xff] %v5514_v55  ;;  %8146 = vst [vmem:[#allocation71_spill] sm:$0xff] %v5516_v27  ;;  %v399_v36 = vsub.f32 0.0, %v335_v38  ;;  %v3865_v54 = vpop.eup %3864  ;;  %v856_v22 = vmul.f32 0.6931472, %v3863_v23  ;;  %v886_v53 = vmul.f32 %v3857_v61, %v885_v50  ;;  %v2503_v55 = vld [vmem:[#allocation10 + $0x158] sm:$0xff] }
 0x103   :  { %v502_v41 = vmul.f32 1.442695, %v397_v3  ;;  %v872_v44 = vadd.f32 1.0, %v3865_v54  ;;  %v5532_v28 = vld [vmem:[%s7896_s2 + $0x148] sm:$0xff]  ;;  %v1222_v50 = vld [vmem:[#allocation8 + $0x110] sm:$0xff]  ;;  %v875_v23 = vmul.f32 -0.5, %v3865_v54  ;;  %v904_v0 = vmul.f32 %v3859_v58, %v903_v46 }
 0x104   :  { %8144 = vst [vmem:[#allocation69_spill] sm:$0xff] %v5512_v63  ;;  %v1284_v11 = vmul.f32 %v1220_v10, %v5512_v63  ;;  %v506_v38 = vmul.f32 1.442695, %v399_v36  ;;  %v862_v61 = vsel %vm5502_vm3, %v859_v52, %v856_v22  ;;  %v5539_v10 = vld [vmem:[%s7896_s2 + $0x158] sm:$0xff]  ;;  %v2565_v6 = vsub.f32 %v5532_v28, %v2501_v48  ;;  %v5542_v3 = vld [vmem:[#allocation7 + $0x140] sm:$0xff]  ;;  %v5551_v22 = vld [vmem:[#allocation7 + $0x150] sm:$0xff] }
 0x105   :  { %3872 = vpow2.f32 %v502_v41  ;;  %v5544_v1 = vpop.eup %3866  ;;  %v8151_v4 = vmax.f32 %v5335_v32, 0.0  ;;  %v2567_v52 = vsub.f32 %v5539_v10, %v2503_v55  ;;  %v878_v27 = vand.u32 2147483647, %v3865_v54  ;;  %v2502_v59 = vld [vmem:[#allocation10 + $0x150] sm:$0xff] }
 0x106   :  { %3874 = vlog2.f32 %v872_v44  ;;  %v3869_v12 = vpop.eup %3868  ;;  %v890_v41 = vadd.f32 1.0, %v5544_v1  ;;  %v1348_v63 = vadd.f32 %v1284_v11, %v5365_v14  ;;  %v876_v46 = vadd.f32 1.0, %v875_v23 }
 0x107   :  { %v5548_v36 = vadd.f32 %v862_v61, %v8151_v4  ;;  %3876 = vpow2.f32 %v506_v38  ;;  %v883_v32 = vmul.f32 0.6931472, %v3869_v12  ;;  %v332_v4 = vand.u32 2147483647, %v5542_v3 }
 0x108   :  { %v3871_v58 = vpop.eup %3870  ;;  %3878 = vlog2.f32 %v890_v41  ;;  %v893_v55 = vmul.f32 -0.5, %v5544_v1  ;;  %v334_v44 = vand.u32 2147483647, %v5551_v22  ;;  %v8153_v14 = vmax.f32 %v5375_v19, 0.0 }
 0x109   :  { %8152 = vst [vmem:[#allocation72_spill] sm:$0xff] %v5548_v36  ;;  %v1286_v51 = vmul.f32 %v1222_v50, %v5548_v36  ;;  %v889_v38 = vsel %vm5518_vm4, %v886_v53, %v883_v32  ;;  %v901_v48 = vmul.f32 0.6931472, %v3871_v58  ;;  %v396_v50 = vsub.f32 0.0, %v332_v4  ;;  %v5574_v53 = vld [vmem:[#allocation7 + $0x168] sm:$0xff]  ;;  %v2500_v58 = vld [vmem:[#allocation10 + $0x140] sm:$0xff] }
 0x10a   :  { %v5565_v12 = vadd.f32 %v889_v38, %v8153_v14  ;;  %v5567_v11 = vmul.f32 %v2565_v6, %v2565_v6  ;;  %v398_v41 = vsub.f32 0.0, %v334_v44  ;;  %v8157_v32 = vmax.f32 %v5380_v33, 0.0  ;;  %v5586_v44 = vld [vmem:[#allocation7 + $0x178] sm:$0xff] }
 0x10b   :  { %v1350_v61 = vadd.f32 %v1286_v51, %v5371_v62  ;;  %v907_v36 = vsel %vm5525_vm5, %v904_v0, %v901_v48  ;;  %v1227_v62 = vld [vmem:[#allocation8 + $0x138] sm:$0xff]  ;;  %v5572_v51 = vmul.f32 %v2567_v52, %v2567_v52  ;;  %v500_v25 = vmul.f32 1.442695, %v396_v50 }
 0x10c   :  { %8154 = vst [vmem:[#allocation73_spill] sm:$0xff] %v5565_v12  ;;  %8155 = vst [vmem:[#allocation74_spill] sm:$0xff] %v5567_v11  ;;  %v5578_v19 = vadd.f32 %v907_v36, %v8157_v32  ;;  %v1289_v6 = vmul.f32 %v1225_v13, %v5565_v12  ;;  %vm5581_vm6 = vcmp.lt.f32.partialorder %v878_v27, 0.0004427343  ;;  %v877_v0 = vmul.f32 %v3865_v54, %v876_v46  ;;  %v5593_v27 = vld [vmem:[%s7896_s2 + $0x140] sm:$0xff] }
 0x10d   :  { %v3679_v20 = vpack.c.bf16 %v1350_v61, %v1348_v63  ;;  %8156 = vst [vmem:[#allocation75_spill] sm:$0xff] %v5572_v51  ;;  %v504_v63 = vmul.f32 1.442695, %v398_v41  ;;  %v894_v52 = vadd.f32 1.0, %v893_v55  ;;  %v896_v48 = vand.u32 2147483647, %v5544_v1 }
 0x10e   :  { %8158 = vst [vmem:[#allocation76_spill] sm:$0xff] %v5578_v19  ;;  %3880 = vpow2.f32 %v500_v25  ;;  %v1291_v36 = vmul.f32 %v1227_v62, %v5578_v19  ;;  %v1353_v13 = vadd.f32 %v1289_v6, %v5437_v45  ;;  %v337_v54 = vand.u32 2147483647, %v5574_v53 }
 0x10f   :  { %3680 = vmatpush1.bf16.xpose.msra.mxu0 %v3679_v20  ;;  %v3873_v33 = vpop.eup %3872  ;;  %v5598_v20 = vld [vmem:[%s7896_s2 + $0x150] sm:$0xff]  ;;  %3882 = vpow2.f32 %v504_v63  ;;  %v2564_v38 = vsub.f32 %v5593_v27, %v2500_v58  ;;  %v339_v62 = vand.u32 2147483647, %v5586_v44  ;;  %v895_v32 = vmul.f32 %v5544_v1, %v894_v52 }
 0x110   :  { %v3875_v46 = vpop.eup %3874  ;;  %v917_v55 = vadd.f32 1.0, %v3873_v33  ;;  %v920_v61 = vmul.f32 -0.5, %v3873_v33  ;;  %v2566_v45 = vsub.f32 %v5598_v20, %v2502_v59  ;;  %v1355_v14 = vadd.f32 %v1291_v36, %v5451_v26  ;;  %v1224_v59 = vld [vmem:[#allocation8 + $0x120] sm:$0xff]  ;;  %v2384_v36 = vld [vmem:[%s7895_s1 + $0x8] sm:$0xff] }
 0x111   :  { %v3877_v50 = vpop.eup %3876  ;;  %v874_v41 = vmul.f32 0.6931472, %v3875_v46  ;;  %v401_v25 = vsub.f32 0.0, %v337_v54  ;;  %vm5606_vm7 = vcmp.lt.f32.partialorder %v896_v48, 0.0004427343  ;;  %v8163_v1 = vmax.f32 %v5409_v37, 0.0  ;;  %2449 = vmatprep.mubr.f32.mxu0 %v2384_v36 }
 0x112   :  { %3884 = vlog2.f32 %v917_v55  ;;  %v935_v63 = vadd.f32 1.0, %v3877_v50  ;;  %v3879_v23 = vpop.eup %3878  ;;  %v3681_v11 = vpack.c.bf16 %v1355_v14, %v1353_v13  ;;  %v923_v51 = vand.u32 2147483647, %v3873_v33  ;;  %v2505_v55 = vld [vmem:[#allocation10 + $0x168] sm:$0xff] }
 0x113   :  { %v880_v58 = vsel %vm5581_vm6, %v877_v0, %v874_v41  ;;  %v938_v26 = vmul.f32 -0.5, %v3877_v50  ;;  %v892_v54 = vmul.f32 0.6931472, %v3879_v23  ;;  %v921_v48 = vadd.f32 1.0, %v920_v61  ;;  %v1226_v41 = vld [vmem:[#allocation8 + $0x130] sm:$0xff] }
 0x114   :  { %v5617_v52 = vadd.f32 %v880_v58, %v8163_v1  ;;  %3886 = vlog2.f32 %v935_v63  ;;  %3682 = vmatprep.subr.bf16.mxu0 %v3681_v11  ;;  %v5619_v13 = vmul.f32 %v2564_v38, %v2564_v38  ;;  %v5621_v4 = vmul.f32 %v2566_v45, %v2566_v45  ;;  %v5634_v38 = vld [vmem:[%s7896_s2 + $0x168] sm:$0xff] }
 0x115   :  { %v403_v0 = vsub.f32 0.0, %v339_v62  ;;  %v510_v46 = vmul.f32 1.442695, %v401_v25  ;;  %v898_v14 = vsel %vm5606_vm7, %v895_v32, %v892_v54  ;;  %v941_v37 = vand.u32 2147483647, %v3877_v50  ;;  %v2507_v62 = vld [vmem:[#allocation10 + $0x178] sm:$0xff] }
 0x116   :  { %8164 = vst [vmem:[#allocation77_spill] sm:$0xff] %v5617_v52  ;;  %8165 = vst [vmem:[#allocation78_spill] sm:$0xff] %v5619_v13  ;;  %v1288_v23 = vmul.f32 %v1224_v59, %v5617_v52  ;;  %v8167_v61 = vmax.f32 %v5418_v17, 0.0  ;;  %v939_v11 = vadd.f32 1.0, %v938_v26  ;;  %v922_v32 = vmul.f32 %v3873_v33, %v921_v48  ;;  %v5699_v33 = vld [vmem:[%s7896_s2 + $0x160] sm:$0xff] }
 0x117   :  { %8166 = vst [vmem:[#allocation79_spill] sm:$0xff] %v5621_v4  ;;  %3888 = vpow2.f32 %v510_v46  ;;  %v514_v45 = vmul.f32 1.442695, %v403_v0  ;;  %vm5636_vm8 = vcmp.lt.f32.partialorder %v923_v51, 0.0004427343  ;;  %v2569_v17 = vsub.f32 %v5634_v38, %v2505_v55  ;;  %v5647_v0 = vld [vmem:[%s7896_s2 + $0x178] sm:$0xff] }
 0x118   :  { %v5629_v63 = vadd.f32 %v898_v14, %v8167_v61  ;;  %v3881_v25 = vpop.eup %3880  ;;  %v1352_v54 = vadd.f32 %v1288_v23, %v5489_v47  ;;  %v5649_v51 = vld [vmem:[#allocation7 + $0x160] sm:$0xff]  ;;  %vm5651_vm9 = vcmp.lt.f32.partialorder %v941_v37, 0.0004427343  ;;  %v2571_v46 = vsub.f32 %v5647_v0, %v2507_v62  ;;  %v5656_v55 = vld [vmem:[#allocation7 + $0x170] sm:$0xff] }
 0x119   :  { %v3883_v36 = vpop.eup %3882  ;;  %v908_v1 = vadd.f32 1.0, %v3881_v25  ;;  %v911_v14 = vmul.f32 -0.5, %v3881_v25  ;;  %3890 = vpow2.f32 %v514_v45  ;;  %v914_v59 = vand.u32 2147483647, %v3881_v25 }
 0x11a   :  { %8168 = vst [vmem:[#allocation80_spill] sm:$0xff] %v5629_v63  ;;  %v1290_v26 = vmul.f32 %v1226_v41, %v5629_v63  ;;  %v926_v48 = vadd.f32 1.0, %v3883_v36  ;;  %v940_v41 = vmul.f32 %v3877_v50, %v939_v11  ;;  %v929_v23 = vmul.f32 -0.5, %v3883_v36  ;;  %v5666_v11 = vld [vmem:[#allocation7 + $0x188] sm:$0xff] }
 0x11b   :  { %3892 = vlog2.f32 %v908_v1  ;;  %v932_v58 = vand.u32 2147483647, %v3883_v36  ;;  %v336_v37 = vand.u32 2147483647, %v5649_v51  ;;  %v912_v12 = vadd.f32 1.0, %v911_v14 }
 0x11c   :  { %v1354_v47 = vadd.f32 %v1290_v26, %v5494_v18  ;;  %v3885_v61 = vpop.eup %3884  ;;  %3894 = vlog2.f32 %v926_v48  ;;  %v338_v45 = vand.u32 2147483647, %v5656_v55  ;;  %v5661_v62 = vmul.f32 %v2569_v17, %v2569_v17  ;;  %v2504_v18 = vld [vmem:[#allocation10 + $0x160] sm:$0xff] }
 0x11d   :  { %v919_v4 = vmul.f32 0.6931472, %v3885_v61  ;;  %v5663_v19 = vmul.f32 %v2571_v46, %v2571_v46  ;;  %v400_v50 = vsub.f32 0.0, %v336_v37  ;;  %v930_v48 = vadd.f32 1.0, %v929_v23  ;;  %v5734_v23 = vld [vmem:[%s7896_s2 + $0x188] sm:$0xff] }
 0x11e   :  { %v3683_v13 = vpack.c.bf16 %v1354_v47, %v1352_v54  ;;  %v3887_v52 = vpop.eup %3886  ;;  %8173 = vst [vmem:[#allocation81_spill] sm:$0xff] %v5661_v62  ;;  %v1229_v54 = vld [vmem:[#allocation8 + $0x148] sm:$0xff]  ;;  %v402_v14 = vsub.f32 0.0, %v338_v45  ;;  %v5670_v47 = vld [vmem:[#allocation7 + $0x198] sm:$0xff]  ;;  %v8175_v17 = vmax.f32 %v5496_v7, 0.0  ;;  %v8186_v46 = vmax.f32 %v5551_v22, 0.0 }
 0x11f   :  { %8174 = vst [vmem:[#allocation82_spill] sm:$0xff] %v5663_v19  ;;  %v925_v26 = vsel %vm5636_vm8, %v922_v32, %v919_v4  ;;  %v937_v1 = vmul.f32 0.6931472, %v3887_v52  ;;  %vm5676_vm10 = vcmp.lt.f32.partialorder %v914_v59, 0.0004427343  ;;  %v1231_v4 = vld [vmem:[#allocation8 + $0x158] sm:$0xff]  ;;  %v913_v32 = vmul.f32 %v3881_v25, %v912_v12 }
 0x120   :  { %3684 = vmatpush1.bf16.xpose.msra.mxu0 %v3683_v13  ;;  %v5674_v61 = vadd.f32 %v925_v26, %v8175_v17  ;;  %v508_v13 = vmul.f32 1.442695, %v400_v50  ;;  %vm5685_vm11 = vcmp.lt.f32.partialorder %v932_v58, 0.0004427343  ;;  %v341_v7 = vand.u32 2147483647, %v5666_v11 }
 0x121   :  { %v5681_v6 = vpop.eup %3888  ;;  %v943_v52 = vsel %vm5651_vm9, %v940_v41, %v937_v1  ;;  %v8181_v59 = vmax.f32 %v5500_v39, 0.0  ;;  %v512_v12 = vmul.f32 1.442695, %v402_v14  ;;  %v2506_v58 = vld [vmem:[#allocation10 + $0x170] sm:$0xff]  ;;  %v931_v25 = vmul.f32 %v3883_v36, %v930_v48 }
 0x122   :  { %8176 = vst [vmem:[#allocation83_spill] sm:$0xff] %v5674_v61  ;;  %v1293_v50 = vmul.f32 %v1229_v54, %v5674_v61  ;;  %v953_v26 = vadd.f32 1.0, %v5681_v6  ;;  %3896 = vpow2.f32 %v508_v13  ;;  %v2568_v41 = vsub.f32 %v5699_v33, %v2504_v18  ;;  %v2509_v13 = vld [vmem:[#allocation10 + $0x188] sm:$0xff] }
 0x123   :  { %v5692_v45 = vadd.f32 %v943_v52, %v8181_v59  ;;  %v343_v1 = vand.u32 2147483647, %v5670_v47  ;;  %v3891_v39 = vpop.eup %3890  ;;  %v5708_v52 = vld [vmem:[%s7896_s2 + $0x170] sm:$0xff]  ;;  %v405_v59 = vsub.f32 0.0, %v341_v7  ;;  %v956_v36 = vmul.f32 -0.5, %v5681_v6 }
 0x124   :  { %v1357_v54 = vadd.f32 %v1293_v50, %v5532_v28  ;;  %3898 = vlog2.f32 %v953_v26  ;;  %v971_v48 = vadd.f32 1.0, %v3891_v39  ;;  %v2570_v18 = vsub.f32 %v5708_v52, %v2506_v58 }
 0x125   :  { %8182 = vst [vmem:[#allocation84_spill] sm:$0xff] %v5692_v45  ;;  %v1295_v17 = vmul.f32 %v1231_v4, %v5692_v45  ;;  %v3893_v14 = vpop.eup %3892  ;;  %v974_v28 = vmul.f32 -0.5, %v3891_v39  ;;  %3900 = vpow2.f32 %v512_v12  ;;  %v959_v26 = vand.u32 2147483647, %v5681_v6  ;;  %v1228_v45 = vld [vmem:[#allocation8 + $0x140] sm:$0xff] }
 0x126   :  { %v3895_v37 = vpop.eup %3894  ;;  %v910_v62 = vmul.f32 0.6931472, %v3893_v14  ;;  %3902 = vlog2.f32 %v971_v48  ;;  %v5715_v19 = vmul.f32 %v2568_v41, %v2568_v41  ;;  %v407_v58 = vsub.f32 0.0, %v343_v1  ;;  %v5725_v41 = vld [vmem:[#allocation7 + $0x180] sm:$0xff] }
 0x127   :  { %v1359_v4 = vadd.f32 %v1295_v17, %v5539_v10  ;;  %v928_v50 = vmul.f32 0.6931472, %v3895_v37  ;;  %v518_v63 = vmul.f32 1.442695, %v405_v59  ;;  %v8184_v17 = vmax.f32 %v5542_v3, 0.0  ;;  %v1230_v37 = vld [vmem:[#allocation8 + $0x150] sm:$0xff] }
 0x128   :  { %8183 = vst [vmem:[#allocation85_spill] sm:$0xff] %v5715_v19  ;;  %v916_v61 = vsel %vm5676_vm10, %v913_v32, %v910_v62  ;;  %v957_v14 = vadd.f32 1.0, %v956_v36  ;;  %v977_v48 = vand.u32 2147483647, %v3891_v39  ;;  %v975_v32 = vadd.f32 1.0, %v974_v28  ;;  %v2511_v59 = vld [vmem:[#allocation10 + $0x198] sm:$0xff] }
 0x129   :  { %v3685_v7 = vpack.c.bf16 %v1359_v4, %v1357_v54  ;;  %v934_v10 = vsel %vm5685_vm11, %v931_v25, %v928_v50  ;;  %v5723_v12 = vadd.f32 %v916_v61, %v8184_v17  ;;  %3904 = vpow2.f32 %v518_v63  ;;  %v5736_v61 = vld [vmem:[#allocation7 + $0x190] sm:$0xff]  ;;  %v5768_v19 = vld [vmem:[%s7896_s2 + $0x180] sm:$0xff] }
 0x12a   :  { %v5729_v62 = vadd.f32 %v934_v10, %v8186_v46  ;;  %v522_v3 = vmul.f32 1.442695, %v407_v58  ;;  %v5739_v1 = vmul.f32 %v2570_v18, %v2570_v18  ;;  %v2573_v22 = vsub.f32 %v5734_v23, %v2509_v13  ;;  %v5758_v13 = vld [vmem:[%s7896_s2 + $0x198] sm:$0xff] }
 0x12b   :  { %8185 = vst [vmem:[#allocation86_spill] sm:$0xff] %v5723_v12  ;;  %3686 = vmatprep.subr.bf16.mxu0 %v3685_v7  ;;  %v1292_v25 = vmul.f32 %v1228_v45, %v5723_v12  ;;  %vm5744_vm12 = vcmp.lt.f32.partialorder %v959_v26, 0.0004427343  ;;  %v340_v63 = vand.u32 2147483647, %v5725_v41  ;;  %v958_v45 = vmul.f32 %v5681_v6, %v957_v14 }
 0x12c   :  { %8187 = vst [vmem:[#allocation87_spill] sm:$0xff] %v5729_v62  ;;  %8188 = vst [vmem:[#allocation88_spill] sm:$0xff] %v5739_v1  ;;  %v1294_v36 = vmul.f32 %v1230_v37, %v5729_v62  ;;  %3906 = vpow2.f32 %v522_v3  ;;  %v3897_v28 = vpop.eup %3896  ;;  %vm5751_vm13 = vcmp.lt.f32.partialorder %v977_v48, 0.0004427343  ;;  %v342_v26 = vand.u32 2147483647, %v5736_v61 }
 0x12d   :  { %v1356_v50 = vadd.f32 %v1292_v25, %v5593_v27  ;;  %v976_v10 = vmul.f32 %v3891_v39, %v975_v32  ;;  %v944_v17 = vadd.f32 1.0, %v3897_v28  ;;  %v2575_v27 = vsub.f32 %v5758_v13, %v2511_v59  ;;  %v2508_v37 = vld [vmem:[#allocation10 + $0x180] sm:$0xff]  ;;  %v1233_v59 = vld [vmem:[#allocation8 + $0x168] sm:$0xff] }
 0x12e   :  { %v3899_v7 = vpop.eup %3898  ;;  %v1358_v58 = vadd.f32 %v1294_v36, %v5598_v20  ;;  %v5763_v14 = vmul.f32 %v2573_v22, %v2573_v22  ;;  %v404_v48 = vsub.f32 0.0, %v340_v63  ;;  %v406_v46 = vsub.f32 0.0, %v342_v26  ;;  %v1235_v36 = vld [vmem:[#allocation8 + $0x178] sm:$0xff] }
 0x12f   :  { %v955_v6 = vmul.f32 0.6931472, %v3899_v7  ;;  %v3901_v3 = vpop.eup %3900  ;;  %3908 = vlog2.f32 %v944_v17  ;;  %v947_v54 = vmul.f32 -0.5, %v3897_v28  ;;  %v2572_v63 = vsub.f32 %v5768_v19, %v2508_v37 }
 0x130   :  { %8193 = vst [vmem:[#allocation89_spill] sm:$0xff] %v5763_v14  ;;  %v3687_v25 = vpack.c.bf16 %v1358_v58, %v1356_v50  ;;  %v3903_v39 = vpop.eup %3902  ;;  %v962_v22 = vadd.f32 1.0, %v3901_v3  ;;  %v8194_v26 = vmax.f32 %v5574_v53, 0.0  ;;  %v965_v58 = vmul.f32 -0.5, %v3901_v3  ;;  %v2510_v14 = vld [vmem:[#allocation10 + $0x190] sm:$0xff] }
 0x131   :  { %v961_v32 = vsel %vm5744_vm12, %v958_v45, %v955_v6  ;;  %v973_v50 = vmul.f32 0.6931472, %v3903_v39  ;;  %v516_v17 = vmul.f32 1.442695, %v404_v48  ;;  %v950_v20 = vand.u32 2147483647, %v3897_v28 }
 0x132   :  { %3688 = vmatpush1.bf16.xpose.msra.mxu0 %v3687_v25  ;;  %v5777_v7 = vadd.f32 %v961_v32, %v8194_v26  ;;  %3910 = vlog2.f32 %v962_v22  ;;  %v5779_v1 = vmul.f32 %v2575_v27, %v2575_v27  ;;  %v520_v4 = vmul.f32 1.442695, %v406_v46  ;;  %v5787_v53 = vld [vmem:[%s7896_s2 + $0x190] sm:$0xff] }
 0x133   :  { %v3905_v45 = vpop.eup %3904  ;;  %v979_v6 = vsel %vm5751_vm13, %v976_v10, %v973_v50  ;;  %v948_v25 = vadd.f32 1.0, %v947_v54  ;;  %3912 = vpow2.f32 %v516_v17  ;;  %v8197_v48 = vmax.f32 %v5586_v44, 0.0  ;;  %v5796_v54 = vld [vmem:[#allocation7 + $0x1a8] sm:$0xff]  ;;  %v5800_v17 = vld [vmem:[#allocation7 + $0x1b8] sm:$0xff] }
 0x134   :  { %8195 = vst [vmem:[#allocation90_spill] sm:$0xff] %v5777_v7  ;;  %8196 = vst [vmem:[#allocation91_spill] sm:$0xff] %v5779_v1  ;;  %v1297_v37 = vmul.f32 %v1233_v59, %v5777_v7  ;;  %v989_v27 = vadd.f32 1.0, %v3905_v45  ;;  %v992_v46 = vmul.f32 -0.5, %v3905_v45  ;;  %v2574_v32 = vsub.f32 %v5787_v53, %v2510_v14  ;;  %v2513_v7 = vld [vmem:[#allocation10 + $0x1a8] sm:$0xff] }
 0x135   :  { %v5791_v39 = vadd.f32 %v979_v6, %v8197_v48  ;;  %v966_v10 = vadd.f32 1.0, %v965_v58  ;;  %v968_v22 = vand.u32 2147483647, %v3901_v3  ;;  %3914 = vpow2.f32 %v520_v4 }
 0x136   :  { %v3907_v18 = vpop.eup %3906  ;;  %v5794_v59 = vmul.f32 %v2572_v63, %v2572_v63  ;;  %v1361_v26 = vadd.f32 %v1297_v37, %v5634_v38  ;;  %3916 = vlog2.f32 %v989_v27  ;;  %v949_v6 = vmul.f32 %v3897_v28, %v948_v25 }
 0x137   :  { %8198 = vst [vmem:[#allocation92_spill] sm:$0xff] %v5791_v39  ;;  %v1299_v50 = vmul.f32 %v1235_v36, %v5791_v39  ;;  %v1007_v44 = vadd.f32 1.0, %v3907_v18  ;;  %vm5802_vm14 = vcmp.lt.f32.partialorder %v950_v20, 0.0004427343  ;;  %v993_v14 = vadd.f32 1.0, %v992_v46 }
 0x138   :  { %8199 = vst [vmem:[#allocation93_spill] sm:$0xff] %v5794_v59  ;;  %v995_v58 = vand.u32 2147483647, %v3905_v45  ;;  %v1010_v4 = vmul.f32 -0.5, %v3907_v18  ;;  %v345_v59 = vand.u32 2147483647, %v5796_v54  ;;  %v967_v1 = vmul.f32 %v3901_v3, %v966_v10 }
 0x139   :  { %v1363_v63 = vadd.f32 %v1299_v50, %v5647_v0  ;;  %3918 = vlog2.f32 %v1007_v44  ;;  %v3909_v36 = vpop.eup %3908  ;;  %vm5808_vm15 = vcmp.lt.f32.partialorder %v968_v22, 0.0004427343  ;;  %v5812_v37 = vmul.f32 %v2574_v32, %v2574_v32  ;;  %v5821_v22 = vld [vmem:[#allocation7 + $0x1a0] sm:$0xff]  ;;  %v2515_v50 = vld [vmem:[#allocation10 + $0x1b8] sm:$0xff] }
 0x13a   :  { %v347_v28 = vand.u32 2147483647, %v5800_v17  ;;  %v946_v25 = vmul.f32 0.6931472, %v3909_v36  ;;  %v1013_v27 = vand.u32 2147483647, %v3907_v18 }
 0x13b   :  { %8204 = vst [vmem:[#allocation94_spill] sm:$0xff] %v5812_v37  ;;  %v3689_v20 = vpack.c.bf16 %v1363_v63, %v1361_v26  ;;  %v409_v46 = vsub.f32 0.0, %v345_v59  ;;  %vm5815_vm0 = vcmp.lt.f32.partialorder %v995_v58, 0.0004427343  ;;  %v1232_v44 = vld [vmem:[#allocation8 + $0x160] sm:$0xff]  ;;  %v994_v63 = vmul.f32 %v3905_v45, %v993_v14  ;;  %v5828_v58 = vld [vmem:[%s7896_s2 + $0x1a8] sm:$0xff] }
 0x13c   :  { %v411_v10 = vsub.f32 0.0, %v347_v28  ;;  %v3911_v32 = vpop.eup %3910  ;;  %v952_v26 = vsel %vm5802_vm14, %v949_v6, %v946_v25  ;;  %v1011_v59 = vadd.f32 1.0, %v1010_v4  ;;  %v8207_v28 = vmax.f32 %v5649_v51, 0.0  ;;  %v5835_v6 = vld [vmem:[#allocation7 + $0x1b0] sm:$0xff]  ;;  %v5844_v4 = vld [vmem:[%s7896_s2 + $0x1b8] sm:$0xff] }
 0x13d   :  { %3690 = vmatprep.subr.bf16.mxu0 %v3689_v20  ;;  %v526_v36 = vmul.f32 1.442695, %v409_v46  ;;  %v3913_v37 = vpop.eup %3912  ;;  %v964_v3 = vmul.f32 0.6931472, %v3911_v32  ;;  %v2577_v48 = vsub.f32 %v5828_v58, %v2513_v7  ;;  %vm5837_vm1 = vcmp.lt.f32.partialorder %v1013_v27, 0.0004427343 }
 0x13e   :  { %v5832_v39 = vadd.f32 %v952_v26, %v8207_v28  ;;  %v530_v20 = vmul.f32 1.442695, %v411_v10  ;;  %v980_v14 = vadd.f32 1.0, %v3913_v37  ;;  %v344_v51 = vand.u32 2147483647, %v5821_v22  ;;  %v1234_v46 = vld [vmem:[#allocation8 + $0x170] sm:$0xff] }
 0x13f   :  { %3920 = vpow2.f32 %v526_v36  ;;  %v5847_v25 = vpop.eup %3914  ;;  %v970_v7 = vsel %vm5808_vm15, %v967_v1, %v964_v3  ;;  %v2579_v10 = vsub.f32 %v5844_v4, %v2515_v50  ;;  %v8210_v26 = vmax.f32 %v5656_v55, 0.0 }
 0x140   :  { %v1296_v27 = vmul.f32 %v1232_v44, %v5832_v39  ;;  %3922 = vpow2.f32 %v530_v20  ;;  %v3917_v32 = vpop.eup %3916  ;;  %v1012_v12 = vmul.f32 %v3907_v18, %v1011_v59  ;;  %v346_v36 = vand.u32 2147483647, %v5835_v6 }
 0x141   :  { %v5855_v28 = vadd.f32 %v970_v7, %v8210_v26  ;;  %3924 = vlog2.f32 %v980_v14  ;;  %v991_v62 = vmul.f32 0.6931472, %v3917_v32  ;;  %v983_v15 = vmul.f32 -0.5, %v3913_v37  ;;  %v1237_v14 = vld [vmem:[#allocation8 + $0x188] sm:$0xff] }
 0x142   :  { %v998_v38 = vadd.f32 1.0, %v5847_v25  ;;  %v5859_v1 = vmul.f32 %v2577_v48, %v2577_v48  ;;  %v1360_v50 = vadd.f32 %v1296_v27, %v5699_v33  ;;  %v408_v55 = vsub.f32 0.0, %v344_v51  ;;  %v1239_v51 = vld [vmem:[#allocation8 + $0x198] sm:$0xff] }
 0x143   :  { %v3919_v3 = vpop.eup %3918  ;;  %v1298_v44 = vmul.f32 %v1234_v46, %v5855_v28  ;;  %v997_v18 = vsel %vm5815_vm0, %v994_v63, %v991_v62  ;;  %v1001_v7 = vmul.f32 -0.5, %v5847_v25  ;;  %v8212_v48 = vmax.f32 %v5666_v11, 0.0 }
 0x144   :  { %8211 = vst [vmem:[#allocation95_spill] sm:$0xff] %v5859_v1  ;;  %v1009_v59 = vmul.f32 0.6931472, %v3919_v3  ;;  %3926 = vlog2.f32 %v998_v38  ;;  %v986_v46 = vand.u32 2147483647, %v3913_v37  ;;  %v410_v1 = vsub.f32 0.0, %v346_v36 }
 0x145   :  { %v1362_v32 = vadd.f32 %v1298_v44, %v5708_v52  ;;  %v5870_v26 = vadd.f32 %v997_v18, %v8212_v48  ;;  %v984_v27 = vadd.f32 1.0, %v983_v15  ;;  %v1004_v62 = vand.u32 2147483647, %v5847_v25 }
 0x146   :  { %v1015_v33 = vsel %vm5837_vm1, %v1012_v12, %v1009_v59  ;;  %v524_v0 = vmul.f32 1.442695, %v408_v55  ;;  %v8214_v38 = vmax.f32 %v5670_v47, 0.0  ;;  %v528_v11 = vmul.f32 1.442695, %v410_v1  ;;  %v2512_v12 = vld [vmem:[#allocation10 + $0x1a0] sm:$0xff] }
 0x147   :  { %8213 = vst [vmem:[#allocation96_spill] sm:$0xff] %v5870_v26  ;;  %v3691_v63 = vpack.c.bf16 %v1362_v32, %v1360_v50  ;;  %v1301_v52 = vmul.f32 %v1237_v14, %v5870_v26  ;;  %v1002_v44 = vadd.f32 1.0, %v1001_v7  ;;  %v5880_v18 = vmul.f32 %v2579_v10, %v2579_v10  ;;  %v2514_v55 = vld [vmem:[#allocation10 + $0x1b0] sm:$0xff]  ;;  %v5896_v32 = vld [vmem:[%s7896_s2 + $0x1a0] sm:$0xff]  ;;  %v5924_v47 = vld [vmem:[%s7896_s2 + $0x1c8] sm:$0xff] }
 0x148   :  { %v5877_v3 = vadd.f32 %v1015_v33, %v8214_v38  ;;  %3928 = vpow2.f32 %v524_v0  ;;  %vm5885_vm2 = vcmp.lt.f32.partialorder %v986_v46, 0.0004427343  ;;  %v985_v59 = vmul.f32 %v3913_v37, %v984_v27  ;;  %v5902_v37 = vld [vmem:[%s7896_s2 + $0x1b0] sm:$0xff]  ;;  %v5905_v27 = vld [vmem:[#allocation7 + $0x1c8] sm:$0xff]  ;;  %v5951_v10 = vld [vmem:[%s7896_s2 + $0x1d8] sm:$0xff] }
 0x149   :  { %8216 = vst [vmem:[#allocation98_spill] sm:$0xff] %v5880_v18  ;;  %v3921_v45 = vpop.eup %3920  ;;  %3692 = vmatpush1.bf16.xpose.msra.mxu0 %v3691_v63  ;;  %v1365_v50 = vadd.f32 %v1301_v52, %v5734_v23  ;;  %3930 = vpow2.f32 %v528_v11  ;;  %vm5889_vm3 = vcmp.lt.f32.partialorder %v1004_v62, 0.0004427343  ;;  %v5907_v62 = vld [vmem:[#allocation7 + $0x1d8] sm:$0xff]  ;;  %v1003_v63 = vmul.f32 %v5847_v25, %v1002_v44  ;;  %v1236_v52 = vld [vmem:[#allocation8 + $0x180] sm:$0xff] }
 0x14a   :  { %8215 = vst [vmem:[#allocation97_spill] sm:$0xff] %v5877_v3  ;;  %v1303_v15 = vmul.f32 %v1239_v51, %v5877_v3  ;;  %v3923_v1 = vpop.eup %3922  ;;  %v1025_v14 = vadd.f32 1.0, %v3921_v45  ;;  %v1028_v7 = vmul.f32 -0.5, %v3921_v45  ;;  %v2576_v51 = vsub.f32 %v5896_v32, %v2512_v12  ;;  %v2518_v3 = vld [vmem:[#allocation10 + $0x1d0] sm:$0xff] }
 0x14b   :  { %v3925_v23 = vpop.eup %3924  ;;  %v1043_v46 = vadd.f32 1.0, %v3923_v1  ;;  %v1046_v33 = vmul.f32 -0.5, %v3923_v1  ;;  %v2578_v38 = vsub.f32 %v5902_v37, %v2514_v55  ;;  %v1031_v11 = vand.u32 2147483647, %v3921_v45 }
 0x14c   :  { %v1367_v48 = vadd.f32 %v1303_v15, %v5758_v13  ;;  %v982_v0 = vmul.f32 0.6931472, %v3925_v23  ;;  %3932 = vlog2.f32 %v1025_v14  ;;  %v1049_v15 = vand.u32 2147483647, %v3923_v1  ;;  %v2517_v23 = vld [vmem:[#allocation10 + $0x1c8] sm:$0xff] }
 0x14d   :  { %3934 = vlog2.f32 %v1043_v46  ;;  %v1029_v12 = vadd.f32 1.0, %v1028_v7  ;;  %v349_v18 = vand.u32 2147483647, %v5905_v27  ;;  %v351_v26 = vand.u32 2147483647, %v5907_v62 }
 0x14e   :  { %v3693_v13 = vpack.c.bf16 %v1367_v48, %v1365_v50  ;;  %v3927_v36 = vpop.eup %3926  ;;  %v988_v20 = vsel %vm5885_vm2, %v985_v59, %v982_v0  ;;  %v8221_v44 = vmax.f32 %v5725_v41, 0.0  ;;  %v1047_v50 = vadd.f32 1.0, %v1046_v33  ;;  %v2519_v0 = vld [vmem:[#allocation10 + $0x1d8] sm:$0xff] }
 0x14f   :  { %v1000_v25 = vmul.f32 0.6931472, %v3927_v36  ;;  %v5919_v14 = vmul.f32 %v2576_v51, %v2576_v51  ;;  %v413_v48 = vsub.f32 0.0, %v349_v18  ;;  %v415_v46 = vsub.f32 0.0, %v351_v26  ;;  %v5992_v26 = vld [vmem:[#allocation7 + $0x1f8] sm:$0xff] }
 0x150   :  { %3694 = vmatprep.subr.bf16.mxu0 %v3693_v13  ;;  %v5917_v55 = vadd.f32 %v988_v20, %v8221_v44  ;;  %v1238_v20 = vld [vmem:[#allocation8 + $0x190] sm:$0xff]  ;;  %v5931_v33 = vmul.f32 %v2578_v38, %v2578_v38  ;;  %v2581_v51 = vsub.f32 %v5924_v47, %v2517_v23  ;;  %v8225_v44 = vmax.f32 %v5736_v61, 0.0 }
 0x151   :  { %8223 = vst [vmem:[#allocation100_spill] sm:$0xff] %v5919_v14  ;;  %v1006_v41 = vsel %vm5889_vm3, %v1003_v63, %v1000_v25  ;;  %v1030_v7 = vmul.f32 %v3921_v45, %v1029_v12  ;;  %vm5940_vm4 = vcmp.lt.f32.partialorder %v1031_v11, 0.0004427343  ;;  %vm5944_vm5 = vcmp.lt.f32.partialorder %v1049_v15, 0.0004427343  ;;  %v5953_v63 = vld [vmem:[#allocation7 + $0x1c0] sm:$0xff] }
 0x152   :  { %8222 = vst [vmem:[#allocation99_spill] sm:$0xff] %v5917_v55  ;;  %v1300_v36 = vmul.f32 %v1236_v52, %v5917_v55  ;;  %8224 = vst [vmem:[#allocation101_spill] sm:$0xff] %v5931_v33  ;;  %v5934_v13 = vpop.eup %3928  ;;  %v5938_v59 = vadd.f32 %v1006_v41, %v8225_v44  ;;  %v1048_v61 = vmul.f32 %v3923_v1, %v1047_v50  ;;  %v534_v52 = vmul.f32 1.442695, %v413_v48  ;;  %v5962_v41 = vld [vmem:[#allocation7 + $0x1d0] sm:$0xff]  ;;  %v1241_v14 = vld [vmem:[#allocation8 + $0x1a8] sm:$0xff] }
 0x153   :  { %v5955_v38 = vpop.eup %3930  ;;  %v1016_v45 = vadd.f32 1.0, %v5934_v13  ;;  %v2583_v11 = vsub.f32 %v5951_v10, %v2519_v0  ;;  %v538_v25 = vmul.f32 1.442695, %v415_v46  ;;  %v5964_v44 = vmul.f32 %v2581_v51, %v2581_v51  ;;  %v5975_v55 = vld [vmem:[#allocation7 + $0x1e8] sm:$0xff] }
 0x154   :  { %v1302_v15 = vmul.f32 %v1238_v20, %v5938_v59  ;;  %v1364_v12 = vadd.f32 %v1300_v36, %v5768_v19  ;;  %v1034_v23 = vadd.f32 1.0, %v5955_v38  ;;  %v348_v1 = vand.u32 2147483647, %v5953_v63  ;;  %v2516_v19 = vld [vmem:[#allocation10 + $0x1c0] sm:$0xff] }
 0x155   :  { %3936 = vlog2.f32 %v1016_v45  ;;  %8230 = vst [vmem:[#allocation102_spill] sm:$0xff] %v5964_v44  ;;  %v1019_v0 = vmul.f32 -0.5, %v5934_v13  ;;  %v1037_v46 = vmul.f32 -0.5, %v5955_v38  ;;  %v350_v51 = vand.u32 2147483647, %v5962_v41 }
 0x156   :  { %v3933_v50 = vpop.eup %3932  ;;  %v1366_v48 = vadd.f32 %v1302_v15, %v5787_v53  ;;  %3938 = vlog2.f32 %v1034_v23  ;;  %v5973_v33 = vmul.f32 %v2583_v11, %v2583_v11  ;;  %v1022_v15 = vand.u32 2147483647, %v5934_v13  ;;  %v1243_v11 = vld [vmem:[#allocation8 + $0x1b8] sm:$0xff] }
 0x157   :  { %v3935_v20 = vpop.eup %3934  ;;  %v1027_v36 = vmul.f32 0.6931472, %v3933_v50  ;;  %3940 = vpow2.f32 %v534_v52  ;;  %v412_v23 = vsub.f32 0.0, %v348_v1  ;;  %v414_v50 = vsub.f32 0.0, %v350_v51 }
 0x158   :  { %v3695_v45 = vpack.c.bf16 %v1366_v48, %v1364_v12  ;;  %v1045_v44 = vmul.f32 0.6931472, %v3935_v20  ;;  %3942 = vpow2.f32 %v538_v25  ;;  %8231 = vst [vmem:[#allocation103_spill] sm:$0xff] %v5973_v33  ;;  %v8232_v12 = vmax.f32 %v5796_v54, 0.0  ;;  %v6001_v54 = vld [vmem:[%s7896_s2 + $0x1d0] sm:$0xff] }
 0x159   :  { %v1033_v53 = vsel %vm5940_vm4, %v1030_v7, %v1027_v36  ;;  %v1020_v48 = vadd.f32 1.0, %v1019_v0  ;;  %v1040_v20 = vand.u32 2147483647, %v5955_v38  ;;  %v5990_v7 = vld [vmem:[%s7896_s2 + $0x1c0] sm:$0xff]  ;;  %v8234_v1 = vmax.f32 %v5800_v17, 0.0 }
 0x15a   :  { %3696 = vmatpush1.bf16.xpose.msra.mxu0 %v3695_v45  ;;  %v1051_v52 = vsel %vm5944_vm5, %v1048_v61, %v1045_v44  ;;  %v5984_v25 = vadd.f32 %v1033_v53, %v8232_v12  ;;  %v1038_v18 = vadd.f32 1.0, %v1037_v46  ;;  %v532_v61 = vmul.f32 1.442695, %v412_v23 }
 0x15b   :  { %v5996_v36 = vadd.f32 %v1051_v52, %v8234_v1  ;;  %v536_v44 = vmul.f32 1.442695, %v414_v50  ;;  %v2580_v51 = vsub.f32 %v5990_v7, %v2516_v19  ;;  %v2582_v45 = vsub.f32 %v6001_v54, %v2518_v3  ;;  %v6040_v52 = vld [vmem:[%s7896_s2 + $0x1f8] sm:$0xff] }
 0x15c   :  { %8233 = vst [vmem:[#allocation104_spill] sm:$0xff] %v5984_v25  ;;  %v1305_v0 = vmul.f32 %v1241_v14, %v5984_v25  ;;  %v353_v53 = vand.u32 2147483647, %v5975_v55  ;;  %vm6008_vm6 = vcmp.lt.f32.partialorder %v1022_v15, 0.0004427343  ;;  %3944 = vpow2.f32 %v532_v61 }
 0x15d   :  { %8235 = vst [vmem:[#allocation105_spill] sm:$0xff] %v5996_v36  ;;  %v1307_v17 = vmul.f32 %v1243_v11, %v5996_v36  ;;  %v355_v46 = vand.u32 2147483647, %v5992_v26  ;;  %v1021_v50 = vmul.f32 %v5934_v13, %v1020_v48  ;;  %3946 = vpow2.f32 %v536_v44 }
 0x15e   :  { %v1369_v23 = vadd.f32 %v1305_v0, %v5828_v58  ;;  %v417_v14 = vsub.f32 0.0, %v353_v53  ;;  %v1039_v12 = vmul.f32 %v5955_v38, %v1038_v18  ;;  %vm6017_vm7 = vcmp.lt.f32.partialorder %v1040_v20, 0.0004427343  ;;  %v2523_v38 = vld [vmem:[#allocation10 + $0x1f8] sm:$0xff]  ;;  %v1240_v53 = vld [vmem:[#allocation8 + $0x1a0] sm:$0xff] }
 0x15f   :  { %v3937_v19 = vpop.eup %3936  ;;  %v1371_v3 = vadd.f32 %v1307_v17, %v5844_v4  ;;  %v419_v15 = vsub.f32 0.0, %v355_v46  ;;  %v6021_v33 = vmul.f32 %v2580_v51, %v2580_v51  ;;  %v6023_v25 = vmul.f32 %v2582_v45, %v2582_v45 }
 0x160   :  { %v3939_v1 = vpop.eup %3938  ;;  %v1018_v61 = vmul.f32 0.6931472, %v3937_v19  ;;  %v542_v0 = vmul.f32 1.442695, %v417_v14  ;;  %v6029_v19 = vld [vmem:[#allocation7 + $0x1e0] sm:$0xff]  ;;  %v1242_v14 = vld [vmem:[#allocation8 + $0x1b0] sm:$0xff]  ;;  %v6047_v11 = vsub.f32 %v6040_v52, %v2523_v38 }
 0x161   :  { %8240 = vst [vmem:[#allocation106_spill] sm:$0xff] %v6021_v33  ;;  %8241 = vst [vmem:[#allocation107_spill] sm:$0xff] %v6023_v25  ;;  %v3941_v13 = vpop.eup %3940  ;;  %v3697_v48 = vpack.c.bf16 %v1371_v3, %v1369_v23  ;;  %v1036_v44 = vmul.f32 0.6931472, %v3939_v1  ;;  %v546_v51 = vmul.f32 1.442695, %v419_v15 }
 0x162   :  { %v3943_v20 = vpop.eup %3942  ;;  %v1024_v18 = vsel %vm6008_vm6, %v1021_v50, %v1018_v61  ;;  %v1061_v17 = vadd.f32 1.0, %v3941_v13  ;;  %v1064_v46 = vmul.f32 -0.5, %v3941_v13  ;;  %v8242_v23 = vmax.f32 %v5821_v22, 0.0  ;;  %8245 = vst [vmem:[#allocation109_spill] sm:$0xff] %v6047_v11 }
 0x163   :  { %3698 = vmatprep.subr.bf16.mxu0 %v3697_v48  ;;  %v1042_v45 = vsel %vm6017_vm7, %v1039_v12, %v1036_v44  ;;  %v1079_v1 = vadd.f32 1.0, %v3943_v20  ;;  %v1082_v4 = vmul.f32 -0.5, %v3943_v20  ;;  %v8244_v50 = vmax.f32 %v5835_v6, 0.0  ;;  %v6049_v12 = vld [vmem:[#allocation7 + $0x1f0] sm:$0xff] }
 0x164   :  { %v6035_v3 = vadd.f32 %v1024_v18, %v8242_v23  ;;  %3948 = vlog2.f32 %v1061_v17  ;;  %v1067_v48 = vand.u32 2147483647, %v3941_v13  ;;  %v352_v44 = vand.u32 2147483647, %v6029_v19 }
 0x165   :  { %v6044_v15 = vadd.f32 %v1042_v45, %v8244_v50  ;;  %3950 = vlog2.f32 %v1079_v1  ;;  %v1065_v23 = vadd.f32 1.0, %v1064_v46  ;;  %v1083_v6 = vadd.f32 1.0, %v1082_v4 }
 0x166   :  { %8243 = vst [vmem:[#allocation108_spill] sm:$0xff] %v6035_v3  ;;  %v1304_v61 = vmul.f32 %v1240_v53, %v6035_v3  ;;  %3952 = vpow2.f32 %v542_v0  ;;  %v3945_v17 = vpop.eup %3944  ;;  %v1085_v45 = vand.u32 2147483647, %v3943_v20  ;;  %v354_v50 = vand.u32 2147483647, %v6049_v12 }
 0x167   :  { %v1306_v18 = vmul.f32 %v1242_v14, %v6044_v15  ;;  %3954 = vpow2.f32 %v546_v51  ;;  %v3947_v53 = vpop.eup %3946  ;;  %v1052_v22 = vadd.f32 1.0, %v3945_v17  ;;  %v1055_v58 = vmul.f32 -0.5, %v3945_v17 }
 0x168   :  { %v1368_v38 = vadd.f32 %v1304_v61, %v5896_v32  ;;  %v1058_v14 = vand.u32 2147483647, %v3945_v17  ;;  %v1070_v46 = vadd.f32 1.0, %v3947_v53  ;;  %v1073_v4 = vmul.f32 -0.5, %v3947_v53 }
 0x169   :  { %v1370_v1 = vadd.f32 %v1306_v18, %v5902_v37  ;;  %v1076_v0 = vand.u32 2147483647, %v3947_v53  ;;  %v416_v33 = vsub.f32 0.0, %v352_v44  ;;  %3956 = vlog2.f32 %v1052_v22 }
 0x16a   :  { %v1056_v25 = vadd.f32 1.0, %v1055_v58  ;;  %vm6063_vm8 = vcmp.lt.f32.partialorder %v1067_v48, 0.0004427343  ;;  %3958 = vlog2.f32 %v1070_v46  ;;  %v1074_v61 = vadd.f32 1.0, %v1073_v4  ;;  %v1245_v4 = vld [vmem:[#allocation8 + $0x1c8] sm:$0xff] }
 0x16b   :  { %v3699_v11 = vpack.c.bf16 %v1370_v1, %v1368_v38  ;;  %v418_v37 = vsub.f32 0.0, %v354_v50  ;;  %v1066_v18 = vmul.f32 %v3941_v13, %v1065_v23  ;;  %v1084_v3 = vmul.f32 %v3943_v20, %v1083_v6 }
 0x16c   :  { %vm6067_vm9 = vcmp.lt.f32.partialorder %v1085_v45, 0.0004427343  ;;  %v540_v22 = vmul.f32 1.442695, %v416_v33  ;;  %v1057_v58 = vmul.f32 %v3945_v17, %v1056_v25  ;;  %vm6071_vm10 = vcmp.lt.f32.partialorder %v1058_v14, 0.0004427343 }
 0x16d   :  { %3700 = vmatpush1.bf16.xpose.msra.mxu0 %v3699_v11  ;;  %vm6075_vm11 = vcmp.lt.f32.partialorder %v1076_v0, 0.0004427343  ;;  %v544_v38 = vmul.f32 1.442695, %v418_v37  ;;  %v1075_v11 = vmul.f32 %v3947_v53, %v1074_v61  ;;  %v6080_v13 = vstv %s6055_s3 }
 0x16e   :  { %v3949_v50 = vpop.eup %3948  ;;  %3960 = vpow2.f32 %v540_v22  ;;  %v2913_v20 = vmul.f32 %v4765_v35, %v4765_v35  ;;  %v6085_v25 = vstv %s6059_s28  ;;  %v2914_v6 = vmul.f32 %v4739_v16, %v4739_v16 }
 0x16f   :  { %v3951_v23 = vpop.eup %3950  ;;  %v1063_v33 = vmul.f32 0.6931472, %v3949_v50  ;;  %3962 = vpow2.f32 %v544_v38  ;;  %v2909_v1 = vmul.f32 %v4712_v2, %v4712_v2  ;;  %v8254_v38 = vmax.f32 %v5905_v27, 0.0 }
 0x170   :  { %v3953_v17 = vpop.eup %3952  ;;  %v1081_v45 = vmul.f32 0.6931472, %v3951_v23  ;;  %3964 = vlog2.f32 %v4765_v35  ;;  %v2977_v53 = vadd.f32 %v2913_v20, %v4637_v30  ;;  %v1247_v35 = vld [vmem:[#allocation8 + $0x1d8] sm:$0xff]  ;;  %v8255_v23 = vmax.f32 %v5907_v62, 0.0 }
 0x171   :  { %v3955_v14 = vpop.eup %3954  ;;  %v1069_v46 = vsel %vm6063_vm8, %v1066_v18, %v1063_v33  ;;  %v1097_v0 = vadd.f32 1.0, %v3953_v17  ;;  %v1100_v61 = vmul.f32 -0.5, %v3953_v17  ;;  %v1103_v37 = vand.u32 2147483647, %v3953_v17 }
 0x172   :  { %v1087_v22 = vsel %vm6067_vm9, %v1084_v3, %v1081_v45  ;;  %v6099_v50 = vadd.f32 %v1069_v46, %v8254_v38  ;;  %v1115_v30 = vadd.f32 1.0, %v3955_v14  ;;  %v1118_v20 = vmul.f32 -0.5, %v3955_v14 }
 0x173   :  { %v6103_v32 = vadd.f32 %v1087_v22, %v8255_v23  ;;  %3966 = vlog2.f32 %v1097_v0  ;;  %v1101_v51 = vadd.f32 1.0, %v1100_v61  ;;  %v6107_v18 = vmul.f32 %v4752_v24, %v6085_v25  ;;  %v3957_v33 = vpop.eup %3956 }
 0x174   :  { %v1309_v36 = vmul.f32 %v1245_v4, %v6099_v50  ;;  %3968 = vlog2.f32 %v1115_v30  ;;  %v1119_v27 = vadd.f32 1.0, %v1118_v20  ;;  %v1121_v3 = vand.u32 2147483647, %v3955_v14  ;;  %v3959_v45 = vpop.eup %3958  ;;  %v1244_v20 = vld [vmem:[#allocation8 + $0x1c0] sm:$0xff] }
 0x175   :  { %v1311_v46 = vmul.f32 %v1247_v35, %v6103_v32  ;;  %v1054_v38 = vmul.f32 0.6931472, %v3957_v33  ;;  %vm6111_vm12 = vcmp.lt.f32.partialorder %v1103_v37, 0.0004427343  ;;  %3970 = vlog2.f32 %v4739_v16 }
 0x176   :  { %v1373_v0 = vadd.f32 %v1309_v36, %v5924_v47  ;;  %v1072_v24 = vmul.f32 0.6931472, %v3959_v45  ;;  %v1102_v61 = vmul.f32 %v3953_v17, %v1101_v51  ;;  %v1120_v22 = vmul.f32 %v3955_v14, %v1119_v27  ;;  %v1246_v14 = vld [vmem:[#allocation8 + $0x1d0] sm:$0xff] }
 0x177   :  { %v1375_v4 = vadd.f32 %v1311_v46, %v5951_v10  ;;  %v1060_v30 = vsel %vm6071_vm10, %v1057_v58, %v1054_v38  ;;  %vm6120_vm13 = vcmp.lt.f32.partialorder %v1121_v3, 0.0004427343  ;;  %v2978_v37 = vadd.f32 %v2914_v6, %v4626_v8 }
 0x178   :  { %v3961_v23 = vpop.eup %3960  ;;  %v1078_v16 = vsel %vm6075_vm11, %v1075_v11, %v1072_v24  ;;  %v8260_v47 = vmax.f32 %v5953_v63, 0.0  ;;  %3972 = vlog2.f32 %v4712_v2  ;;  %v2973_v10 = vadd.f32 %v2909_v1, %v4593_v43 }
 0x179   :  { %v3963_v58 = vpop.eup %3962  ;;  %v3701_v44 = vpack.c.bf16 %v1375_v4, %v1373_v0  ;;  %v8261_v51 = vmax.f32 %v5962_v41, 0.0  ;;  %v1088_v8 = vadd.f32 1.0, %v3961_v23  ;;  %v1091_v6 = vmul.f32 -0.5, %v3961_v23 }
 0x17a   :  { %v6129_v17 = vadd.f32 %v1060_v30, %v8260_v47  ;;  %v3965_v36 = vpop.eup %3964  ;;  %v1094_v11 = vand.u32 2147483647, %v3961_v23  ;;  %v1106_v63 = vadd.f32 1.0, %v3963_v58  ;;  %v1109_v27 = vmul.f32 -0.5, %v3963_v58  ;;  %v162_v47 = vld [vmem:[%s7896_s2 + $0x1f0] sm:$0xff] }
 0x17b   :  { %v6135_v33 = vadd.f32 %v1078_v16, %v8261_v51  ;;  %3702 = vmatprep.subr.bf16.mxu0 %v3701_v44  ;;  %3974 = vlog2.f32 %v1088_v8  ;;  %v1092_v2 = vadd.f32 1.0, %v1091_v6  ;;  %v1112_v43 = vand.u32 2147483647, %v3963_v58 }
 0x17c   :  { %v1308_v48 = vmul.f32 %v1244_v20, %v6129_v17  ;;  %3976 = vlog2.f32 %v1106_v63  ;;  %v1110_v41 = vadd.f32 1.0, %v1109_v27  ;;  %v3042_v45 = vmul.f32 %v2977_v53, %v6085_v25 }
 0x17d   :  { %v1310_v3 = vmul.f32 %v1246_v14, %v6135_v33  ;;  %v3967_v46 = vpop.eup %3966  ;;  %v1093_v0 = vmul.f32 %v3961_v23, %v1092_v2  ;;  %vm6142_vm14 = vcmp.lt.f32.partialorder %v1094_v11, 0.0004427343  ;;  %v2597_v4 = vmul.f32 0.6931472, %v3965_v36 }
 0x17e   :  { %v1372_v1 = vadd.f32 %v1308_v48, %v5990_v7  ;;  %v3969_v30 = vpop.eup %3968  ;;  %v1099_v20 = vmul.f32 0.6931472, %v3967_v46  ;;  %v6146_v16 = vmul.f32 %v3963_v58, %v1110_v41  ;;  %vm6148_vm15 = vcmp.lt.f32.partialorder %v1112_v43, 0.0004427343  ;;  %v1249_v58 = vld [vmem:[#allocation8 + $0x1e8] sm:$0xff]  ;;  %v1251_v48 = vld [vmem:[#allocation8 + $0x1f8] sm:$0xff] }
 0x17f   :  { %v1374_v38 = vadd.f32 %v1310_v3, %v6001_v54  ;;  %v3043_v7 = vmul.f32 %v2978_v37, %v6085_v25  ;;  %3978 = vlog2.f32 %v4693_v40  ;;  %v3971_v53 = vpop.eup %3970  ;;  %v1117_v23 = vmul.f32 0.6931472, %v3969_v30 }
 0x180   :  { %v2721_v14 = vsub.f32 %v6080_v13, %v2597_v4  ;;  %v3038_v44 = vmul.f32 %v2973_v10, %v6085_v25  ;;  %v1105_v51 = vsel %vm6111_vm12, %v1102_v61, %v1099_v20  ;;  %v2599_v8 = vmul.f32 0.6931472, %v3971_v53  ;;  %v161_v61 = vld [vmem:[%s7896_s2 + $0x1e8] sm:$0xff] }
 0x181   :  { %v3703_v54 = vpack.c.bf16 %v1374_v38, %v1372_v1  ;;  %3980 = vlog2.f32 %v4769_v5  ;;  %v2915_v6 = vmul.f32 %v4769_v5, %v4769_v5  ;;  %v1123_v40 = vsel %vm6120_vm13, %v1120_v22, %v1117_v23  ;;  %v8269_v23 = vld [vmem:[#allocation20_spill] sm:$0xff] }
 0x182   :  { %v8266_v37 = vmax.f32 %v5975_v55, 0.0  ;;  %v2785_v10 = vmul.f32 2.0, %v2721_v14  ;;  %3982 = vlog2.f32 %v4749_v29  ;;  %v3973_v62 = vpop.eup %3972  ;;  %v8267_v11 = vmax.f32 %v5992_v26, 0.0 }
 0x183   :  { %3704 = vmatpush1.bf16.xpose.msra.mxu0 %v3703_v54  ;;  %v2722_v35 = vsub.f32 %v6080_v13, %v2599_v8  ;;  %v2916_v55 = vmul.f32 %v4749_v29, %v4749_v29  ;;  %v2979_v22 = vadd.f32 %v2915_v6, %v4640_v49  ;;  %v2589_v3 = vmul.f32 0.6931472, %v3973_v62  ;;  %v8268_v49 = vld [vmem:[#allocation17_spill] sm:$0xff]  ;;  %v1248_v6 = vld [vmem:[#allocation8 + $0x1e0] sm:$0xff]  ;;  %v1250_v62 = vld [vmem:[#allocation8 + $0x1f0] sm:$0xff] }
 0x184   :  { %v6165_v36 = vadd.f32 %v1105_v51, %v8266_v37  ;;  %v6173_v5 = vadd.f32 %v1123_v40, %v8267_v11  ;;  %v3106_v27 = vadd.f32 %v3042_v45, %v2785_v10  ;;  %3984 = vlog2.f32 %v4717_v60 }
 0x185   :  { %v2786_v43 = vmul.f32 2.0, %v2722_v35  ;;  %v2980_v26 = vadd.f32 %v2916_v55, %v4628_v9  ;;  %v6184_v1 = vmul.f32 %v2979_v22, %v6085_v25  ;;  %v3975_v41 = vpop.eup %3974  ;;  %v2717_v29 = vsub.f32 %v6080_v13, %v2589_v3 }
 0x186   :  { %v1313_v63 = vmul.f32 %v1249_v58, %v6165_v36  ;;  %v1315_v2 = vmul.f32 %v1251_v48, %v6173_v5  ;;  %v3585_v38 = vadd.f32 -1.0, %v3106_v27  ;;  %3986 = vlog2.f32 %v8268_v49  ;;  %v3977_v4 = vpop.eup %3976 }
 0x187   :  { %v1090_v30 = vmul.f32 0.6931472, %v3975_v41  ;;  %v3107_v60 = vadd.f32 %v3043_v7, %v2786_v43  ;;  %v3045_v20 = vmul.f32 %v2980_v26, %v6085_v25  ;;  %v1108_v53 = vmul.f32 0.6931472, %v3977_v4  ;;  %v8273_v26 = vld [vmem:[#allocation24_spill] sm:$0xff] }
 0x188   :  { %v1377_v46 = vadd.f32 %v1313_v63, %v161_v61  ;;  %v1379_v45 = vadd.f32 %v1315_v2, %v6040_v52  ;;  %v3234_v54 = vmul.f32 0.5, %v3585_v38  ;;  %v2781_v9 = vmul.f32 2.0, %v2717_v29  ;;  %v8270_v52 = vld [vmem:[#allocation18_spill] sm:$0xff] }
 0x189   :  { %v6192_v14 = vmul.f32 %v8269_v23, %v6085_v25  ;;  %v3979_v51 = vpop.eup %3978  ;;  %v1096_v8 = vsel %vm6142_vm14, %v1093_v0, %v1090_v30  ;;  %v3586_v40 = vadd.f32 -1.0, %v3107_v60  ;;  %v6198_v37 = vmul.f32 %v8270_v52, %v6085_v25  ;;  %v160_v0 = vld [vmem:[%s7896_s2 + $0x1e0] sm:$0xff] }
 0x18a   :  { %v3705_v58 = vpack.c.bf16 %v1379_v45, %v1377_v46  ;;  %v1114_v7 = vsel %vm6148_vm15, %v6146_v16, %v1108_v53  ;;  %v8271_v48 = vmax.f32 %v6029_v19, 0.0  ;;  %v2591_v61 = vmul.f32 0.6931472, %v3979_v51 }
 0x18b   :  { %v3102_v11 = vadd.f32 %v3038_v44, %v2781_v9  ;;  %v3981_v35 = vpop.eup %3980  ;;  %v8272_v24 = vmax.f32 %v6049_v12, 0.0  ;;  %v3235_v22 = vmul.f32 0.5, %v3586_v40  ;;  %3988 = vlog2.f32 %v4958_v56  ;;  %v8274_v9 = vld [vmem:[#allocation22_spill] sm:$0xff] }
 0x18c   :  { %v6205_v10 = vadd.f32 %v1096_v8, %v8271_v48  ;;  %3706 = vmatprep.subr.bf16.mxu0 %v3705_v58  ;;  %v2919_v19 = vmul.f32 %v4958_v56, %v4958_v56  ;;  %v3983_v16 = vpop.eup %3982  ;;  %v2718_v63 = vsub.f32 %v6080_v13, %v2591_v61  ;;  %v2601_v3 = vmul.f32 0.6931472, %v3981_v35  ;;  %v8276_v35 = vld [vmem:[#allocation23_spill] sm:$0xff] }
 0x18d   :  { %v6212_v55 = vadd.f32 %v1114_v7, %v8272_v24  ;;  %v3581_v27 = vadd.f32 -1.0, %v3102_v11  ;;  %v3332_v2 = vadd.f32 %v3235_v22, %v3234_v54  ;;  %v2603_v43 = vmul.f32 0.6931472, %v3983_v16  ;;  %v8275_v7 = vld [vmem:[#allocation19_spill] sm:$0xff] }
 0x18e   :  { %v1312_v44 = vmul.f32 %v1248_v6, %v6205_v10  ;;  %3990 = vlog2.f32 %v8273_v26  ;;  %v3985_v41 = vpop.eup %3984  ;;  %v2782_v56 = vmul.f32 2.0, %v2718_v63  ;;  %v2723_v29 = vsub.f32 %v6080_v13, %v2601_v3 }
 0x18f   :  { %v1314_v12 = vmul.f32 %v1250_v62, %v6212_v55  ;;  %v3230_v38 = vmul.f32 0.5, %v3581_v27  ;;  %3333 = vadd.xlane.f32.xlu1 %v3332_v2  ;;  %v2724_v4 = vsub.f32 %v6080_v13, %v2603_v43  ;;  %v2593_v45 = vmul.f32 0.6931472, %v3985_v41 }
 0x190   :  { %v1376_v46 = vadd.f32 %v1312_v44, %v160_v0  ;;  %v2920_v30 = vmul.f32 %v8273_v26, %v8273_v26  ;;  %v3987_v60 = vpop.eup %3986  ;;  %v3103_v53 = vadd.f32 %v6107_v18, %v2782_v56  ;;  %v2787_v54 = vmul.f32 2.0, %v2723_v29  ;;  %v2383_v26 = vld [vmem:[%s7895_s1] sm:$0xff]  ;;  %v8278_v56 = vld [vmem:[#allocation16_spill] sm:$0xff] }
 0x191   :  { %v1378_v49 = vadd.f32 %v1314_v12, %v162_v47  ;;  %v2983_v23 = vadd.f32 %v2919_v19, %v8274_v9  ;;  %3992 = vlog2.f32 %v4945_v21  ;;  %v2788_v58 = vmul.f32 2.0, %v2724_v4  ;;  %v8277_v12 = vld [vmem:[#allocation21_spill] sm:$0xff] }
 0x192   :  { %v2595_v8 = vmul.f32 0.6931472, %v3987_v60  ;;  %v2719_v6 = vsub.f32 %v6080_v13, %v2593_v45  ;;  %v3582_v40 = vadd.f32 -1.0, %v3103_v53  ;;  %v3108_v52 = vadd.f32 %v6184_v1, %v2787_v54 }
 0x193   :  { %v3707_v51 = vpack.c.bf16 %v1378_v49, %v1376_v46  ;;  %v2984_v48 = vadd.f32 %v2920_v30, %v8275_v7  ;;  %v3048_v62 = vmul.f32 %v2983_v23, %v6085_v25  ;;  %v3109_v61 = vadd.f32 %v3045_v20, %v2788_v58 }
 0x194   :  { %v2720_v18 = vsub.f32 %v6080_v13, %v2595_v8  ;;  %v2783_v11 = vmul.f32 2.0, %v2719_v6  ;;  %3994 = vlog2.f32 %v8276_v35  ;;  %v3231_v0 = vmul.f32 0.5, %v3582_v40  ;;  %v8279_v8 = vld [vmem:[#allocation32_spill] sm:$0xff] }
 0x195   :  { %3708 = vmatpush1.bf16.xpose.msra.mxu0 %v3707_v51  ;;  %v3587_v24 = vadd.f32 -1.0, %v3108_v52  ;;  %v3049_v22 = vmul.f32 %v2984_v48, %v6085_v25  ;;  %v2917_v19 = vmul.f32 %v4945_v21, %v4945_v21  ;;  %v3989_v16 = vpop.eup %3988  ;;  %v3588_v1 = vadd.f32 -1.0, %v3109_v61  ;;  %v8280_v52 = vld [vmem:[#allocation28_spill] sm:$0xff]  ;;  %v8281_v48 = vld [vmem:[#allocation31_spill] sm:$0xff] }
 0x196   :  { %v2784_v47 = vmul.f32 2.0, %v2720_v18  ;;  %v3104_v44 = vadd.f32 %v6192_v14, %v2783_v11  ;;  %v2918_v20 = vmul.f32 %v8276_v35, %v8276_v35  ;;  %v3326_v63 = vadd.f32 %v3231_v0, %v3230_v38  ;;  %v8282_v35 = vld [vmem:[#allocation26_spill] sm:$0xff] }
 0x197   :  { %v3236_v27 = vmul.f32 0.5, %v3587_v24  ;;  %v2609_v3 = vmul.f32 0.6931472, %v3989_v16  ;;  %v2981_v2 = vadd.f32 %v2917_v19, %v8277_v12  ;;  %v3237_v41 = vmul.f32 0.5, %v3588_v1  ;;  %v8284_v12 = vld [vmem:[#allocation44_spill] sm:$0xff] }
 0x198   :  { %v3991_v43 = vpop.eup %3990  ;;  %v3105_v21 = vadd.f32 %v6198_v37, %v2784_v47  ;;  %v3583_v46 = vadd.f32 -1.0, %v3104_v44  ;;  %v2982_v29 = vadd.f32 %v2918_v20, %v8278_v56  ;;  %3327 = vadd.xlane.f32.xlu0 %v3326_v63  ;;  %3996 = vlog2.f32 %v5006_v31  ;;  %v8283_v44 = vld [vmem:[#allocation27_spill] sm:$0xff] }
 0x199   :  { %v2611_v14 = vmul.f32 0.6931472, %v3991_v43  ;;  %v2727_v49 = vsub.f32 %v6080_v13, %v2609_v3  ;;  %v3046_v38 = vmul.f32 %v2981_v2, %v6085_v25  ;;  %v3335_v4 = vadd.f32 %v3237_v41, %v3236_v27  ;;  %v8285_v2 = vld [vmem:[#allocation25_spill] sm:$0xff]  ;;  %v8286_v41 = vld [vmem:[#allocation36_spill] sm:$0xff] }
 0x19a   :  { %v3584_v45 = vadd.f32 -1.0, %v3105_v21  ;;  %v3232_v30 = vmul.f32 0.5, %v3583_v46  ;;  %v3047_v60 = vmul.f32 %v2982_v29, %v6085_v25  ;;  %3998 = vlog2.f32 %v4985_v34 }
 0x19b   :  { %v3993_v53 = vpop.eup %3992  ;;  %v2728_v37 = vsub.f32 %v6080_v13, %v2611_v14  ;;  %v2791_v54 = vmul.f32 2.0, %v2727_v49  ;;  %v2923_v9 = vmul.f32 %v5006_v31, %v5006_v31  ;;  %3336 = vadd.xlane.f32.xlu1 %v3335_v4  ;;  %v2924_v58 = vmul.f32 %v4985_v34, %v4985_v34 }
 0x19c   :  { %2450 = vmatmul.mubr.f32.vlgmr.msra.gmra.mrb[0].mxu0 %v2383_v26  ;;  %v3233_v23 = vmul.f32 0.5, %v3584_v45  ;;  %v2605_v51 = vmul.f32 0.6931472, %v3993_v53  ;;  %4000 = vlog2.f32 %v8279_v8  ;;  %v2921_v0 = vmul.f32 %v8279_v8, %v8279_v8 }
 0x19d   :  { %v2792_v6 = vmul.f32 2.0, %v2728_v37  ;;  %v3112_v40 = vadd.f32 %v3048_v62, %v2791_v54  ;;  %v2987_v7 = vadd.f32 %v2923_v9, %v8280_v52  ;;  %4002 = vlog2.f32 %v8281_v48  ;;  %v8288_v54 = vld [vmem:[#allocation35_spill] sm:$0xff]  ;;  %v8290_v52 = vld [vmem:[#allocation34_spill] sm:$0xff] }
 0x19e   :  { %v3995_v61 = vpop.eup %3994  ;;  %v3329_v18 = vadd.f32 %v3233_v23, %v3232_v30  ;;  %v2725_v11 = vsub.f32 %v6080_v13, %v2605_v51  ;;  %v2988_v31 = vadd.f32 %v2924_v58, %v8282_v35  ;;  %v2922_v47 = vmul.f32 %v8281_v48, %v8281_v48  ;;  %v8289_v23 = vld [vmem:[#allocation30_spill] sm:$0xff] }
 0x19f   :  { %v3113_v24 = vadd.f32 %v3049_v22, %v2792_v6  ;;  %v3591_v19 = vadd.f32 -1.0, %v3112_v40  ;;  %v2607_v34 = vmul.f32 0.6931472, %v3995_v61  ;;  %v3052_v16 = vmul.f32 %v2987_v7, %v6085_v25 }
 0x1a0   :  { %3330 = vadd.xlane.f32.xlu0 %v3329_v18  ;;  %v2789_v62 = vmul.f32 2.0, %v2725_v11  ;;  %v3053_v1 = vmul.f32 %v2988_v31, %v6085_v25  ;;  %v2985_v20 = vadd.f32 %v2921_v0, %v8283_v44  ;;  %4004 = vlog2.f32 %v8284_v12 }
 0x1a1   :  { %v3592_v63 = vadd.f32 -1.0, %v3113_v24  ;;  %v3240_v27 = vmul.f32 0.5, %v3591_v19  ;;  %v2726_v3 = vsub.f32 %v6080_v13, %v2607_v34  ;;  %v2986_v43 = vadd.f32 %v2922_v47, %v8285_v2  ;;  %v8293_v2 = vld [vmem:[#allocation29_spill] sm:$0xff] }
 0x1a2   :  { %v3110_v22 = vadd.f32 %v3046_v38, %v2789_v62  ;;  %v3050_v26 = vmul.f32 %v2985_v20, %v6085_v25  ;;  %4006 = vlog2.f32 %v8286_v41  ;;  %v3997_v21 = vpop.eup %3996  ;;  %v2927_v29 = vmul.f32 %v8284_v12, %v8284_v12  ;;  %v8287_v38 = vld [vmem:[#allocation40_spill] sm:$0xff]  ;;  %v8291_v62 = vld [vmem:[#allocation50_spill] sm:$0xff] }
 0x1a3   :  { %v3241_v46 = vmul.f32 0.5, %v3592_v63  ;;  %v2790_v56 = vmul.f32 2.0, %v2726_v3  ;;  %v2928_v14 = vmul.f32 %v8286_v41, %v8286_v41  ;;  %v2617_v4 = vmul.f32 0.6931472, %v3997_v21  ;;  %v8292_v63 = vld [vmem:[#allocation33_spill] sm:$0xff]  ;;  %v8294_v41 = vld [vmem:[#allocation47_spill] sm:$0xff] }
 0x1a4   :  { %v3589_v49 = vadd.f32 -1.0, %v3110_v22  ;;  %v3051_v45 = vmul.f32 %v2986_v43, %v6085_v25  ;;  %4008 = vlog2.f32 %v8287_v38  ;;  %v3999_v30 = vpop.eup %3998  ;;  %v2991_v9 = vadd.f32 %v2927_v29, %v8288_v54 }
 0x1a5   :  { %v3341_v53 = vadd.f32 %v3241_v46, %v3240_v27  ;;  %v3111_v37 = vadd.f32 %v3047_v60, %v2790_v56  ;;  %v2992_v51 = vadd.f32 %v2928_v14, %v8289_v23  ;;  %v2619_v6 = vmul.f32 0.6931472, %v3999_v30 }
 0x1a6   :  { %v4001_v58 = vpop.eup %4000  ;;  %v3238_v8 = vmul.f32 0.5, %v3589_v49  ;;  %v2731_v40 = vsub.f32 %v6080_v13, %v2617_v4  ;;  %4010 = vlog2.f32 %v8290_v52  ;;  %v3056_v18 = vmul.f32 %v2991_v9, %v6085_v25 }
 0x1a7   :  { %v4003_v7 = vpop.eup %4002  ;;  %3342 = vadd.xlane.f32.xlu1 %v3341_v53  ;;  %v3590_v48 = vadd.f32 -1.0, %v3111_v37  ;;  %v2613_v61 = vmul.f32 0.6931472, %v4001_v58  ;;  %v3057_v11 = vmul.f32 %v2992_v51, %v6085_v25  ;;  %v2732_v60 = vsub.f32 %v6080_v13, %v2619_v6 }
 0x1a8   :  { %v2795_v35 = vmul.f32 2.0, %v2731_v40  ;;  %v2615_v31 = vmul.f32 0.6931472, %v4003_v7  ;;  %v2925_v0 = vmul.f32 %v8287_v38, %v8287_v38  ;;  %v2926_v34 = vmul.f32 %v8290_v52, %v8290_v52 }
 0x1a9   :  { %v3239_v24 = vmul.f32 0.5, %v3590_v48  ;;  %v2729_v19 = vsub.f32 %v6080_v13, %v2613_v61  ;;  %4012 = vlog2.f32 %v8291_v62  ;;  %v2796_v47 = vmul.f32 2.0, %v2732_v60 }
 0x1aa   :  { %v3116_v44 = vadd.f32 %v3052_v16, %v2795_v35  ;;  %v2730_v20 = vsub.f32 %v6080_v13, %v2615_v31  ;;  %v2989_v27 = vadd.f32 %v2925_v0, %v8292_v63  ;;  %v4005_v3 = vpop.eup %4004  ;;  %v2990_v43 = vadd.f32 %v2926_v34, %v8293_v2  ;;  %v8295_v0 = vld [vmem:[#allocation41_spill] sm:$0xff] }
 0x1ab   :  { %v3338_v12 = vadd.f32 %v3239_v24, %v3238_v8  ;;  %v2793_v22 = vmul.f32 2.0, %v2729_v19  ;;  %4014 = vlog2.f32 %v8294_v41  ;;  %v3117_v46 = vadd.f32 %v3053_v1, %v2796_v47 }
 0x1ac   :  { %v4007_v21 = vpop.eup %4006  ;;  %v3595_v56 = vadd.f32 -1.0, %v3116_v44  ;;  %v2794_v29 = vmul.f32 2.0, %v2730_v20  ;;  %v2625_v14 = vmul.f32 0.6931472, %v4005_v3  ;;  %v3054_v16 = vmul.f32 %v2989_v27, %v6085_v25  ;;  %v8296_v44 = vld [vmem:[#allocation38_spill] sm:$0xff] }
 0x1ad   :  { %3339 = vadd.xlane.f32.xlu0 %v3338_v12  ;;  %v3114_v49 = vadd.f32 %v3050_v26, %v2793_v22  ;;  %v2627_v4 = vmul.f32 0.6931472, %v4007_v21  ;;  %v3055_v38 = vmul.f32 %v2990_v43, %v6085_v25  ;;  %v3596_v53 = vadd.f32 -1.0, %v3117_v46 }
 0x1ae   :  { %v4009_v30 = vpop.eup %4008  ;;  %v3244_v37 = vmul.f32 0.5, %v3595_v56  ;;  %v3115_v54 = vadd.f32 %v3051_v45, %v2794_v29  ;;  %v2735_v9 = vsub.f32 %v6080_v13, %v2625_v14  ;;  %v2931_v58 = vmul.f32 %v8291_v62, %v8291_v62  ;;  %v8297_v56 = vld [vmem:[#allocation49_spill] sm:$0xff] }
 0x1af   :  { %v3593_v23 = vadd.f32 -1.0, %v3114_v49  ;;  %v2736_v51 = vsub.f32 %v6080_v13, %v2627_v4  ;;  %v2621_v1 = vmul.f32 0.6931472, %v4009_v30  ;;  %v3245_v26 = vmul.f32 0.5, %v3596_v53  ;;  %v8298_v4 = vld [vmem:[#allocation45_spill] sm:$0xff] }
 0x1b0   :  { %v4011_v8 = vpop.eup %4010  ;;  %v3594_v6 = vadd.f32 -1.0, %v3115_v54  ;;  %v2799_v40 = vmul.f32 2.0, %v2735_v9  ;;  %v2932_v52 = vmul.f32 %v8294_v41, %v8294_v41  ;;  %v2995_v24 = vadd.f32 %v2931_v58, %v8295_v0  ;;  %v8303_v0 = vld [vmem:[#allocation48_spill] sm:$0xff] }
 0x1b1   :  { %v3242_v7 = vmul.f32 0.5, %v3593_v23  ;;  %v2800_v48 = vmul.f32 2.0, %v2736_v51  ;;  %v2623_v61 = vmul.f32 0.6931472, %v4011_v8  ;;  %v2733_v45 = vsub.f32 %v6080_v13, %v2621_v1  ;;  %v8299_v51 = vld [vmem:[#allocation56_spill] sm:$0xff] }
 0x1b2   :  { %v3347_v60 = vadd.f32 %v3245_v26, %v3244_v37  ;;  %v3243_v35 = vmul.f32 0.5, %v3594_v6  ;;  %v3120_v31 = vadd.f32 %v3056_v18, %v2799_v40  ;;  %v2996_v20 = vadd.f32 %v2932_v52, %v8296_v44  ;;  %v8301_v26 = vld [vmem:[#allocation37_spill] sm:$0xff]  ;;  %v8302_v52 = vld [vmem:[#allocation54_spill] sm:$0xff] }
 0x1b3   :  { %v4013_v19 = vpop.eup %4012  ;;  %v3121_v34 = vadd.f32 %v3057_v11, %v2800_v48  ;;  %v2734_v62 = vsub.f32 %v6080_v13, %v2623_v61  ;;  %v2797_v47 = vmul.f32 2.0, %v2733_v45  ;;  %v3060_v12 = vmul.f32 %v2995_v24, %v6085_v25 }
 0x1b4   :  { %3348 = vadd.xlane.f32.xlu1 %v3347_v60  ;;  %v3344_v63 = vadd.f32 %v3243_v35, %v3242_v7  ;;  %v3599_v27 = vadd.f32 -1.0, %v3120_v31  ;;  %v2633_v3 = vmul.f32 0.6931472, %v4013_v19  ;;  %v3061_v18 = vmul.f32 %v2996_v20, %v6085_v25  ;;  %v8304_v19 = vld [vmem:[#allocation43_spill] sm:$0xff] }
 0x1b5   :  { %v4015_v22 = vpop.eup %4014  ;;  %v3600_v2 = vadd.f32 -1.0, %v3121_v34  ;;  %v2798_v43 = vmul.f32 2.0, %v2734_v62  ;;  %v3118_v41 = vadd.f32 %v3054_v16, %v2797_v47  ;;  %4016 = vlog2.f32 %v8297_v56  ;;  %v8305_v62 = vld [vmem:[#allocation55_spill] sm:$0xff] }
 0x1b6   :  { %3345 = vadd.xlane.f32.xlu0 %v3344_v63  ;;  %v3248_v21 = vmul.f32 0.5, %v3599_v27  ;;  %v2635_v11 = vmul.f32 0.6931472, %v4015_v22  ;;  %v2739_v46 = vsub.f32 %v6080_v13, %v2633_v3  ;;  %4018 = vlog2.f32 %v8298_v4  ;;  %v8306_v20 = vld [vmem:[#allocation51_spill] sm:$0xff] }
 0x1b7   :  { %v3249_v29 = vmul.f32 0.5, %v3600_v2  ;;  %v3119_v14 = vadd.f32 %v3055_v38, %v2798_v43  ;;  %v3597_v49 = vadd.f32 -1.0, %v3118_v41  ;;  %v2929_v16 = vmul.f32 %v8297_v56, %v8297_v56  ;;  %v8300_v38 = vld [vmem:[#allocation39_spill] sm:$0xff]  ;;  %v8307_v43 = vld [vmem:[#allocation46_spill] sm:$0xff] }
 0x1b8   :  { %v2740_v30 = vsub.f32 %v6080_v13, %v2635_v11  ;;  %v2803_v53 = vmul.f32 2.0, %v2739_v46  ;;  %v2930_v37 = vmul.f32 %v8298_v4, %v8298_v4  ;;  %4020 = vlog2.f32 %v8299_v51  ;;  %v8308_v46 = vld [vmem:[#allocation42_spill] sm:$0xff] }
 0x1b9   :  { %v3353_v54 = vadd.f32 %v3249_v29, %v3248_v21  ;;  %v3598_v9 = vadd.f32 -1.0, %v3119_v14  ;;  %v3246_v23 = vmul.f32 0.5, %v3597_v49  ;;  %v2993_v8 = vadd.f32 %v2929_v16, %v8300_v38  ;;  %v8309_v14 = vld [vmem:[#allocation64_spill] sm:$0xff] }
 0x1ba   :  { %v2804_v1 = vmul.f32 2.0, %v2740_v30  ;;  %v3124_v58 = vadd.f32 %v3060_v12, %v2803_v53  ;;  %v2994_v6 = vadd.f32 %v2930_v37, %v8301_v26  ;;  %4022 = vlog2.f32 %v8302_v52  ;;  %v8310_v53 = vld [vmem:[#allocation58_spill] sm:$0xff] }
 0x1bb   :  { %3354 = vadd.xlane.f32.xlu1 %v3353_v54  ;;  %v3247_v40 = vmul.f32 0.5, %v3598_v9  ;;  %v2935_v7 = vmul.f32 %v8299_v51, %v8299_v51  ;;  %v2936_v48 = vmul.f32 %v8302_v52, %v8302_v52  ;;  %v3058_v60 = vmul.f32 %v2993_v8, %v6085_v25  ;;  %v8311_v9 = vld [vmem:[#allocation53_spill] sm:$0xff]  ;;  %v8313_v52 = vld [vmem:[#allocation72_spill] sm:$0xff] }
 0x1bc   :  { %v3125_v61 = vadd.f32 %v3061_v18, %v2804_v1  ;;  %v3603_v45 = vadd.f32 -1.0, %v3124_v58  ;;  %v3059_v35 = vmul.f32 %v2994_v6, %v6085_v25  ;;  %4024 = vlog2.f32 %v8305_v62  ;;  %v8312_v51 = vld [vmem:[#allocation61_spill] sm:$0xff] }
 0x1bd   :  { %v3350_v31 = vadd.f32 %v3247_v40, %v3246_v23  ;;  %v2999_v24 = vadd.f32 %v2935_v7, %v8303_v0  ;;  %v3000_v34 = vadd.f32 %v2936_v48, %v8304_v19  ;;  %4026 = vlog2.f32 %v8306_v20  ;;  %v8315_v19 = vld [vmem:[#allocation52_spill] sm:$0xff] }
 0x1be   :  { %v3604_v47 = vadd.f32 -1.0, %v3125_v61  ;;  %v3252_v44 = vmul.f32 0.5, %v3603_v45  ;;  %v2933_v63 = vmul.f32 %v8305_v62, %v8305_v62  ;;  %v2934_v12 = vmul.f32 %v8306_v20, %v8306_v20  ;;  %v8314_v45 = vld [vmem:[#allocation57_spill] sm:$0xff]  ;;  %v8316_v62 = vld [vmem:[#allocation66_spill] sm:$0xff] }
 0x1bf   :  { %3351 = vadd.xlane.f32.xlu0 %v3350_v31  ;;  %v3064_v27 = vmul.f32 %v2999_v24, %v6085_v25  ;;  %v3065_v3 = vmul.f32 %v3000_v34, %v6085_v25  ;;  %4028 = vlog2.f32 %v5445_v42  ;;  %v4017_v22 = vpop.eup %4016  ;;  %v2939_v18 = vmul.f32 %v5445_v42, %v5445_v42 }
 0x1c0   :  { %v3253_v2 = vmul.f32 0.5, %v3604_v47  ;;  %v2997_v41 = vadd.f32 %v2933_v63, %v8307_v43  ;;  %4030 = vlog2.f32 %v5394_v57  ;;  %v4019_v21 = vpop.eup %4018  ;;  %v2629_v11 = vmul.f32 0.6931472, %v4017_v22 }
 0x1c1   :  { %v2998_v56 = vadd.f32 %v2934_v12, %v8308_v46  ;;  %v2940_v29 = vmul.f32 %v5394_v57, %v5394_v57  ;;  %4032 = vlog2.f32 %v8309_v14  ;;  %v2631_v4 = vmul.f32 0.6931472, %v4019_v21 }
 0x1c2   :  { %v3359_v49 = vadd.f32 %v3253_v2, %v3252_v44  ;;  %v3062_v30 = vmul.f32 %v2997_v41, %v6085_v25  ;;  %v3003_v16 = vadd.f32 %v2939_v18, %v8310_v53  ;;  %v4021_v37 = vpop.eup %4020  ;;  %v2737_v54 = vsub.f32 %v6080_v13, %v2629_v11 }
 0x1c3   :  { %v3063_v42 = vmul.f32 %v2998_v56, %v6085_v25  ;;  %v3004_v23 = vadd.f32 %v2940_v29, %v8311_v9  ;;  %4034 = vlog2.f32 %v8312_v51  ;;  %v2738_v57 = vsub.f32 %v6080_v13, %v2631_v4 }
 0x1c4   :  { %3360 = vadd.xlane.f32.xlu1 %v3359_v49  ;;  %v2641_v1 = vmul.f32 0.6931472, %v4021_v37  ;;  %v3068_v58 = vmul.f32 %v3003_v16, %v6085_v25  ;;  %v2937_v38 = vmul.f32 %v8309_v14, %v8309_v14  ;;  %v4023_v8 = vpop.eup %4022  ;;  %v2801_v26 = vmul.f32 2.0, %v2737_v54 }
 0x1c5   :  { %v3069_v6 = vmul.f32 %v3004_v23, %v6085_v25  ;;  %v2938_v40 = vmul.f32 %v8312_v51, %v8312_v51  ;;  %4036 = vlog2.f32 %v8313_v52  ;;  %v2802_v7 = vmul.f32 2.0, %v2738_v57 }
 0x1c6   :  { %v2643_v48 = vmul.f32 0.6931472, %v4023_v8  ;;  %v2743_v61 = vsub.f32 %v6080_v13, %v2641_v1  ;;  %v3001_v31 = vadd.f32 %v2937_v38, %v8314_v45  ;;  %v4025_v0 = vpop.eup %4024  ;;  %v3122_v24 = vadd.f32 %v3058_v60, %v2801_v26 }
 0x1c7   :  { %v3002_v34 = vadd.f32 %v2938_v40, %v8315_v19  ;;  %4038 = vlog2.f32 %v8316_v62  ;;  %v6370_v47 = vmul.f32 %v8313_v52, %v8313_v52  ;;  %v4027_v44 = vpop.eup %4026  ;;  %v3123_v20 = vadd.f32 %v3059_v35, %v2802_v7 }
 0x1c8   :  { %v2744_v63 = vsub.f32 %v6080_v13, %v2643_v48  ;;  %v2807_v12 = vmul.f32 2.0, %v2743_v61  ;;  %v2637_v22 = vmul.f32 0.6931472, %v4025_v0  ;;  %v3601_v43 = vadd.f32 -1.0, %v3122_v24 }
 0x1c9   :  { %v4029_v2 = vpop.eup %4028  ;;  %v2639_v41 = vmul.f32 0.6931472, %v4027_v44  ;;  %v3066_v18 = vmul.f32 %v3001_v31, %v6085_v25  ;;  %v3067_v60 = vmul.f32 %v3002_v34, %v6085_v25  ;;  %v3602_v11 = vadd.f32 -1.0, %v3123_v20 }
 0x1ca   :  { %v4031_v21 = vpop.eup %4030  ;;  %v2808_v46 = vmul.f32 2.0, %v2744_v63  ;;  %v3128_v56 = vadd.f32 %v3064_v27, %v2807_v12  ;;  %v2741_v29 = vsub.f32 %v6080_v13, %v2637_v22  ;;  %v3250_v49 = vmul.f32 0.5, %v3601_v43 }
 0x1cb   :  { %v4033_v14 = vpop.eup %4032  ;;  %v2742_v35 = vsub.f32 %v6080_v13, %v2639_v41  ;;  %v2649_v4 = vmul.f32 0.6931472, %v4029_v2  ;;  %v2651_v53 = vmul.f32 0.6931472, %v4031_v21  ;;  %v3251_v16 = vmul.f32 0.5, %v3602_v11 }
 0x1cc   :  { %v3129_v37 = vadd.f32 %v3065_v3, %v2808_v46  ;;  %v3607_v54 = vadd.f32 -1.0, %v3128_v56  ;;  %v2805_v9 = vmul.f32 2.0, %v2741_v29  ;;  %v2645_v38 = vmul.f32 0.6931472, %v4033_v14 }
 0x1cd   :  { %v4035_v23 = vpop.eup %4034  ;;  %v2806_v51 = vmul.f32 2.0, %v2742_v35  ;;  %v2747_v57 = vsub.f32 %v6080_v13, %v2649_v4  ;;  %v2748_v1 = vsub.f32 %v6080_v13, %v2651_v53  ;;  %v3356_v27 = vadd.f32 %v3251_v16, %v3250_v49  ;;  %v8317_v16 = vld [vmem:[#allocation63_spill] sm:$0xff] }
 0x1ce   :  { %v3608_v8 = vadd.f32 -1.0, %v3129_v37  ;;  %v3256_v26 = vmul.f32 0.5, %v3607_v54  ;;  %v3126_v40 = vadd.f32 %v3062_v30, %v2805_v9  ;;  %v2647_v45 = vmul.f32 0.6931472, %v4035_v23  ;;  %v8318_v9 = vld [vmem:[#allocation60_spill] sm:$0xff] }
 0x1cf   :  { %v4037_v52 = vpop.eup %4036  ;;  %v3127_v7 = vadd.f32 %v3063_v42, %v2806_v51  ;;  %v2811_v48 = vmul.f32 2.0, %v2747_v57  ;;  %v2812_v61 = vmul.f32 2.0, %v2748_v1  ;;  %3357 = vadd.xlane.f32.xlu0 %v3356_v27  ;;  %v2745_v0 = vsub.f32 %v6080_v13, %v2645_v38  ;;  %v8319_v51 = vld [vmem:[#allocation69_spill] sm:$0xff] }
 0x1d0   :  { %v3257_v3 = vmul.f32 0.5, %v3608_v8  ;;  %v3605_v31 = vadd.f32 -1.0, %v3126_v40  ;;  %v2657_v24 = vmul.f32 0.6931472, %v4037_v52  ;;  %v2746_v63 = vsub.f32 %v6080_v13, %v2647_v45  ;;  %v8320_v1 = vld [vmem:[#allocation65_spill] sm:$0xff]  ;;  %v8321_v8 = vld [vmem:[#allocation80_spill] sm:$0xff] }
 0x1d1   :  { %v4039_v19 = vpop.eup %4038  ;;  %v3606_v34 = vadd.f32 -1.0, %v3127_v7  ;;  %v3132_v44 = vadd.f32 %v3068_v58, %v2811_v48  ;;  %v3133_v20 = vadd.f32 %v3069_v6, %v2812_v61  ;;  %v2809_v30 = vmul.f32 2.0, %v2745_v0  ;;  %v8322_v40 = vld [vmem:[#allocation62_spill] sm:$0xff]  ;;  %v8323_v7 = vld [vmem:[#allocation76_spill] sm:$0xff] }
 0x1d2   :  { %v3365_v12 = vadd.f32 %v3257_v3, %v3256_v26  ;;  %v3254_v22 = vmul.f32 0.5, %v3605_v31  ;;  %v2659_v2 = vmul.f32 0.6931472, %v4039_v19  ;;  %v2810_v21 = vmul.f32 2.0, %v2746_v63  ;;  %v8324_v3 = vld [vmem:[#allocation59_spill] sm:$0xff] }
 0x1d3   :  { %v3255_v42 = vmul.f32 0.5, %v3606_v34  ;;  %v3611_v43 = vadd.f32 -1.0, %v3132_v44  ;;  %v3612_v41 = vadd.f32 -1.0, %v3133_v20  ;;  %v3130_v11 = vadd.f32 %v3066_v18, %v2809_v30  ;;  %v8325_v34 = vld [vmem:[#allocation71_spill] sm:$0xff]  ;;  %v8326_v20 = vld [vmem:[#allocation77_spill] sm:$0xff] }
 0x1d4   :  { %3366 = vadd.xlane.f32.xlu1 %v3365_v12  ;;  %v2751_v46 = vsub.f32 %v6080_v13, %v2657_v24  ;;  %v2752_v56 = vsub.f32 %v6080_v13, %v2659_v2  ;;  %v2944_v58 = vmul.f32 %v8316_v62, %v8316_v62  ;;  %v3131_v49 = vadd.f32 %v3067_v60, %v2810_v21  ;;  %v8328_v2 = vld [vmem:[#allocation73_spill] sm:$0xff] }
 0x1d5   :  { %v3362_v6 = vadd.f32 %v3255_v42, %v3254_v22  ;;  %v3260_v29 = vmul.f32 0.5, %v3611_v43  ;;  %v3261_v14 = vmul.f32 0.5, %v3612_v41  ;;  %v3609_v35 = vadd.f32 -1.0, %v3130_v11  ;;  %v8327_v22 = vld [vmem:[#allocation68_spill] sm:$0xff] }
 0x1d6   :  { %v2815_v4 = vmul.f32 2.0, %v2751_v46  ;;  %v2816_v53 = vmul.f32 2.0, %v2752_v56  ;;  %v3007_v37 = vadd.f32 %v6370_v47, %v8317_v16  ;;  %v3610_v18 = vadd.f32 -1.0, %v3131_v49  ;;  %v8329_v56 = vld [vmem:[#allocation87_spill] sm:$0xff] }
 0x1d7   :  { %3363 = vadd.xlane.f32.xlu0 %v3362_v6  ;;  %v3371_v54 = vadd.f32 %v3261_v14, %v3260_v29  ;;  %v3008_v23 = vadd.f32 %v2944_v58, %v8318_v9  ;;  %4040 = vlog2.f32 %v8319_v51  ;;  %v3258_v57 = vmul.f32 0.5, %v3609_v35  ;;  %v8330_v6 = vld [vmem:[#allocation70_spill] sm:$0xff]  ;;  %v8331_v14 = vld [vmem:[#allocation67_spill] sm:$0xff]  ;;  %v8332_v35 = vld [vmem:[#allocation84_spill] sm:$0xff] }
 0x1d8   :  { %v3072_v62 = vmul.f32 %v3007_v37, %v6085_v25  ;;  %4042 = vlog2.f32 %v8320_v1  ;;  %v2941_v60 = vmul.f32 %v8319_v51, %v8319_v51  ;;  %v3259_v38 = vmul.f32 0.5, %v3610_v18  ;;  %v8333_v37 = vld [vmem:[#allocation79_spill] sm:$0xff]  ;;  %v8334_v18 = vld [vmem:[#allocation86_spill] sm:$0xff] }
 0x1d9   :  { %3372 = vadd.xlane.f32.xlu1 %v3371_v54  ;;  %v3073_v27 = vmul.f32 %v3008_v23, %v6085_v25  ;;  %v2942_v47 = vmul.f32 %v8320_v1, %v8320_v1  ;;  %4044 = vlog2.f32 %v8321_v8  ;;  %v2947_v48 = vmul.f32 %v8321_v8, %v8321_v8  ;;  %v8335_v1 = vld [vmem:[#allocation75_spill] sm:$0xff] }
 0x1da   :  { %v3136_v26 = vadd.f32 %v3072_v62, %v2815_v4  ;;  %v3005_v52 = vadd.f32 %v2941_v60, %v8322_v40  ;;  %4046 = vlog2.f32 %v8323_v7  ;;  %v3368_v61 = vadd.f32 %v3259_v38, %v3258_v57  ;;  %v8336_v8 = vld [vmem:[#allocation83_spill] sm:$0xff] }
 0x1db   :  { %v3137_v45 = vadd.f32 %v3073_v27, %v2816_v53  ;;  %v3006_v31 = vadd.f32 %v2942_v47, %v8324_v3  ;;  %v2948_v0 = vmul.f32 %v8323_v7, %v8323_v7  ;;  %v3011_v44 = vadd.f32 %v2947_v48, %v8325_v34 }
 0x1dc   :  { %v3615_v24 = vadd.f32 -1.0, %v3136_v26  ;;  %v3070_v19 = vmul.f32 %v3005_v52, %v6085_v25  ;;  %4048 = vlog2.f32 %v8326_v20  ;;  %3369 = vadd.xlane.f32.xlu0 %v3368_v61  ;;  %v2945_v41 = vmul.f32 %v8326_v20, %v8326_v20  ;;  %v8337_v61 = vld [vmem:[#allocation78_spill] sm:$0xff] }
 0x1dd   :  { %v3616_v63 = vadd.f32 -1.0, %v3137_v45  ;;  %v3071_v12 = vmul.f32 %v3006_v31, %v6085_v25  ;;  %v3012_v30 = vadd.f32 %v2948_v0, %v8327_v22  ;;  %4050 = vlog2.f32 %v8328_v2  ;;  %v8338_v0 = vld [vmem:[#allocation74_spill] sm:$0xff]  ;;  %v8339_v22 = vld [vmem:[#allocation92_spill] sm:$0xff] }
 0x1de   :  { %v3264_v42 = vmul.f32 0.5, %v3615_v24  ;;  %v3076_v43 = vmul.f32 %v3011_v44, %v6085_v25  ;;  %v2946_v21 = vmul.f32 %v8328_v2, %v8328_v2  ;;  %4052 = vlog2.f32 %v8329_v56 }
 0x1df   :  { %v3265_v11 = vmul.f32 0.5, %v3616_v63  ;;  %v3077_v46 = vmul.f32 %v3012_v30, %v6085_v25  ;;  %v2951_v58 = vmul.f32 %v8329_v56, %v8329_v56  ;;  %v3009_v29 = vadd.f32 %v2945_v41, %v8330_v6 }
 0x1e0   :  { %v3010_v49 = vadd.f32 %v2946_v21, %v8331_v14  ;;  %4054 = vlog2.f32 %v8332_v35  ;;  %v2952_v4 = vmul.f32 %v8332_v35, %v8332_v35  ;;  %v2949_v9 = vmul.f32 %v8334_v18, %v8334_v18 }
 0x1e1   :  { %v4041_v53 = vpop.eup %4040  ;;  %v3377_v16 = vadd.f32 %v3265_v11, %v3264_v42  ;;  %v3015_v54 = vadd.f32 %v2951_v58, %v8333_v37  ;;  %4056 = vlog2.f32 %v8334_v18  ;;  %v3074_v57 = vmul.f32 %v3009_v29, %v6085_v25 }
 0x1e2   :  { %v4043_v23 = vpop.eup %4042  ;;  %v2653_v51 = vmul.f32 0.6931472, %v4041_v53  ;;  %v3075_v62 = vmul.f32 %v3010_v49, %v6085_v25  ;;  %v3016_v60 = vadd.f32 %v2952_v4, %v8335_v1  ;;  %4058 = vlog2.f32 %v8336_v8 }
 0x1e3   :  { %v4045_v38 = vpop.eup %4044  ;;  %3378 = vadd.xlane.f32.xlu1 %v3377_v16  ;;  %v2655_v27 = vmul.f32 0.6931472, %v4043_v23  ;;  %v3080_v47 = vmul.f32 %v3015_v54, %v6085_v25  ;;  %v2950_v26 = vmul.f32 %v8336_v8, %v8336_v8  ;;  %v3013_v45 = vadd.f32 %v2949_v9, %v8337_v61 }
 0x1e4   :  { %v4047_v40 = vpop.eup %4046  ;;  %v2749_v52 = vsub.f32 %v6080_v13, %v2653_v51  ;;  %v2665_v7 = vmul.f32 0.6931472, %v4045_v38  ;;  %v3081_v48 = vmul.f32 %v3016_v60, %v6085_v25  ;;  %4060 = vlog2.f32 %v5855_v28 }
 0x1e5   :  { %v2750_v3 = vsub.f32 %v6080_v13, %v2655_v27  ;;  %v2667_v31 = vmul.f32 0.6931472, %v4047_v40  ;;  %v3014_v24 = vadd.f32 %v2950_v26, %v8338_v0  ;;  %v6443_v63 = vmul.f32 %v3013_v45, %v6085_v25 }
 0x1e6   :  { %v4049_v34 = vpop.eup %4048  ;;  %v2813_v44 = vmul.f32 2.0, %v2749_v52  ;;  %v2755_v20 = vsub.f32 %v6080_v13, %v2665_v7  ;;  %4062 = vlog2.f32 %v8339_v22  ;;  %v2955_v6 = vmul.f32 %v5855_v28, %v5855_v28 }
 0x1e7   :  { %v4051_v30 = vpop.eup %4050  ;;  %v2814_v2 = vmul.f32 2.0, %v2750_v3  ;;  %v2756_v42 = vsub.f32 %v6080_v13, %v2667_v31  ;;  %v2661_v41 = vmul.f32 0.6931472, %v4049_v34  ;;  %v6448_v21 = vmul.f32 %v3014_v24, %v6085_v25 }
 0x1e8   :  { %v3134_v11 = vadd.f32 %v3070_v19, %v2813_v44  ;;  %v2819_v56 = vmul.f32 2.0, %v2755_v20  ;;  %v2663_v58 = vmul.f32 0.6931472, %v4051_v30  ;;  %v4053_v29 = vpop.eup %4052  ;;  %v2956_v4 = vmul.f32 %v8339_v22, %v8339_v22 }
 0x1e9   :  { %v3135_v14 = vadd.f32 %v3071_v12, %v2814_v2  ;;  %v2820_v49 = vmul.f32 2.0, %v2756_v42  ;;  %v2753_v35 = vsub.f32 %v6080_v13, %v2661_v41  ;;  %v2673_v18 = vmul.f32 0.6931472, %v4053_v29 }
 0x1ea   :  { %v4055_v53 = vpop.eup %4054  ;;  %v3613_v16 = vadd.f32 -1.0, %v3134_v11  ;;  %v3140_v37 = vadd.f32 %v3076_v43, %v2819_v56  ;;  %v2754_v54 = vsub.f32 %v6080_v13, %v2663_v58  ;;  %4064 = vlog2.f32 %v5832_v39 }
 0x1eb   :  { %v4057_v19 = vpop.eup %4056  ;;  %v3614_v9 = vadd.f32 -1.0, %v3135_v14  ;;  %v3141_v23 = vadd.f32 %v3077_v46, %v2820_v49  ;;  %v2817_v51 = vmul.f32 2.0, %v2753_v35  ;;  %v2675_v1 = vmul.f32 0.6931472, %v4055_v53  ;;  %v8340_v35 = vld [vmem:[#allocation88_spill] sm:$0xff] }
 0x1ec   :  { %v3262_v28 = vmul.f32 0.5, %v3613_v16  ;;  %v3619_v60 = vadd.f32 -1.0, %v3140_v37  ;;  %v2818_v12 = vmul.f32 2.0, %v2754_v54  ;;  %v2759_v38 = vsub.f32 %v6080_v13, %v2673_v18  ;;  %v4059_v27 = vpop.eup %4058 }
 0x1ed   :  { %v3263_v8 = vmul.f32 0.5, %v3614_v9  ;;  %v3620_v26 = vadd.f32 -1.0, %v3141_v23  ;;  %v3138_v40 = vadd.f32 %v3074_v57, %v2817_v51  ;;  %v2760_v52 = vsub.f32 %v6080_v13, %v2675_v1  ;;  %v8341_v9 = vld [vmem:[#allocation82_spill] sm:$0xff] }
 0x1ee   :  { %v3268_v43 = vmul.f32 0.5, %v3619_v60  ;;  %v3139_v7 = vadd.f32 %v3075_v62, %v2818_v12  ;;  %v2823_v61 = vmul.f32 2.0, %v2759_v38  ;;  %v2669_v45 = vmul.f32 0.6931472, %v4057_v19  ;;  %v4061_v3 = vpop.eup %4060  ;;  %v8342_v38 = vld [vmem:[#allocation90_spill] sm:$0xff] }
 0x1ef   :  { %v3374_v31 = vadd.f32 %v3263_v8, %v3262_v28  ;;  %v3269_v46 = vmul.f32 0.5, %v3620_v26  ;;  %v3617_v0 = vadd.f32 -1.0, %v3138_v40  ;;  %v2824_v24 = vmul.f32 2.0, %v2760_v52 }
 0x1f0   :  { %v4063_v34 = vpop.eup %4062  ;;  %v3618_v44 = vadd.f32 -1.0, %v3139_v7  ;;  %v3144_v20 = vadd.f32 %v3080_v47, %v2823_v61  ;;  %v2671_v22 = vmul.f32 0.6931472, %v4059_v27  ;;  %v2757_v30 = vsub.f32 %v6080_v13, %v2669_v45  ;;  %v8343_v7 = vld [vmem:[#allocation85_spill] sm:$0xff] }
 0x1f1   :  { %3375 = vadd.xlane.f32.xlu0 %v3374_v31  ;;  %v3383_v2 = vadd.f32 %v3269_v46, %v3268_v43  ;;  %v3266_v57 = vmul.f32 0.5, %v3617_v0  ;;  %v3145_v42 = vadd.f32 %v3081_v48, %v2824_v24  ;;  %v2681_v41 = vmul.f32 0.6931472, %v4061_v3  ;;  %v8344_v45 = vld [vmem:[#allocation97_spill] sm:$0xff]  ;;  %v8346_v0 = vld [vmem:[#allocation94_spill] sm:$0xff] }
 0x1f2   :  { %v3267_v11 = vmul.f32 0.5, %v3618_v44  ;;  %v3623_v62 = vadd.f32 -1.0, %v3144_v20  ;;  %v2758_v56 = vsub.f32 %v6080_v13, %v2671_v22  ;;  %v2821_v58 = vmul.f32 2.0, %v2757_v30  ;;  %v8345_v31 = vld [vmem:[#allocation81_spill] sm:$0xff]  ;;  %v8347_v22 = vld [vmem:[#allocation99_spill] sm:$0xff] }
 0x1f3   :  { %3384 = vadd.xlane.f32.xlu1 %v3383_v2  ;;  %v3624_v29 = vadd.f32 -1.0, %v3145_v42  ;;  %v2683_v14 = vmul.f32 0.6931472, %v4063_v34  ;;  %v2763_v49 = vsub.f32 %v6080_v13, %v2681_v41  ;;  %v3019_v47 = vadd.f32 %v2955_v6, %v8340_v35  ;;  %v8348_v2 = vld [vmem:[#allocation91_spill] sm:$0xff]  ;;  %v8349_v41 = vld [vmem:[#allocation96_spill] sm:$0xff] }
 0x1f4   :  { %v3380_v53 = vadd.f32 %v3267_v11, %v3266_v57  ;;  %v3272_v16 = vmul.f32 0.5, %v3623_v62  ;;  %v2822_v37 = vmul.f32 2.0, %v2758_v56  ;;  %v3142_v54 = vadd.f32 %v6443_v63, %v2821_v58  ;;  %v4065_v35 = vpop.eup %4064 }
 0x1f5   :  { %v3273_v18 = vmul.f32 0.5, %v3624_v29  ;;  %v2764_v48 = vsub.f32 %v6080_v13, %v2683_v14  ;;  %v2827_v19 = vmul.f32 2.0, %v2763_v49  ;;  %v3020_v23 = vadd.f32 %v2956_v4, %v8341_v9  ;;  %v8350_v14 = vld [vmem:[#allocation105_spill] sm:$0xff]  ;;  %v8354_v9 = vld [vmem:[#allocation98_spill] sm:$0xff] }
 0x1f6   :  { %3381 = vadd.xlane.f32.xlu0 %v3380_v53  ;;  %v3143_v51 = vadd.f32 %v6448_v21, %v2822_v37  ;;  %v3621_v1 = vadd.f32 -1.0, %v3142_v54  ;;  %v3084_v28 = vmul.f32 %v3019_v47, %v6085_v25  ;;  %4066 = vlog2.f32 %v8342_v38  ;;  %v8351_v47 = vld [vmem:[#allocation93_spill] sm:$0xff] }
 0x1f7   :  { %v3389_v6 = vadd.f32 %v3273_v18, %v3272_v16  ;;  %v2828_v60 = vmul.f32 2.0, %v2764_v48  ;;  %v3085_v12 = vmul.f32 %v3020_v23, %v6085_v25  ;;  %v2953_v4 = vmul.f32 %v5832_v39, %v5832_v39  ;;  %v8352_v16 = vld [vmem:[#allocation89_spill] sm:$0xff] }
 0x1f8   :  { %v3622_v63 = vadd.f32 -1.0, %v3143_v51  ;;  %v3270_v27 = vmul.f32 0.5, %v3621_v1  ;;  %v3148_v8 = vadd.f32 %v3084_v28, %v2827_v19  ;;  %v2954_v21 = vmul.f32 %v8342_v38, %v8342_v38  ;;  %v8353_v54 = vld [vmem:[#allocation101_spill] sm:$0xff]  ;;  %v8355_v51 = vld [vmem:[#allocation108_spill] sm:$0xff] }
 0x1f9   :  { %3390 = vadd.xlane.f32.xlu1 %v3389_v6  ;;  %v3149_v26 = vadd.f32 %v3085_v12, %v2828_v60  ;;  %4068 = vlog2.f32 %v5938_v59  ;;  %v2959_v40 = vmul.f32 %v5938_v59, %v5938_v59  ;;  %v3017_v61 = vadd.f32 %v2953_v4, %v8343_v7 }
 0x1fa   :  { %v3271_v52 = vmul.f32 0.5, %v3622_v63  ;;  %v3627_v43 = vadd.f32 -1.0, %v3148_v8  ;;  %4070 = vlog2.f32 %v8344_v45  ;;  %v3018_v46 = vadd.f32 %v2954_v21, %v8345_v31 }
 0x1fb   :  { %v3628_v3 = vadd.f32 -1.0, %v3149_v26  ;;  %v2960_v39 = vmul.f32 %v8344_v45, %v8344_v45  ;;  %v3023_v24 = vadd.f32 %v2959_v40, %v8346_v0  ;;  %v3082_v20 = vmul.f32 %v3017_v61, %v6085_v25  ;;  %v8357_v40 = vld [vmem:[#allocation100_spill] sm:$0xff]  ;;  %v8358_v61 = vld [vmem:[#allocation95_spill] sm:$0xff] }
 0x1fc   :  { %v3386_v34 = vadd.f32 %v3271_v52, %v3270_v27  ;;  %v3276_v44 = vmul.f32 0.5, %v3627_v43  ;;  %4072 = vlog2.f32 %v8347_v22  ;;  %v3083_v30 = vmul.f32 %v3018_v46, %v6085_v25  ;;  %v8356_v27 = vld [vmem:[#allocation104_spill] sm:$0xff] }
 0x1fd   :  { %v3277_v59 = vmul.f32 0.5, %v3628_v3  ;;  %v3024_v57 = vadd.f32 %v2960_v39, %v8348_v2  ;;  %v3088_v42 = vmul.f32 %v3023_v24, %v6085_v25  ;;  %4074 = vlog2.f32 %v8349_v41 }
 0x1fe   :  { %3387 = vadd.xlane.f32.xlu0 %v3386_v34  ;;  %v2957_v11 = vmul.f32 %v8347_v22, %v8347_v22  ;;  %v2958_v62 = vmul.f32 %v8349_v41, %v8349_v41  ;;  %v2963_v56 = vmul.f32 %v6044_v15, %v6044_v15  ;;  %4076 = vlog2.f32 %v6044_v15 }
 0x1ff   :  { %v3395_v58 = vadd.f32 %v3277_v59, %v3276_v44  ;;  %v3089_v29 = vmul.f32 %v3024_v57, %v6085_v25  ;;  %v2964_v49 = vmul.f32 %v8350_v14, %v8350_v14  ;;  %4078 = vlog2.f32 %v8350_v14 }
 0x200   :  { %v3021_v53 = vadd.f32 %v2957_v11, %v8351_v47  ;;  %v3022_v37 = vadd.f32 %v2958_v62, %v8352_v16  ;;  %v3027_v18 = vadd.f32 %v2963_v56, %v8353_v54  ;;  %v4067_v48 = vpop.eup %4066  ;;  %v2677_v19 = vmul.f32 0.6931472, %v4065_v35  ;;  %v8359_v11 = vld [vmem:[#allocation107_spill] sm:$0xff] }
 0x201   :  { %3396 = vadd.xlane.f32.xlu1 %v3395_v58  ;;  %v3028_v23 = vadd.f32 %v2964_v49, %v8354_v9  ;;  %4080 = vlog2.f32 %v8355_v51  ;;  %v2961_v15 = vmul.f32 %v8355_v51, %v8355_v51  ;;  %v2679_v1 = vmul.f32 0.6931472, %v4067_v48  ;;  %v8360_v16 = vld [vmem:[#allocation103_spill] sm:$0xff] }
 0x202   :  { %v3086_v28 = vmul.f32 %v3021_v53, %v6085_v25  ;;  %v3087_v6 = vmul.f32 %v3022_v37, %v6085_v25  ;;  %v6510_v60 = vmul.f32 %v3027_v18, %v6085_v25  ;;  %v2761_v38 = vsub.f32 %v6080_v13, %v2677_v19 }
 0x203   :  { %v4069_v12 = vpop.eup %4068  ;;  %v6514_v63 = vmul.f32 %v3028_v23, %v6085_v25  ;;  %4082 = vlog2.f32 %v8356_v27  ;;  %v2962_v8 = vmul.f32 %v8356_v27, %v8356_v27  ;;  %v2762_v26 = vsub.f32 %v6080_v13, %v2679_v1 }
 0x204   :  { %v4071_v4 = vpop.eup %4070  ;;  %v2689_v21 = vmul.f32 0.6931472, %v4069_v12  ;;  %v3025_v52 = vadd.f32 %v2961_v15, %v8357_v40  ;;  %4084 = vlog2.f32 %v6135_v33  ;;  %v2825_v43 = vmul.f32 2.0, %v2761_v38 }
 0x205   :  { %v2691_v7 = vmul.f32 0.6931472, %v4071_v4  ;;  %v3026_v45 = vadd.f32 %v2962_v8, %v8358_v61  ;;  %4086 = vlog2.f32 %v6103_v32  ;;  %v2826_v31 = vmul.f32 2.0, %v2762_v26 }
 0x206   :  { %v4073_v3 = vpop.eup %4072  ;;  %v2767_v46 = vsub.f32 %v6080_v13, %v2689_v21  ;;  %v6526_v39 = vmul.f32 %v3025_v52, %v6085_v25  ;;  %v2967_v0 = vmul.f32 %v6135_v33, %v6135_v33  ;;  %v3146_v24 = vadd.f32 %v3082_v20, %v2825_v43 }
 0x207   :  { %v2768_v34 = vsub.f32 %v6080_v13, %v2691_v7  ;;  %v2685_v44 = vmul.f32 0.6931472, %v4073_v3  ;;  %v6532_v22 = vmul.f32 %v3026_v45, %v6085_v25  ;;  %v4075_v59 = vpop.eup %4074  ;;  %v3147_v2 = vadd.f32 %v3083_v30, %v2826_v31 }
 0x208   :  { %v2831_v57 = vmul.f32 2.0, %v2767_v46  ;;  %v2968_v41 = vmul.f32 %v6103_v32, %v6103_v32  ;;  %v3031_v62 = vadd.f32 %v2967_v0, %v8359_v11  ;;  %v4077_v56 = vpop.eup %4076  ;;  %v3625_v58 = vadd.f32 -1.0, %v3146_v24  ;;  %v2522_v11 = vld [vmem:[#allocation10 + $0x1f0] sm:$0xff] }
 0x209   :  { %v2832_v14 = vmul.f32 2.0, %v2768_v34  ;;  %v2687_v49 = vmul.f32 0.6931472, %v4075_v59  ;;  %v2765_v33 = vsub.f32 %v6080_v13, %v2685_v44  ;;  %v4079_v20 = vpop.eup %4078  ;;  %v3626_v35 = vadd.f32 -1.0, %v3147_v2 }
 0x20a   :  { %v3152_v47 = vadd.f32 %v3088_v42, %v2831_v57  ;;  %v2697_v53 = vmul.f32 0.6931472, %v4077_v56  ;;  %v3032_v37 = vadd.f32 %v2968_v41, %v8360_v16  ;;  %v3274_v30 = vmul.f32 0.5, %v3625_v58 }
 0x20b   :  { %v4081_v54 = vpop.eup %4080  ;;  %v3153_v18 = vadd.f32 %v3089_v29, %v2832_v14  ;;  %v2766_v48 = vsub.f32 %v6080_v13, %v2687_v49  ;;  %v2829_v32 = vmul.f32 2.0, %v2765_v33  ;;  %v3275_v19 = vmul.f32 0.5, %v3626_v35 }
 0x20c   :  { %v3631_v9 = vadd.f32 -1.0, %v3152_v47  ;;  %v2699_v23 = vmul.f32 0.6931472, %v4079_v20  ;;  %v2771_v51 = vsub.f32 %v6080_v13, %v2697_v53  ;;  %v2693_v27 = vmul.f32 0.6931472, %v4081_v54  ;;  %v2521_v54 = vld [vmem:[#allocation10 + $0x1e8] sm:$0xff] }
 0x20d   :  { %v4083_v15 = vpop.eup %4082  ;;  %v3632_v1 = vadd.f32 -1.0, %v3153_v18  ;;  %v2830_v12 = vmul.f32 2.0, %v2766_v48  ;;  %v3150_v38 = vadd.f32 %v3086_v28, %v2829_v32  ;;  %v3392_v8 = vadd.f32 %v3275_v19, %v3274_v30  ;;  %v4296_v30 = vld [vmem:[%s7896_s2 + $0x1f0] sm:$0xff] }
 0x20e   :  { %v4085_v42 = vpop.eup %4084  ;;  %v3280_v4 = vmul.f32 0.5, %v3631_v9  ;;  %v2772_v26 = vsub.f32 %v6080_v13, %v2699_v23  ;;  %v2835_v21 = vmul.f32 2.0, %v2771_v51  ;;  %v2695_v7 = vmul.f32 0.6931472, %v4083_v15  ;;  %v4297_v15 = vld [vmem:[%s7896_s2 + $0x1e8] sm:$0xff] }
 0x20f   :  { %v4087_v29 = vpop.eup %4086  ;;  %v3281_v40 = vmul.f32 0.5, %v3632_v1  ;;  %v3151_v52 = vadd.f32 %v3087_v6, %v2830_v12  ;;  %v3629_v43 = vadd.f32 -1.0, %v3150_v38  ;;  %3393 = vadd.xlane.f32.xlu0 %v3392_v8  ;;  %v2769_v3 = vsub.f32 %v6080_v13, %v2693_v27  ;;  %v4298_v12 = vld [vmem:[%s7896_s2 + $0x1e0] sm:$0xff] }
 0x210   :  { %v2836_v61 = vmul.f32 2.0, %v2772_v26  ;;  %v3156_v45 = vadd.f32 %v6510_v60, %v2835_v21  ;;  %v2705_v31 = vmul.f32 0.6931472, %v4085_v42  ;;  %v2770_v24 = vsub.f32 %v6080_v13, %v2695_v7  ;;  %v8361_v26 = vld [vmem:[#allocation109_spill] sm:$0xff] }
 0x211   :  { %v3401_v28 = vadd.f32 %v3281_v40, %v3280_v4  ;;  %v3630_v46 = vadd.f32 -1.0, %v3151_v52  ;;  %v3278_v0 = vmul.f32 0.5, %v3629_v43  ;;  %v2833_v59 = vmul.f32 2.0, %v2769_v3  ;;  %v6574_v4 = vld [vmem:[%s7904_s10 + $0x10] sm:$0xff]  ;;  %v8362_v40 = vld [vmem:[#allocation106_spill] sm:$0xff] }
 0x212   :  { %v3157_v34 = vadd.f32 %v6514_v63, %v2836_v61  ;;  %v3635_v44 = vadd.f32 -1.0, %v3156_v45  ;;  %v2707_v2 = vmul.f32 0.6931472, %v4087_v29  ;;  %v2834_v57 = vmul.f32 2.0, %v2770_v24  ;;  %v8363_v43 = vld [vmem:[#allocation102_spill] sm:$0xff] }
 0x213   :  { %3402 = vadd.xlane.f32.xlu1 %v3401_v28  ;;  %v3279_v6 = vmul.f32 0.5, %v3630_v46  ;;  %v2775_v41 = vsub.f32 %v6080_v13, %v2705_v31  ;;  %v3096_v60 = vmul.f32 %v3031_v62, %v6085_v25  ;;  %v3154_v14 = vadd.f32 %v6526_v39, %v2833_v59  ;;  %v2520_v62 = vld [vmem:[#allocation10 + $0x1e0] sm:$0xff]  ;;  %v6598_v59 = vld [vmem:[%s7904_s10 + $0x18] sm:$0xff] }
 0x214   :  { %v3636_v56 = vadd.f32 -1.0, %v3157_v34  ;;  %v3284_v58 = vmul.f32 0.5, %v3635_v44  ;;  %v2776_v49 = vsub.f32 %v6080_v13, %v2707_v2  ;;  %v3155_v63 = vadd.f32 %v6532_v22, %v2834_v57 }
 0x215   :  { %v3398_v33 = vadd.f32 %v3279_v6, %v3278_v0  ;;  %v2839_v20 = vmul.f32 2.0, %v2775_v41  ;;  %v3097_v35 = vmul.f32 %v3032_v37, %v6085_v25  ;;  %v3633_v53 = vadd.f32 -1.0, %v3154_v14 }
 0x216   :  { %v3285_v47 = vmul.f32 0.5, %v3636_v56  ;;  %v2840_v16 = vmul.f32 2.0, %v2776_v49  ;;  %4088 = vlog2.f32 %v6129_v17  ;;  %v2586_v39 = vsub.f32 %v4296_v30, %v2522_v11 }
 0x217   :  { %3399 = vadd.xlane.f32.xlu0 %v3398_v33  ;;  %v3634_v18 = vadd.f32 -1.0, %v3155_v63  ;;  %v3160_v48 = vadd.f32 %v3096_v60, %v2839_v20  ;;  %4090 = vlog2.f32 %v6099_v50  ;;  %v3282_v32 = vmul.f32 0.5, %v3633_v53 }
 0x218   :  { %v3407_v22 = vadd.f32 %v3285_v47, %v3284_v58  ;;  %v3161_v37 = vadd.f32 %v3097_v35, %v2840_v16  ;;  %v2965_v19 = vmul.f32 %v6129_v17, %v6129_v17  ;;  %v2966_v51 = vmul.f32 %v6099_v50, %v6099_v50 }
 0x219   :  { %v3283_v9 = vmul.f32 0.5, %v3634_v18  ;;  %v3639_v23 = vadd.f32 -1.0, %v3160_v48  ;;  %4092 = vlog2.f32 %v6212_v55  ;;  %v2585_v1 = vsub.f32 %v4297_v15, %v2521_v54 }
 0x21a   :  { %v2584_v38 = vsub.f32 %v4298_v12, %v2520_v62  ;;  %3408 = vadd.xlane.f32.xlu1 %v3407_v22  ;;  %v3640_v27 = vadd.f32 -1.0, %v3161_v37  ;;  %4094 = vlog2.f32 %v6173_v5  ;;  %v2907_v17 = vmul.f32 %v2586_v39, %v2586_v39 }
 0x21b   :  { %v3404_v42 = vadd.f32 %v3283_v9, %v3282_v32  ;;  %v3288_v8 = vmul.f32 0.5, %v3639_v23  ;;  %v2971_v50 = vmul.f32 %v6212_v55, %v6212_v55  ;;  %v2908_v21 = vmul.f32 %v8361_v26, %v8361_v26  ;;  %v6587_v55 = vld [vmem:[%s7904_s10] sm:$0xff] }
 0x21c   :  { %v3289_v29 = vmul.f32 0.5, %v3640_v27  ;;  %4096 = vlog2.f32 %v6205_v10  ;;  %v3029_v52 = vadd.f32 %v2965_v19, %v8362_v40  ;;  %v3030_v7 = vadd.f32 %v2966_v51, %v8363_v43  ;;  %v6613_v51 = vld [vmem:[%s7904_s10 + $0x8] sm:$0xff] }
 0x21d   :  { %3405 = vadd.xlane.f32.xlu0 %v3404_v42  ;;  %v2972_v61 = vmul.f32 %v6173_v5, %v6173_v5  ;;  %4098 = vlog2.f32 %v6165_v36  ;;  %v2905_v45 = vmul.f32 %v2584_v38, %v2584_v38  ;;  %v2969_v31 = vmul.f32 %v6205_v10, %v6205_v10 }
 0x21e   :  { %v3413_v3 = vadd.f32 %v3289_v29, %v3288_v8  ;;  %v1452_v28 = vand.u32 2147483647, %v6574_v4  ;;  %v2906_v46 = vmul.f32 %v2585_v1, %v2585_v1  ;;  %v3035_v0 = vadd.f32 %v2971_v50, %v2907_v17  ;;  %v1932_v29 = vld [vmem:[%s7905_s11 + $0x10] sm:$0xff] }
 0x21f   :  { %v2970_v24 = vmul.f32 %v6165_v36, %v6165_v36  ;;  %v1450_v44 = vand.u32 2147483647, %v6587_v55  ;;  %v3094_v10 = vmul.f32 %v3029_v52, %v6085_v25  ;;  %v3095_v57 = vmul.f32 %v3030_v7, %v6085_v25 }
 0x220   :  { %v4089_v5 = vpop.eup %4088  ;;  %3414 = vadd.xlane.f32.xlu1 %v3413_v3  ;;  %v1484_v34 = vsub.f32 0.0, %v1452_v28  ;;  %v3036_v41 = vadd.f32 %v2972_v61, %v2908_v21  ;;  %v3033_v11 = vadd.f32 %v2969_v31, %v2905_v45  ;;  %v3100_v49 = vmul.f32 %v3035_v0, %v6085_v25  ;;  %v1900_v21 = vld [vmem:[%s7903_s9 + $0x10] sm:$0xff]  ;;  %v1898_v31 = vld [vmem:[%s7903_s9] sm:$0xff] }
 0x221   :  { %v4091_v2 = vpop.eup %4090  ;;  %v2701_v6 = vmul.f32 0.6931472, %v4089_v5  ;;  %v1482_v56 = vsub.f32 0.0, %v1450_v44  ;;  %v3034_v33 = vadd.f32 %v2970_v24, %v2906_v46  ;;  %v1453_v63 = vand.u32 2147483647, %v6598_v59  ;;  %v1930_v28 = vld [vmem:[%s7905_s11] sm:$0xff] }
 0x222   :  { %v2703_v60 = vmul.f32 0.6931472, %v4091_v2  ;;  %v1518_v36 = vmul.f32 1.442695, %v1484_v34  ;;  %v3101_v62 = vmul.f32 %v3036_v41, %v6085_v25  ;;  %v3098_v22 = vmul.f32 %v3033_v11, %v6085_v25  ;;  %v1901_v44 = vld [vmem:[%s7903_s9 + $0x18] sm:$0xff] }
 0x223   :  { %v4093_v58 = vpop.eup %4092  ;;  %v2773_v14 = vsub.f32 %v6080_v13, %v2701_v6  ;;  %v1514_v53 = vmul.f32 1.442695, %v1482_v56  ;;  %v1485_v30 = vsub.f32 0.0, %v1453_v63  ;;  %v3099_v38 = vmul.f32 %v3034_v33, %v6085_v25  ;;  %v1933_v2 = vld [vmem:[%s7905_s11 + $0x18] sm:$0xff]  ;;  %v6641_v6 = vld [vmem:[%s7904_s10 + $0x28] sm:$0xff] }
 0x224   :  { %v4095_v20 = vpop.eup %4094  ;;  %v2774_v35 = vsub.f32 %v6080_v13, %v2703_v60  ;;  %v2713_v47 = vmul.f32 0.6931472, %v4093_v58  ;;  %4100 = vpow2.f32 %v1518_v36  ;;  %v1451_v40 = vand.u32 2147483647, %v6613_v51 }
 0x225   :  { %v2837_v16 = vmul.f32 2.0, %v2773_v14  ;;  %v2715_v54 = vmul.f32 0.6931472, %v4095_v20  ;;  %4102 = vpow2.f32 %v1514_v53  ;;  %v1520_v23 = vmul.f32 1.442695, %v1485_v30  ;;  %v1899_v20 = vld [vmem:[%s7903_s9 + $0x8] sm:$0xff] }
 0x226   :  { %v4097_v39 = vpop.eup %4096  ;;  %v2838_v18 = vmul.f32 2.0, %v2774_v35  ;;  %v2779_v48 = vsub.f32 %v6080_v13, %v2713_v47  ;;  %v1483_v46 = vsub.f32 0.0, %v1451_v40  ;;  %v1420_v5 = vmax.f32 %v6574_v4, 0.0  ;;  %v1931_v35 = vld [vmem:[%s7905_s11 + $0x8] sm:$0xff] }
 0x227   :  { %v4099_v32 = vpop.eup %4098  ;;  %v3158_v37 = vadd.f32 %v3094_v10, %v2837_v16  ;;  %v2780_v19 = vsub.f32 %v6080_v13, %v2715_v54  ;;  %v2709_v9 = vmul.f32 0.6931472, %v4097_v39  ;;  %4104 = vpow2.f32 %v1520_v23  ;;  %v1935_v23 = vld [vmem:[%s7905_s11 + $0x28] sm:$0xff] }
 0x228   :  { %v3159_v15 = vadd.f32 %v3095_v57, %v2838_v18  ;;  %v2843_v1 = vmul.f32 2.0, %v2779_v48  ;;  %v2711_v12 = vmul.f32 0.6931472, %v4099_v32  ;;  %v1964_v34 = vsub.f32 %v1900_v21, %v1932_v29 }
 0x229   :  { %v3637_v27 = vadd.f32 -1.0, %v3158_v37  ;;  %v2844_v17 = vmul.f32 2.0, %v2780_v19  ;;  %v2777_v42 = vsub.f32 %v6080_v13, %v2709_v9  ;;  %v1516_v11 = vmul.f32 1.442695, %v1483_v46  ;;  %v1903_v9 = vld [vmem:[%s7903_s9 + $0x28] sm:$0xff] }
 0x22a   :  { %v3638_v8 = vadd.f32 -1.0, %v3159_v15  ;;  %v3164_v50 = vadd.f32 %v3100_v49, %v2843_v1  ;;  %v2778_v26 = vsub.f32 %v6080_v13, %v2711_v12  ;;  %v1962_v14 = vsub.f32 %v1898_v31, %v1930_v28  ;;  %v1902_v31 = vld [vmem:[%s7903_s9 + $0x20] sm:$0xff] }
 0x22b   :  { %v3286_v52 = vmul.f32 0.5, %v3637_v27  ;;  %v3165_v43 = vadd.f32 %v3101_v62, %v2844_v17  ;;  %v2841_v7 = vmul.f32 2.0, %v2777_v42  ;;  %v1965_v63 = vsub.f32 %v1901_v44, %v1933_v2  ;;  %v1934_v44 = vld [vmem:[%s7905_s11 + $0x20] sm:$0xff] }
 0x22c   :  { %v3287_v61 = vmul.f32 0.5, %v3638_v8  ;;  %v3643_v45 = vadd.f32 -1.0, %v3164_v50  ;;  %v2842_v3 = vmul.f32 2.0, %v2778_v26  ;;  %4106 = vpow2.f32 %v1516_v11  ;;  %v6675_v50 = vld [vmem:[%s7904_s10 + $0x38] sm:$0xff] }
 0x22d   :  { %v3644_v0 = vadd.f32 -1.0, %v3165_v43  ;;  %v3162_v24 = vadd.f32 %v3098_v22, %v2841_v7  ;;  %v1455_v47 = vand.u32 2147483647, %v6641_v6  ;;  %v1418_v30 = vmax.f32 %v6587_v55, 0.0 }
 0x22e   :  { %v4101_v10 = vpop.eup %4100  ;;  %v3410_v57 = vadd.f32 %v3287_v61, %v3286_v52  ;;  %v3292_v41 = vmul.f32 0.5, %v3643_v45  ;;  %v3163_v60 = vadd.f32 %v3099_v38, %v2842_v3  ;;  %v6653_v22 = vmul.f32 %v1964_v34, %v1964_v34  ;;  %v6666_v38 = vld [vmem:[%s7904_s10 + $0x20] sm:$0xff]  ;;  %v6685_v61 = vld [vmem:[%s7904_s10 + $0x30] sm:$0xff] }
 0x22f   :  { %v3293_v36 = vmul.f32 0.5, %v3644_v0  ;;  %v3641_v56 = vadd.f32 -1.0, %v3162_v24  ;;  %v1596_v58 = vadd.f32 1.0, %v4101_v10  ;;  %v4103_v49 = vpop.eup %4102  ;;  %v1599_v54 = vmul.f32 -0.5, %v4101_v10 }
 0x230   :  { %3411 = vadd.xlane.f32.xlu0 %v3410_v57  ;;  %v3642_v33 = vadd.f32 -1.0, %v3163_v60  ;;  %v1578_v39 = vadd.f32 1.0, %v4103_v49  ;;  %v1581_v18 = vmul.f32 -0.5, %v4103_v49  ;;  %v1421_v32 = vmax.f32 %v6598_v59, 0.0 }
 0x231   :  { %v3419_v53 = vadd.f32 %v3293_v36, %v3292_v41  ;;  %v3290_v16 = vmul.f32 0.5, %v3641_v56  ;;  %4108 = vlog2.f32 %v1596_v58  ;;  %v6651_v48 = vpop.eup %4104  ;;  %v1963_v37 = vsub.f32 %v1899_v20, %v1931_v35 }
 0x232   :  { %v3291_v62 = vmul.f32 0.5, %v3642_v33  ;;  %v1487_v19 = vsub.f32 0.0, %v1455_v47  ;;  %v1602_v1 = vand.u32 2147483647, %v4101_v10  ;;  %4110 = vlog2.f32 %v1578_v39  ;;  %v6714_v33 = vld [vmem:[%s7904_s10 + $0x48] sm:$0xff] }
 0x233   :  { %3420 = vadd.xlane.f32.xlu1 %v3419_v53  ;;  %v1605_v12 = vadd.f32 1.0, %v6651_v48  ;;  %v1600_v27 = vadd.f32 1.0, %v1599_v54  ;;  %v1584_v17 = vand.u32 2147483647, %v4103_v49  ;;  %v6668_v42 = vmul.f32 %v1962_v14, %v1962_v14  ;;  %v1905_v54 = vld [vmem:[%s7903_s9 + $0x38] sm:$0xff] }
 0x234   :  { %v3416_v15 = vadd.f32 %v3291_v62, %v3290_v16  ;;  %v6670_v8 = vmul.f32 %v1965_v63, %v1965_v63  ;;  %v1582_v26 = vadd.f32 1.0, %v1581_v18  ;;  %v1524_v21 = vmul.f32 1.442695, %v1487_v19  ;;  %v1937_v62 = vld [vmem:[%s7905_s11 + $0x38] sm:$0xff] }
 0x235   :  { %4112 = vlog2.f32 %v1605_v12  ;;  %v1967_v29 = vsub.f32 %v1903_v9, %v1935_v23  ;;  %v1608_v40 = vmul.f32 -0.5, %v6651_v48  ;;  %v1419_v52 = vmax.f32 %v6613_v51, 0.0  ;;  %v1936_v12 = vld [vmem:[%s7905_s11 + $0x30] sm:$0xff] }
 0x236   :  { %3417 = vadd.xlane.f32.xlu0 %v3416_v15  ;;  %v6679_v43 = vmul.f32 %v1963_v37, %v1963_v37  ;;  %v1454_v7 = vand.u32 2147483647, %v6666_v38  ;;  %vm6687_vm0 = vcmp.lt.f32.partialorder %v1602_v1, 0.0004427343  ;;  %v1423_v3 = vmax.f32 %v6641_v6, 0.0  ;;  %v6704_v2 = vpop.eup %4106  ;;  %v1904_v1 = vld [vmem:[%s7903_s9 + $0x30] sm:$0xff] }
 0x237   :  { %4114 = vpow2.f32 %v1524_v21  ;;  %v1457_v28 = vand.u32 2147483647, %v6675_v50  ;;  %v1601_v46 = vmul.f32 %v4101_v10, %v1600_v27  ;;  %vm6696_vm1 = vcmp.lt.f32.partialorder %v1584_v17, 0.0004427343  ;;  %v6743_v27 = vld [vmem:[%s7904_s10 + $0x40] sm:$0xff] }
 0x238   :  { %v1611_v24 = vand.u32 2147483647, %v6651_v48  ;;  %v1486_v34 = vsub.f32 0.0, %v1454_v7  ;;  %v1583_v57 = vmul.f32 %v4103_v49, %v1582_v26  ;;  %v6706_v41 = vmul.f32 %v1967_v29, %v1967_v29 }
 0x239   :  { %v1489_v60 = vsub.f32 0.0, %v1457_v28  ;;  %v1456_v11 = vand.u32 2147483647, %v6685_v61  ;;  %v1609_v36 = vadd.f32 1.0, %v1608_v40  ;;  %v1587_v56 = vadd.f32 1.0, %v6704_v2 }
 0x23a   :  { %v1422_v58 = vmax.f32 %v6666_v38, 0.0  ;;  %v1522_v14 = vmul.f32 1.442695, %v1486_v34  ;;  %v1966_v20 = vsub.f32 %v1902_v31, %v1934_v44  ;;  %vm6716_vm2 = vcmp.lt.f32.partialorder %v1611_v24, 0.0004427343 }
 0x23b   :  { %v4109_v10 = vpop.eup %4108  ;;  %v1528_v49 = vmul.f32 1.442695, %v1489_v60  ;;  %v1488_v35 = vsub.f32 0.0, %v1456_v11  ;;  %4116 = vlog2.f32 %v1587_v56  ;;  %v1590_v53 = vmul.f32 -0.5, %v6704_v2 }
 0x23c   :  { %v1598_v63 = vmul.f32 0.6931472, %v4109_v10  ;;  %v1425_v16 = vmax.f32 %v6675_v50, 0.0  ;;  %v4111_v39 = vpop.eup %4110  ;;  %4118 = vpow2.f32 %v1522_v14  ;;  %v1459_v19 = vand.u32 2147483647, %v6714_v33 }
 0x23d   :  { %v1526_v37 = vmul.f32 1.442695, %v1488_v35  ;;  %v1580_v23 = vmul.f32 0.6931472, %v4111_v39  ;;  %v1610_v15 = vmul.f32 %v6651_v48, %v1609_v36  ;;  %4120 = vpow2.f32 %v1528_v49 }
 0x23e   :  { %v1604_v18 = vsel %vm6687_vm0, %v1601_v46, %v1598_v63  ;;  %v6745_v4 = vmul.f32 %v1966_v20, %v1966_v20  ;;  %v1491_v48 = vsub.f32 0.0, %v1459_v19  ;;  %v1591_v45 = vadd.f32 1.0, %v1590_v53 }
 0x23f   :  { %v1868_v9 = vadd.f32 %v1604_v18, %v1420_v5  ;;  %v4113_v17 = vpop.eup %4112  ;;  %v1969_v5 = vsub.f32 %v1905_v54, %v1937_v62  ;;  %4122 = vpow2.f32 %v1526_v37  ;;  %v1586_v21 = vsel %vm6696_vm1, %v1583_v57, %v1580_v23 }
 0x240   :  { %v1607_v29 = vmul.f32 0.6931472, %v4113_v17  ;;  %v1866_v7 = vadd.f32 %v1586_v21, %v1418_v30  ;;  %v1968_v31 = vsub.f32 %v1904_v1, %v1936_v12  ;;  %v1458_v28 = vand.u32 2147483647, %v6743_v27 }
 0x241   :  { %4124 = vlog2.f32 %v1868_v9  ;;  %v2157_v26 = vmul.f32 %v1868_v9, %v1868_v9  ;;  %v4115_v40 = vpop.eup %4114  ;;  %v1593_v24 = vand.u32 2147483647, %v6704_v2  ;;  %v1532_v44 = vmul.f32 1.442695, %v1491_v48 }
 0x242   :  { %v1613_v46 = vsel %vm6716_vm2, %v1610_v15, %v1607_v29  ;;  %v1623_v34 = vadd.f32 1.0, %v4115_v40  ;;  %4126 = vlog2.f32 %v1866_v7  ;;  %v1626_v57 = vmul.f32 -0.5, %v4115_v40 }
 0x243   :  { %v2189_v60 = vadd.f32 %v2157_v26, %v6653_v22  ;;  %v1869_v0 = vadd.f32 %v1613_v46, %v1421_v32  ;;  %v2155_v55 = vmul.f32 %v1866_v7, %v1866_v7  ;;  %v1424_v30 = vmax.f32 %v6685_v61, 0.0 }
 0x244   :  { %4128 = vlog2.f32 %v1623_v34  ;;  %v1490_v11 = vsub.f32 0.0, %v1458_v28  ;;  %v1592_v36 = vmul.f32 %v6704_v2, %v1591_v45  ;;  %v6760_v56 = vmul.f32 %v1969_v5, %v1969_v5 }
 0x245   :  { %4130 = vlog2.f32 %v1869_v0  ;;  %v2158_v10 = vmul.f32 %v1869_v0, %v1869_v0  ;;  %v4117_v14 = vpop.eup %4116  ;;  %vm6762_vm3 = vcmp.lt.f32.partialorder %v1593_v24, 0.0004427343  ;;  %v1629_v22 = vand.u32 2147483647, %v4115_v40 }
 0x246   :  { %4132 = vpow2.f32 %v1532_v44  ;;  %v1530_v59 = vmul.f32 1.442695, %v1490_v11  ;;  %v4119_v32 = vpop.eup %4118  ;;  %v2222_v20 = vmul.f32 %v6085_v25, %v2189_v60  ;;  %v1589_v49 = vmul.f32 0.6931472, %v4117_v14 }
 0x247   :  { %v1627_v35 = vadd.f32 1.0, %v1626_v57  ;;  %v6767_v47 = vmul.f32 %v1968_v31, %v1968_v31  ;;  %v4121_v53 = vpop.eup %4120  ;;  %v2187_v2 = vadd.f32 %v2155_v55, %v6668_v42  ;;  %v1614_v54 = vadd.f32 1.0, %v4119_v32 }
 0x248   :  { %v1617_v62 = vmul.f32 -0.5, %v4119_v32  ;;  %4134 = vpow2.f32 %v1530_v59  ;;  %v2190_v18 = vadd.f32 %v2158_v10, %v6670_v8  ;;  %v1595_v37 = vsel %vm6762_vm3, %v1592_v36, %v1589_v49 }
 0x249   :  { %v4123_v39 = vpop.eup %4122  ;;  %v1641_v19 = vadd.f32 1.0, %v4121_v53  ;;  %v1644_v9 = vmul.f32 -0.5, %v4121_v53  ;;  %v1867_v15 = vadd.f32 %v1595_v37, %v1419_v52  ;;  %vm6775_vm4 = vcmp.lt.f32.partialorder %v1629_v22, 0.0004427343 }
 0x24a   :  { %4136 = vlog2.f32 %v1614_v54  ;;  %v1620_v42 = vand.u32 2147483647, %v4119_v32  ;;  %v1628_v17 = vmul.f32 %v4115_v40, %v1627_v35  ;;  %v1618_v5 = vadd.f32 1.0, %v1617_v62 }
 0x24b   :  { %v4125_v23 = vpop.eup %4124  ;;  %4138 = vlog2.f32 %v1641_v19  ;;  %vm2348_vm5 = vcmask 7168   ;;  %v2156_v8 = vmul.f32 %v1867_v15, %v1867_v15  ;;  %v1645_v48 = vadd.f32 1.0, %v1644_v9 }
 0x24c   :  { %v1999_v12 = vmul.f32 0.6931472, %v4125_v23  ;;  %4140 = vlog2.f32 %v1867_v15  ;;  %v1632_v26 = vadd.f32 1.0, %v4123_v39  ;;  %v4127_v21 = vpop.eup %4126  ;;  %v2220_v51 = vmul.f32 %v6085_v25, %v2187_v2 }
 0x24d   :  { %v2223_v52 = vmul.f32 %v6085_v25, %v2190_v18  ;;  %v1635_v7 = vmul.f32 -0.5, %v4123_v39  ;;  %v1995_v31 = vmul.f32 0.6931472, %v4127_v21  ;;  %vm6782_vm6 = vcmp.lt.f32.partialorder %v1620_v42, 0.0004427343 }
 0x24e   :  { %v2061_v29 = vsub.f32 %v6080_v13, %v1999_v12  ;;  %v4129_v45 = vpop.eup %4128  ;;  %v1647_v40 = vand.u32 2147483647, %v4121_v53  ;;  %4142 = vlog2.f32 %v1632_v26  ;;  %v2188_v34 = vadd.f32 %v2156_v8, %v6679_v43 }
 0x24f   :  { %v4131_v46 = vpop.eup %4130  ;;  %v1625_v44 = vmul.f32 0.6931472, %v4129_v45  ;;  %v1619_v60 = vmul.f32 %v4119_v32, %v1618_v5  ;;  %v2059_v57 = vsub.f32 %v6080_v13, %v1995_v31  ;;  %v1646_v11 = vmul.f32 %v4121_v53, %v1645_v48 }
 0x250   :  { %v2093_v24 = vmul.f32 2.0, %v2061_v29  ;;  %v6787_v0 = vpop.eup %4132  ;;  %v2001_v55 = vmul.f32 0.6931472, %v4131_v46  ;;  %v1638_v10 = vand.u32 2147483647, %v4123_v39  ;;  %v1636_v63 = vadd.f32 1.0, %v1635_v7 }
 0x251   :  { %v1631_v14 = vsel %vm6775_vm4, %v1628_v17, %v1625_v44  ;;  %v1659_v22 = vadd.f32 1.0, %v6787_v0  ;;  %v2091_v49 = vmul.f32 2.0, %v2059_v57  ;;  %vm6798_vm7 = vcmp.lt.f32.partialorder %v1647_v40, 0.0004427343  ;;  %v1939_v7 = vld [vmem:[%s7905_s11 + $0x48] sm:$0xff] }
 0x252   :  { %v2254_v36 = vadd.f32 %v2222_v20, %v2093_v24  ;;  %v6793_v59 = vpop.eup %4134  ;;  %v2062_v43 = vsub.f32 %v6080_v13, %v2001_v55  ;;  %v1871_v32 = vadd.f32 %v1631_v14, %v1423_v3  ;;  %v2221_v20 = vmul.f32 %v6085_v25, %v2188_v34  ;;  %v6838_v24 = vld [vmem:[%s7904_s10 + $0x58] sm:$0xff]  ;;  %v3334_v34 = vpop.xlane.xlu1 %3333 }
 0x253   :  { %4144 = vlog2.f32 %v1659_v22  ;;  %v1650_v2 = vadd.f32 1.0, %v6793_v59  ;;  %v2252_v62 = vadd.f32 %v2220_v51, %v2091_v49  ;;  %v1662_v37 = vmul.f32 -0.5, %v6787_v0 }
 0x254   :  { %v3551_v53 = vadd.f32 -1.0, %v2254_v36  ;;  %v4137_v54 = vpop.eup %4136  ;;  %v2094_v18 = vmul.f32 2.0, %v2062_v43  ;;  %4146 = vlog2.f32 %v1871_v32  ;;  %v1637_v3 = vmul.f32 %v4123_v39, %v1636_v63 }
 0x255   :  { %v4139_v19 = vpop.eup %4138  ;;  %v1616_v6 = vmul.f32 0.6931472, %v4137_v54  ;;  %vm6805_vm8 = vcmp.lt.f32.partialorder %v1638_v10, 0.0004427343  ;;  %v3549_v1 = vadd.f32 -1.0, %v2252_v62  ;;  %v2160_v12 = vmul.f32 %v1871_v32, %v1871_v32 }
 0x256   :  { %v2318_v9 = vmul.f32 0.5, %v3551_v53  ;;  %v4141_v15 = vpop.eup %4140  ;;  %v2255_v42 = vadd.f32 %v2223_v52, %v2094_v18  ;;  %v1643_v17 = vmul.f32 0.6931472, %v4139_v19  ;;  %v1665_v39 = vand.u32 2147483647, %v6787_v0  ;;  %v1907_v52 = vld [vmem:[%s7903_s9 + $0x48] sm:$0xff] }
 0x257   :  { %v1997_v5 = vmul.f32 0.6931472, %v4141_v15  ;;  %v1622_v8 = vsel %vm6782_vm6, %v1619_v60, %v1616_v6  ;;  %4148 = vlog2.f32 %v1650_v2  ;;  %v2316_v26 = vmul.f32 0.5, %v3549_v1  ;;  %v6866_v18 = vld [vmem:[%s7904_s10 + $0x50] sm:$0xff] }
 0x258   :  { %2351 = vst.msk [vmem:[%s7907_s13 + $0x10] sm:$0xff] %vm2348_vm5, %v2318_v9  ;;  %v4143_v48 = vpop.eup %4142  ;;  %v3552_v21 = vadd.f32 -1.0, %v2255_v42  ;;  %v1870_v29 = vadd.f32 %v1622_v8, %v1422_v58  ;;  %v1663_v51 = vadd.f32 1.0, %v1662_v37  ;;  %v1649_v31 = vsel %vm6798_vm7, %v1646_v11, %v1643_v17 }
 0x259   :  { %v2060_v45 = vsub.f32 %v6080_v13, %v1997_v5  ;;  %v1634_v28 = vmul.f32 0.6931472, %v4143_v48  ;;  %v1653_v40 = vmul.f32 -0.5, %v6793_v59  ;;  %2349 = vst.msk [vmem:[%s7907_s13] sm:$0xff] %vm2348_vm5, %v2316_v26  ;;  %v2192_v58 = vadd.f32 %v2160_v12, %v6706_v41 }
 0x25a   :  { %v2319_v38 = vmul.f32 0.5, %v3552_v21  ;;  %4150 = vlog2.f32 %v1870_v29  ;;  %v1873_v46 = vadd.f32 %v1649_v31, %v1425_v16  ;;  %v1427_v57 = vmax.f32 %v6714_v33, 0.0 }
 0x25b   :  { %v2092_v44 = vmul.f32 2.0, %v2060_v45  ;;  %v1640_v60 = vsel %vm6805_vm8, %v1637_v3, %v1634_v28  ;;  %v1971_v55 = vsub.f32 %v1907_v52, %v1939_v7  ;;  %v2159_v50 = vmul.f32 %v1870_v29, %v1870_v29  ;;  %v1906_v7 = vld [vmem:[%s7903_s9 + $0x40] sm:$0xff] }
 0x25c   :  { %2352 = vst.msk [vmem:[%s7907_s13 + $0x18] sm:$0xff] %vm2348_vm5, %v2319_v38  ;;  %4152 = vlog2.f32 %v1873_v46  ;;  %v1872_v41 = vadd.f32 %v1640_v60, %v1424_v30  ;;  %v1654_v16 = vadd.f32 1.0, %v1653_v40  ;;  %v1664_v36 = vmul.f32 %v6787_v0, %v1663_v51  ;;  %v3328_v0 = vpop.xlane.xlu0 %3327  ;;  %v1938_v45 = vld [vmem:[%s7905_s11 + $0x40] sm:$0xff] }
 0x25d   :  { %v4145_v11 = vpop.eup %4144  ;;  %v2253_v10 = vadd.f32 %v2221_v20, %v2092_v44  ;;  %v1656_v14 = vand.u32 2147483647, %v6793_v59  ;;  %v1461_v33 = vand.u32 2147483647, %v6838_v24  ;;  %v2225_v49 = vmul.f32 %v6085_v25, %v2192_v58  ;;  %v6913_v44 = vld [vmem:[%s7904_s10 + $0x68] sm:$0xff] }
 0x25e   :  { %v4147_v63 = vpop.eup %4146  ;;  %4154 = vlog2.f32 %v1872_v41  ;;  %vm6856_vm9 = vcmp.lt.f32.partialorder %v1665_v39, 0.0004427343  ;;  %v1426_v30 = vmax.f32 %v6743_v27, 0.0  ;;  %v1661_v53 = vmul.f32 0.6931472, %v4145_v11 }
 0x25f   :  { %v3296_v22 = vld [vmem:[%s7907_s13 + $0x10] sm:$0xff]  ;;  %v3550_v32 = vadd.f32 -1.0, %v2253_v10  ;;  %v2005_v35 = vmul.f32 0.6931472, %v4147_v63  ;;  %v2191_v20 = vadd.f32 %v2159_v50, %v6745_v4  ;;  %v2162_v2 = vmul.f32 %v1873_v46, %v1873_v46  ;;  %v3337_v4 = vpop.xlane.xlu1 %3336 }
 0x260   :  { %v3424_v43 = vadd.f32 %v3334_v34, %v3296_v22  ;;  %v1655_v54 = vmul.f32 %v6793_v59, %v1654_v16  ;;  %v1493_v62 = vsub.f32 0.0, %v1461_v33  ;;  %v3294_v27 = vld [vmem:[%s7907_s13] sm:$0xff]  ;;  %v1667_v9 = vsel %vm6856_vm9, %v1664_v36, %v1661_v53 }
 0x261   :  { %v4149_v37 = vpop.eup %4148  ;;  %v2317_v19 = vmul.f32 0.5, %v3550_v32  ;;  %v2064_v59 = vsub.f32 %v6080_v13, %v2005_v35  ;;  %vm6878_vm10 = vcmp.lt.f32.partialorder %v1656_v14, 0.0004427343  ;;  %v3422_v3 = vadd.f32 %v3328_v0, %v3294_v27  ;;  %v6925_v22 = vld [vmem:[%s7904_s10 + $0x60] sm:$0xff] }
 0x262   :  { %3457 = vst.msk [vmem:[%s7907_s13 + $0x10] sm:$0xff] %vm2348_vm5, %v3424_v43  ;;  %v2161_v23 = vmul.f32 %v1872_v41, %v1872_v41  ;;  %v1875_v15 = vadd.f32 %v1667_v9, %v1427_v57  ;;  %v1652_v1 = vmul.f32 0.6931472, %v4149_v37  ;;  %v2132_v17 = vmul.f32 %v1971_v55, %v1971_v55  ;;  %v3331_v57 = vpop.xlane.xlu0 %3330 }
 0x263   :  { %v3297_v42 = vld [vmem:[%s7907_s13 + $0x18] sm:$0xff]  ;;  %2350 = vst.msk [vmem:[%s7907_s13 + $0x8] sm:$0xff] %vm2348_vm5, %v2317_v19  ;;  %v2096_v12 = vmul.f32 2.0, %v2064_v59  ;;  %v1536_v5 = vmul.f32 1.442695, %v1493_v62  ;;  %3455 = vst.msk [vmem:[%s7907_s13] sm:$0xff] %vm2348_vm5, %v3422_v3  ;;  %v2194_v26 = vadd.f32 %v2162_v2, %v6760_v56  ;;  %v2224_v56 = vmul.f32 %v6085_v25, %v2191_v20 }
 0x264   :  { %v1460_v8 = vand.u32 2147483647, %v6866_v18  ;;  %v4151_v39 = vpop.eup %4150  ;;  %v3425_v48 = vadd.f32 %v3337_v4, %v3297_v42  ;;  %4156 = vlog2.f32 %v1875_v15  ;;  %v1658_v21 = vsel %vm6878_vm10, %v1655_v54, %v1652_v1  ;;  %v6940_v62 = vld [vmem:[%s7904_s10 + $0x78] sm:$0xff] }
 0x265   :  { %v2257_v29 = vadd.f32 %v2225_v49, %v2096_v12  ;;  %v2003_v51 = vmul.f32 0.6931472, %v4151_v39  ;;  %v1874_v52 = vadd.f32 %v1658_v21, %v1426_v30  ;;  %4158 = vpow2.f32 %v1536_v5  ;;  %v1909_v39 = vld [vmem:[%s7903_s9 + $0x58] sm:$0xff] }
 0x266   :  { %v4153_v31 = vpop.eup %4152  ;;  %3458 = vst.msk [vmem:[%s7907_s13 + $0x18] sm:$0xff] %vm2348_vm5, %v3425_v48  ;;  %v2193_v28 = vadd.f32 %v2161_v23, %v6767_v47  ;;  %v2164_v40 = vmul.f32 %v1875_v15, %v1875_v15  ;;  %v1492_v38 = vsub.f32 0.0, %v1460_v8  ;;  %v2227_v55 = vmul.f32 %v6085_v25, %v2194_v26  ;;  %v3343_v23 = vpop.xlane.xlu1 %3342  ;;  %v1941_v48 = vld [vmem:[%s7905_s11 + $0x58] sm:$0xff] }
 0x267   :  { %v3554_v58 = vadd.f32 -1.0, %v2257_v29  ;;  %v2063_v46 = vsub.f32 %v6080_v13, %v2003_v51  ;;  %v2009_v34 = vmul.f32 0.6931472, %v4153_v31  ;;  %4160 = vlog2.f32 %v1874_v52 }
 0x268   :  { %v4155_v60 = vpop.eup %4154  ;;  %v1970_v50 = vsub.f32 %v1906_v7, %v1938_v45  ;;  %v1534_v41 = vmul.f32 1.442695, %v1492_v38  ;;  %v2226_v14 = vmul.f32 %v6085_v25, %v2193_v28  ;;  %v2196_v33 = vadd.f32 %v2164_v40, %v2132_v17  ;;  %v3340_v28 = vpop.xlane.xlu0 %3339 }
 0x269   :  { %v2321_v16 = vmul.f32 0.5, %v3554_v58  ;;  %v2095_v47 = vmul.f32 2.0, %v2063_v46  ;;  %v2066_v11 = vsub.f32 %v6080_v13, %v2009_v34  ;;  %v2007_v10 = vmul.f32 0.6931472, %v4155_v60 }
 0x26a   :  { %v3295_v36 = vld [vmem:[%s7907_s13 + $0x8] sm:$0xff]  ;;  %4162 = vpow2.f32 %v1534_v41  ;;  %v1463_v63 = vand.u32 2147483647, %v6913_v44  ;;  %v2131_v0 = vmul.f32 %v1970_v50, %v1970_v50  ;;  %v2163_v32 = vmul.f32 %v1874_v52, %v1874_v52 }
 0x26b   :  { %v3423_v49 = vadd.f32 %v3331_v57, %v3295_v36  ;;  %2354 = vst.msk [vmem:[%s7907_s13 + $0x28] sm:$0xff] %vm2348_vm5, %v2321_v16  ;;  %v2256_v61 = vadd.f32 %v2224_v56, %v2095_v47  ;;  %v2098_v30 = vmul.f32 2.0, %v2066_v11  ;;  %v2065_v43 = vsub.f32 %v6080_v13, %v2007_v10  ;;  %v6988_v50 = vld [vmem:[%s7904_s10 + $0x88] sm:$0xff]  ;;  %v1908_v47 = vld [vmem:[%s7903_s9 + $0x50] sm:$0xff] }
 0x26c   :  { %v1495_v35 = vsub.f32 0.0, %v1463_v63  ;;  %v1462_v54 = vand.u32 2147483647, %v6925_v22  ;;  %v2229_v27 = vmul.f32 %v6085_v25, %v2196_v33  ;;  %v2195_v15 = vadd.f32 %v2163_v32, %v2131_v0  ;;  %v1940_v11 = vld [vmem:[%s7905_s11 + $0x50] sm:$0xff]  ;;  %v1911_v63 = vld [vmem:[%s7903_s9 + $0x68] sm:$0xff] }
 0x26d   :  { %3456 = vst.msk [vmem:[%s7907_s13 + $0x8] sm:$0xff] %vm2348_vm5, %v3423_v49  ;;  %v3553_v53 = vadd.f32 -1.0, %v2256_v61  ;;  %v2259_v20 = vadd.f32 %v2227_v55, %v2098_v30  ;;  %v2097_v2 = vmul.f32 2.0, %v2065_v43  ;;  %v1465_v42 = vand.u32 2147483647, %v6940_v62  ;;  %v6983_v55 = vld [vmem:[%s7904_s10 + $0x70] sm:$0xff]  ;;  %v3349_v30 = vpop.xlane.xlu1 %3348 }
 0x26e   :  { %v4157_v37 = vpop.eup %4156  ;;  %v1540_v4 = vmul.f32 1.442695, %v1495_v35  ;;  %v1494_v26 = vsub.f32 0.0, %v1462_v54  ;;  %v2228_v40 = vmul.f32 %v6085_v25, %v2195_v15  ;;  %v1973_v58 = vsub.f32 %v1909_v39, %v1941_v48  ;;  %v1943_v49 = vld [vmem:[%s7905_s11 + $0x68] sm:$0xff]  ;;  %v7038_v48 = vld [vmem:[%s7904_s10 + $0x80] sm:$0xff] }
 0x26f   :  { %v6943_v19 = vpop.eup %4158  ;;  %v2320_v59 = vmul.f32 0.5, %v3553_v53  ;;  %v3556_v9 = vadd.f32 -1.0, %v2259_v20  ;;  %v2258_v6 = vadd.f32 %v2226_v14, %v2097_v2  ;;  %v2013_v3 = vmul.f32 0.6931472, %v4157_v37 }
 0x270   :  { %v1677_v1 = vadd.f32 1.0, %v6943_v19  ;;  %4164 = vpow2.f32 %v1540_v4  ;;  %v1680_v51 = vmul.f32 -0.5, %v6943_v19  ;;  %v1538_v31 = vmul.f32 1.442695, %v1494_v26 }
 0x271   :  { %v4161_v12 = vpop.eup %4160  ;;  %2353 = vst.msk [vmem:[%s7907_s13 + $0x20] sm:$0xff] %vm2348_vm5, %v2320_v59  ;;  %v2323_v17 = vmul.f32 0.5, %v3556_v9  ;;  %v3555_v5 = vadd.f32 -1.0, %v2258_v6  ;;  %v2068_v8 = vsub.f32 %v6080_v13, %v2013_v3  ;;  %v1497_v46 = vsub.f32 0.0, %v1465_v42 }
 0x272   :  { %v3299_v21 = vld [vmem:[%s7907_s13 + $0x28] sm:$0xff]  ;;  %v2011_v29 = vmul.f32 0.6931472, %v4161_v12  ;;  %4166 = vlog2.f32 %v1677_v1  ;;  %v1429_v60 = vmax.f32 %v6838_v24, 0.0  ;;  %v1428_v16 = vmax.f32 %v6866_v18, 0.0 }
 0x273   :  { %v3427_v52 = vadd.f32 %v3343_v23, %v3299_v21  ;;  %2356 = vst.msk [vmem:[%s7907_s13 + $0x38] sm:$0xff] %vm2348_vm5, %v2323_v17  ;;  %v2322_v7 = vmul.f32 0.5, %v3555_v5  ;;  %v2100_v45 = vmul.f32 2.0, %v2068_v8  ;;  %4168 = vpow2.f32 %v1538_v31 }
 0x274   :  { %v6966_v56 = vpop.eup %4162  ;;  %v2067_v38 = vsub.f32 %v6080_v13, %v2011_v29  ;;  %v1544_v10 = vmul.f32 1.442695, %v1497_v46  ;;  %v1681_v14 = vadd.f32 1.0, %v1680_v51  ;;  %v1683_v33 = vand.u32 2147483647, %v6943_v19  ;;  %v1910_v29 = vld [vmem:[%s7903_s9 + $0x60] sm:$0xff] }
 0x275   :  { %3460 = vst.msk [vmem:[%s7907_s13 + $0x28] sm:$0xff] %vm2348_vm5, %v3427_v52  ;;  %2355 = vst.msk [vmem:[%s7907_s13 + $0x30] sm:$0xff] %vm2348_vm5, %v2322_v7  ;;  %v2261_v34 = vadd.f32 %v2229_v27, %v2100_v45  ;;  %v1668_v57 = vadd.f32 1.0, %v6966_v56  ;;  %v7007_v0 = vmul.f32 %v1973_v58, %v1973_v58  ;;  %v1671_v32 = vmul.f32 -0.5, %v6966_v56  ;;  %v3346_v27 = vpop.xlane.xlu0 %3345  ;;  %v1942_v51 = vld [vmem:[%s7905_s11 + $0x60] sm:$0xff] }
 0x276   :  { %v2099_v41 = vmul.f32 2.0, %v2067_v38  ;;  %v1972_v20 = vsub.f32 %v1908_v47, %v1940_v11  ;;  %v1464_v2 = vand.u32 2147483647, %v6983_v55  ;;  %v1431_v59 = vmax.f32 %v6913_v44, 0.0  ;;  %v7159_v44 = vld [vmem:[%s7904_s10 + $0x90] sm:$0xff] }
 0x277   :  { %v3558_v36 = vadd.f32 -1.0, %v2261_v34  ;;  %4170 = vlog2.f32 %v1668_v57  ;;  %v1975_v9 = vsub.f32 %v1911_v63, %v1943_v49  ;;  %v1467_v6 = vand.u32 2147483647, %v6988_v50  ;;  %v3355_v34 = vpop.xlane.xlu1 %3354  ;;  %v1945_v49 = vld [vmem:[%s7905_s11 + $0x78] sm:$0xff] }
 0x278   :  { %v3298_v61 = vld [vmem:[%s7907_s13 + $0x20] sm:$0xff]  ;;  %v2260_v43 = vadd.f32 %v2228_v40, %v2099_v41  ;;  %4172 = vpow2.f32 %v1544_v10  ;;  %v1682_v23 = vmul.f32 %v6943_v19, %v1681_v14  ;;  %vm7027_vm11 = vcmp.lt.f32.partialorder %v1683_v33, 0.0004427343  ;;  %v1913_v33 = vld [vmem:[%s7903_s9 + $0x78] sm:$0xff] }
 0x279   :  { %v3426_v35 = vadd.f32 %v3340_v28, %v3298_v61  ;;  %v2325_v53 = vmul.f32 0.5, %v3558_v36  ;;  %v1672_v5 = vadd.f32 1.0, %v1671_v32  ;;  %v1496_v8 = vsub.f32 0.0, %v1464_v2 }
 0x27a   :  { %v7011_v54 = vpop.eup %4164  ;;  %v3301_v37 = vld [vmem:[%s7907_s13 + $0x38] sm:$0xff]  ;;  %v3557_v4 = vadd.f32 -1.0, %v2260_v43  ;;  %v1499_v39 = vsub.f32 0.0, %v1467_v6  ;;  %v1674_v21 = vand.u32 2147483647, %v6966_v56  ;;  %v7055_v52 = vmul.f32 %v1972_v20, %v1972_v20  ;;  %v3352_v43 = vpop.xlane.xlu0 %3351  ;;  %v1944_v20 = vld [vmem:[%s7905_s11 + $0x70] sm:$0xff] }
 0x27b   :  { %3459 = vst.msk [vmem:[%s7907_s13 + $0x20] sm:$0xff] %vm2348_vm5, %v3426_v35  ;;  %v3429_v3 = vadd.f32 %v3349_v30, %v3301_v37  ;;  %2358 = vst.msk [vmem:[%s7907_s13 + $0x48] sm:$0xff] %vm2348_vm5, %v2325_v53  ;;  %v1695_v1 = vadd.f32 1.0, %v7011_v54  ;;  %v1698_v7 = vmul.f32 -0.5, %v7011_v54  ;;  %v1542_v45 = vmul.f32 1.442695, %v1496_v8 }
 0x27c   :  { %v4167_v42 = vpop.eup %4166  ;;  %v3300_v12 = vld [vmem:[%s7907_s13 + $0x30] sm:$0xff]  ;;  %v2324_v17 = vmul.f32 0.5, %v3557_v4  ;;  %v1548_v31 = vmul.f32 1.442695, %v1499_v39  ;;  %v7064_v40 = vmul.f32 %v1975_v9, %v1975_v9  ;;  %v1430_v38 = vmax.f32 %v6925_v22, 0.0  ;;  %v1947_v39 = vld [vmem:[%s7905_s11 + $0x88] sm:$0xff] }
 0x27d   :  { %3462 = vst.msk [vmem:[%s7907_s13 + $0x38] sm:$0xff] %vm2348_vm5, %v3429_v3  ;;  %v3428_v19 = vadd.f32 %v3346_v27, %v3300_v12  ;;  %v1679_v26 = vmul.f32 0.6931472, %v4167_v42  ;;  %4174 = vlog2.f32 %v1695_v1  ;;  %v1466_v58 = vand.u32 2147483647, %v7038_v48  ;;  %v7068_v46 = vpop.eup %4168  ;;  %v1912_v53 = vld [vmem:[%s7903_s9 + $0x70] sm:$0xff] }
 0x27e   :  { %2357 = vst.msk [vmem:[%s7907_s13 + $0x40] sm:$0xff] %vm2348_vm5, %v2324_v17  ;;  %v1673_v41 = vmul.f32 %v6966_v56, %v1672_v5  ;;  %v1974_v47 = vsub.f32 %v1910_v29, %v1942_v51  ;;  %4176 = vpow2.f32 %v1542_v45  ;;  %vm7073_vm12 = vcmp.lt.f32.partialorder %v1674_v21, 0.0004427343  ;;  %v1915_v17 = vld [vmem:[%s7903_s9 + $0x88] sm:$0xff]  ;;  %v7137_v45 = vld [vmem:[%s7904_s10 + $0x98] sm:$0xff] }
 0x27f   :  { %3461 = vst.msk [vmem:[%s7907_s13 + $0x30] sm:$0xff] %vm2348_vm5, %v3428_v19  ;;  %v1685_v28 = vsel %vm7027_vm11, %v1682_v23, %v1679_v26  ;;  %v1686_v36 = vadd.f32 1.0, %v7068_v46  ;;  %v1433_v14 = vmax.f32 %v6940_v62, 0.0  ;;  %4178 = vpow2.f32 %v1548_v31 }
 0x280   :  { %v1877_v57 = vadd.f32 %v1685_v28, %v1429_v60  ;;  %v1699_v63 = vadd.f32 1.0, %v1698_v7  ;;  %v1498_v61 = vsub.f32 0.0, %v1466_v58  ;;  %v1701_v32 = vand.u32 2147483647, %v7011_v54 }
 0x281   :  { %v4171_v11 = vpop.eup %4170  ;;  %v1689_v35 = vmul.f32 -0.5, %v7068_v46  ;;  %v7100_v27 = vmul.f32 %v1974_v47, %v1974_v47  ;;  %v1977_v23 = vsub.f32 %v1913_v33, %v1945_v49  ;;  %v1976_v12 = vsub.f32 %v1912_v53, %v1944_v20 }
 0x282   :  { %v7082_v24 = vpop.eup %4172  ;;  %v3303_v56 = vld [vmem:[%s7907_s13 + $0x48] sm:$0xff]  ;;  %4180 = vlog2.f32 %v1877_v57  ;;  %v1670_v60 = vmul.f32 0.6931472, %v4171_v11  ;;  %v2166_v2 = vmul.f32 %v1877_v57, %v1877_v57  ;;  %v1546_v15 = vmul.f32 1.442695, %v1498_v61 }
 0x283   :  { %v3431_v30 = vadd.f32 %v3355_v34, %v3303_v56  ;;  %4182 = vlog2.f32 %v1686_v36  ;;  %v1713_v4 = vadd.f32 1.0, %v7082_v24  ;;  %v1716_v3 = vmul.f32 -0.5, %v7082_v24 }
 0x284   :  { %v1676_v37 = vsel %vm7073_vm12, %v1673_v41, %v1670_v60  ;;  %v1700_v42 = vmul.f32 %v7011_v54, %v1699_v63  ;;  %vm7117_vm13 = vcmp.lt.f32.partialorder %v1701_v32, 0.0004427343  ;;  %v1690_v18 = vadd.f32 1.0, %v1689_v35 }
 0x285   :  { %3464 = vst.msk [vmem:[%s7907_s13 + $0x48] sm:$0xff] %vm2348_vm5, %v3431_v30  ;;  %v3302_v9 = vld [vmem:[%s7907_s13 + $0x40] sm:$0xff]  ;;  %v1876_v6 = vadd.f32 %v1676_v37, %v1428_v16  ;;  %4184 = vlog2.f32 %v1713_v4  ;;  %v1692_v16 = vand.u32 2147483647, %v7068_v46  ;;  %v2198_v54 = vadd.f32 %v2166_v2, %v7007_v0 }
 0x286   :  { %v3430_v1 = vadd.f32 %v3352_v43, %v3302_v9  ;;  %v1717_v21 = vadd.f32 1.0, %v1716_v3  ;;  %v1719_v29 = vand.u32 2147483647, %v7082_v24  ;;  %v7131_v51 = vmul.f32 %v1977_v23, %v1977_v23 }
 0x287   :  { %v4175_v5 = vpop.eup %4174  ;;  %4186 = vlog2.f32 %v1876_v6  ;;  %v2165_v19 = vmul.f32 %v1876_v6, %v1876_v6  ;;  %v1432_v7 = vmax.f32 %v6983_v55, 0.0  ;;  %v7141_v0 = vmul.f32 %v1976_v12, %v1976_v12 }
 0x288   :  { %3463 = vst.msk [vmem:[%s7907_s13 + $0x40] sm:$0xff] %vm2348_vm5, %v3430_v1  ;;  %v1697_v26 = vmul.f32 0.6931472, %v4175_v5  ;;  %4188 = vpow2.f32 %v1546_v15  ;;  %v4177_v31 = vpop.eup %4176  ;;  %v1435_v58 = vmax.f32 %v6988_v50, 0.0  ;;  %v7144_v34 = vsub.f32 %v1915_v17, %v1947_v39  ;;  %v7230_v50 = vld [vmem:[%s7904_s10 + $0xa0] sm:$0xff] }
 0x289   :  { %v4179_v57 = vpop.eup %4178  ;;  %v1691_v47 = vmul.f32 %v7068_v46, %v1690_v18  ;;  %vm7149_vm14 = vcmp.lt.f32.partialorder %v1692_v16, 0.0004427343  ;;  %v1704_v10 = vadd.f32 1.0, %v4177_v31  ;;  %v2231_v33 = vmul.f32 %v6085_v25, %v2198_v54 }
 0x28a   :  { %v1703_v28 = vsel %vm7117_vm13, %v1700_v42, %v1697_v26  ;;  %v2197_v56 = vadd.f32 %v2165_v19, %v7055_v52  ;;  %v1731_v60 = vadd.f32 1.0, %v4179_v57  ;;  %v1469_v63 = vand.u32 2147483647, %v7137_v45 }
 0x28b   :  { %v1879_v41 = vadd.f32 %v1703_v28, %v1431_v59  ;;  %v1718_v49 = vmul.f32 %v7082_v24, %v1717_v21  ;;  %vm7162_vm15 = vcmp.lt.f32.partialorder %v1719_v29, 0.0004427343  ;;  %v1707_v52 = vmul.f32 -0.5, %v4177_v31 }
 0x28c   :  { %v4181_v36 = vpop.eup %4180  ;;  %v1734_v43 = vmul.f32 -0.5, %v4179_v57  ;;  %v1710_v35 = vand.u32 2147483647, %v4177_v31  ;;  %v1468_v53 = vand.u32 2147483647, %v7159_v44  ;;  %v2230_v2 = vmul.f32 %v6085_v25, %v2197_v56 }
 0x28d   :  { %v4183_v59 = vpop.eup %4182  ;;  %v2017_v46 = vmul.f32 0.6931472, %v4181_v36  ;;  %4190 = vlog2.f32 %v1879_v41  ;;  %v2168_v37 = vmul.f32 %v1879_v41, %v1879_v41  ;;  %v1501_v4 = vsub.f32 0.0, %v1469_v63 }
 0x28e   :  { %v1688_v30 = vmul.f32 0.6931472, %v4183_v59  ;;  %4192 = vlog2.f32 %v1704_v10  ;;  %v1737_v15 = vand.u32 2147483647, %v4179_v57  ;;  %v1708_v12 = vadd.f32 1.0, %v1707_v52 }
 0x28f   :  { %v2070_v32 = vsub.f32 %v6080_v13, %v2017_v46  ;;  %4194 = vlog2.f32 %v1731_v60  ;;  %v4185_v20 = vpop.eup %4184  ;;  %v1735_v17 = vadd.f32 1.0, %v1734_v43  ;;  %v1552_v5 = vmul.f32 1.442695, %v1501_v4  ;;  %v1914_v43 = vld [vmem:[%s7903_s9 + $0x80] sm:$0xff] }
 0x290   :  { %v1694_v24 = vsel %vm7149_vm14, %v1691_v47, %v1688_v30  ;;  %v1715_v23 = vmul.f32 0.6931472, %v4185_v20  ;;  %vm7177_vm0 = vcmp.lt.f32.partialorder %v1710_v35, 0.0004427343  ;;  %v1500_v21 = vsub.f32 0.0, %v1468_v53  ;;  %v7189_v47 = vld [vmem:[%s7904_s10 + $0xa8] sm:$0xff] }
 0x291   :  { %v4187_v9 = vpop.eup %4186  ;;  %v2102_v6 = vmul.f32 2.0, %v2070_v32  ;;  %v1878_v3 = vadd.f32 %v1694_v24, %v1430_v38  ;;  %v2200_v38 = vadd.f32 %v2168_v37, %v7064_v40  ;;  %v1709_v28 = vmul.f32 %v4177_v31, %v1708_v12  ;;  %v1946_v32 = vld [vmem:[%s7905_s11 + $0x80] sm:$0xff] }
 0x292   :  { %v7173_v1 = vpop.eup %4188  ;;  %v2015_v42 = vmul.f32 0.6931472, %v4187_v9  ;;  %v1721_v18 = vsel %vm7162_vm15, %v1718_v49, %v1715_v23  ;;  %v1736_v41 = vmul.f32 %v4179_v57, %v1735_v17  ;;  %vm7191_vm1 = vcmp.lt.f32.partialorder %v1737_v15, 0.0004427343  ;;  %v3361_v15 = vpop.xlane.xlu1 %3360 }
 0x293   :  { %v2263_v8 = vadd.f32 %v2231_v33, %v2102_v6  ;;  %4196 = vlog2.f32 %v1878_v3  ;;  %v1881_v39 = vadd.f32 %v1721_v18, %v1433_v14  ;;  %v1722_v54 = vadd.f32 1.0, %v7173_v1 }
 0x294   :  { %v2069_v22 = vsub.f32 %v6080_v13, %v2015_v42  ;;  %v2167_v26 = vmul.f32 %v1878_v3, %v1878_v3  ;;  %4198 = vpow2.f32 %v1552_v5  ;;  %v1725_v14 = vmul.f32 -0.5, %v7173_v1 }
 0x295   :  { %v3560_v19 = vadd.f32 -1.0, %v2263_v8  ;;  %4200 = vlog2.f32 %v1881_v39  ;;  %v2233_v31 = vmul.f32 %v6085_v25, %v2200_v38  ;;  %v1728_v57 = vand.u32 2147483647, %v7173_v1  ;;  %v7245_v38 = vpop.f32.mrb[0].mxu0 }
 0x296   :  { %v2101_v29 = vmul.f32 2.0, %v2069_v22  ;;  %4202 = vlog2.f32 %v1722_v54  ;;  %v2199_v60 = vadd.f32 %v2167_v26, %v7100_v27  ;;  %v1550_v59 = vmul.f32 1.442695, %v1500_v21  ;;  %v7248_v26 = vpop.f32.mrb[1].mxu0 }
 0x297   :  { %v4191_v11 = vpop.eup %4190  ;;  %v2327_v40 = vmul.f32 0.5, %v3560_v19  ;;  %v1471_v46 = vand.u32 2147483647, %v7189_v47  ;;  %v2170_v30 = vmul.f32 %v1881_v39, %v1881_v39  ;;  %v1726_v35 = vadd.f32 1.0, %v1725_v14 }
 0x298   :  { %v4193_v10 = vpop.eup %4192  ;;  %v2262_v36 = vadd.f32 %v2230_v2, %v2101_v29  ;;  %v2021_v33 = vmul.f32 0.6931472, %v4191_v11  ;;  %4204 = vpow2.f32 %v1550_v59  ;;  %v2140_v6 = vmul.f32 %v7144_v34, %v7144_v34  ;;  %v3358_v11 = vpop.xlane.xlu0 %3357 }
 0x299   :  { %v4195_v56 = vpop.eup %4194  ;;  %2360 = vst.msk [vmem:[%s7907_s13 + $0x58] sm:$0xff] %vm2348_vm5, %v2327_v40  ;;  %v1706_v63 = vmul.f32 0.6931472, %v4193_v10  ;;  %v1503_v53 = vsub.f32 0.0, %v1471_v46  ;;  %v1434_v3 = vmax.f32 %v7038_v48, 0.0  ;;  %v1978_v23 = vsub.f32 %v1914_v43, %v1946_v32 }
 0x29a   :  { %v3559_v49 = vadd.f32 -1.0, %v2262_v36  ;;  %v2072_v61 = vsub.f32 %v6080_v13, %v2021_v33  ;;  %v1733_v52 = vmul.f32 0.6931472, %v4195_v56  ;;  %v2232_v42 = vmul.f32 %v6085_v25, %v2199_v60 }
 0x29b   :  { %v1712_v27 = vsel %vm7177_vm0, %v1709_v28, %v1706_v63  ;;  %v2202_v48 = vadd.f32 %v2170_v30, %v7131_v51  ;;  %v1727_v34 = vmul.f32 %v7173_v1, %v1726_v35  ;;  %vm7236_vm2 = vcmp.lt.f32.partialorder %v1728_v57, 0.0004427343 }
 0x29c   :  { %v2326_v20 = vmul.f32 0.5, %v3559_v49  ;;  %v2104_v2 = vmul.f32 2.0, %v2072_v61  ;;  %v1880_v37 = vadd.f32 %v1712_v27, %v1432_v7  ;;  %v1739_v24 = vsel %vm7191_vm1, %v1736_v41, %v1733_v52 }
 0x29d   :  { %v4197_v4 = vpop.eup %4196  ;;  %v1883_v9 = vadd.f32 %v1739_v24, %v1435_v58  ;;  %v1556_v22 = vmul.f32 1.442695, %v1503_v53  ;;  %v1470_v19 = vand.u32 2147483647, %v7230_v50  ;;  %v2235_v40 = vmul.f32 %v6085_v25, %v2202_v48  ;;  %v7278_v53 = vld [vmem:[%s7904_s10 + $0xb8] sm:$0xff] }
 0x29e   :  { %2359 = vst.msk [vmem:[%s7907_s13 + $0x50] sm:$0xff] %vm2348_vm5, %v2326_v20  ;;  %v2265_v55 = vadd.f32 %v2233_v31, %v2104_v2  ;;  %v2019_v7 = vmul.f32 0.6931472, %v4197_v4  ;;  %4206 = vlog2.f32 %v1880_v37  ;;  %v7232_v58 = vpop.eup %4198  ;;  %v2169_v54 = vmul.f32 %v1880_v37, %v1880_v37  ;;  %v3367_v2 = vpop.xlane.xlu1 %3366 }
 0x29f   :  { %4208 = vlog2.f32 %v1883_v9  ;;  %v4201_v17 = vpop.eup %4200  ;;  %v1749_v16 = vadd.f32 1.0, %v7232_v58  ;;  %v2172_v28 = vmul.f32 %v1883_v9, %v1883_v9  ;;  %v1752_v14 = vmul.f32 -0.5, %v7232_v58 }
 0x2a0   :  { %v3305_v5 = vld [vmem:[%s7907_s13 + $0x58] sm:$0xff]  ;;  %v3562_v8 = vadd.f32 -1.0, %v2265_v55  ;;  %v2071_v18 = vsub.f32 %v6080_v13, %v2019_v7  ;;  %v4203_v51 = vpop.eup %4202  ;;  %v2025_v1 = vmul.f32 0.6931472, %v4201_v17  ;;  %v2201_v56 = vadd.f32 %v2169_v54, %v7141_v0 }
 0x2a1   :  { %v3433_v39 = vadd.f32 %v3361_v15, %v3305_v5  ;;  %v1724_v41 = vmul.f32 0.6931472, %v4203_v51  ;;  %4210 = vlog2.f32 %v1749_v16  ;;  %v1502_v63 = vsub.f32 0.0, %v1470_v19  ;;  %v1949_v15 = vld [vmem:[%s7905_s11 + $0x98] sm:$0xff] }
 0x2a2   :  { %v2329_v21 = vmul.f32 0.5, %v3562_v8  ;;  %v2103_v29 = vmul.f32 2.0, %v2071_v18  ;;  %v2074_v62 = vsub.f32 %v6080_v13, %v2025_v1  ;;  %4212 = vpow2.f32 %v1556_v22  ;;  %v7263_v33 = vpop.eup %4204  ;;  %v1916_v8 = vld [vmem:[%s7903_s9 + $0x90] sm:$0xff] }
 0x2a3   :  { %3466 = vst.msk [vmem:[%s7907_s13 + $0x58] sm:$0xff] %vm2348_vm5, %v3433_v39  ;;  %v1730_v36 = vsel %vm7236_vm2, %v1727_v34, %v1724_v41  ;;  %v2204_v49 = vadd.f32 %v2172_v28, %v2140_v6  ;;  %v1740_v61 = vadd.f32 1.0, %v7263_v33  ;;  %v2139_v52 = vmul.f32 %v1978_v23, %v1978_v23  ;;  %v1917_v23 = vld [vmem:[%s7903_s9 + $0x98] sm:$0xff]  ;;  %v1948_v18 = vld [vmem:[%s7905_s11 + $0x90] sm:$0xff]  ;;  %v3364_v41 = vpop.xlane.xlu0 %3363 }
 0x2a4   :  { %2362 = vst.msk [vmem:[%s7907_s13 + $0x68] sm:$0xff] %vm2348_vm5, %v2329_v21  ;;  %v2264_v10 = vadd.f32 %v2232_v42, %v2103_v29  ;;  %v2106_v57 = vmul.f32 2.0, %v2074_v62  ;;  %v1882_v60 = vadd.f32 %v1730_v36, %v1434_v3  ;;  %v1753_v43 = vadd.f32 1.0, %v1752_v14 }
 0x2a5   :  { %v3304_v31 = vld [vmem:[%s7907_s13 + $0x50] sm:$0xff]  ;;  %v1437_v0 = vmax.f32 %v7137_v45, 0.0  ;;  %v1554_v35 = vmul.f32 1.442695, %v1502_v63  ;;  %v1755_v4 = vand.u32 2147483647, %v7232_v58  ;;  %v2234_v45 = vmul.f32 %v6085_v25, %v2201_v56 }
 0x2a6   :  { %v3432_v59 = vadd.f32 %v3358_v11, %v3304_v31  ;;  %v3561_v46 = vadd.f32 -1.0, %v2264_v10  ;;  %v2267_v30 = vadd.f32 %v2235_v40, %v2106_v57  ;;  %4214 = vlog2.f32 %v1882_v60 }
 0x2a7   :  { %4216 = vlog2.f32 %v1740_v61  ;;  %v1743_v9 = vmul.f32 -0.5, %v7263_v33  ;;  %v2237_v3 = vmul.f32 %v6085_v25, %v2204_v49  ;;  %v2171_v48 = vmul.f32 %v1882_v60, %v1882_v60 }
 0x2a8   :  { %v4207_v32 = vpop.eup %4206  ;;  %3465 = vst.msk [vmem:[%s7907_s13 + $0x50] sm:$0xff] %vm2348_vm5, %v3432_v59  ;;  %v2328_v27 = vmul.f32 0.5, %v3561_v46  ;;  %v3564_v37 = vadd.f32 -1.0, %v2267_v30  ;;  %4218 = vpow2.f32 %v1554_v35  ;;  %v1754_v34 = vmul.f32 %v7232_v58, %v1753_v43  ;;  %v3373_v30 = vpop.xlane.xlu1 %3372  ;;  %v1951_v35 = vld [vmem:[%s7905_s11 + $0xa8] sm:$0xff] }
 0x2a9   :  { %v4209_v20 = vpop.eup %4208  ;;  %v2023_v24 = vmul.f32 0.6931472, %v4207_v32  ;;  %v1746_v5 = vand.u32 2147483647, %v7263_v33  ;;  %v1473_v16 = vand.u32 2147483647, %v7278_v53  ;;  %v1981_v39 = vsub.f32 %v1917_v23, %v1949_v15 }
 0x2aa   :  { %2361 = vst.msk [vmem:[%s7907_s13 + $0x60] sm:$0xff] %vm2348_vm5, %v2328_v27  ;;  %v2029_v6 = vmul.f32 0.6931472, %v4209_v20  ;;  %v2331_v7 = vmul.f32 0.5, %v3564_v37  ;;  %vm7312_vm3 = vcmp.lt.f32.partialorder %v1755_v4, 0.0004427343  ;;  %v2203_v40 = vadd.f32 %v2171_v48, %v2139_v52 }
 0x2ab   :  { %v3307_v55 = vld [vmem:[%s7907_s13 + $0x68] sm:$0xff]  ;;  %v2073_v42 = vsub.f32 %v6080_v13, %v2023_v24  ;;  %v4211_v22 = vpop.eup %4210  ;;  %v1744_v1 = vadd.f32 1.0, %v1743_v9  ;;  %v1436_v29 = vmax.f32 %v7159_v44, 0.0  ;;  %v1505_v28 = vsub.f32 0.0, %v1473_v16  ;;  %v7333_v44 = vld [vmem:[%s7904_s10 + $0xb0] sm:$0xff] }
 0x2ac   :  { %v3435_v12 = vadd.f32 %v3367_v2, %v3307_v55  ;;  %v2076_v17 = vsub.f32 %v6080_v13, %v2029_v6  ;;  %2364 = vst.msk [vmem:[%s7907_s13 + $0x78] sm:$0xff] %vm2348_vm5, %v2331_v7  ;;  %v7316_v54 = vpop.eup %4212  ;;  %v1751_v21 = vmul.f32 0.6931472, %v4211_v22  ;;  %v1980_v62 = vsub.f32 %v1916_v8, %v1948_v18  ;;  %v1919_v27 = vld [vmem:[%s7903_s9 + $0xa8] sm:$0xff]  ;;  %v7383_v18 = vld [vmem:[%s7904_s10 + $0xc0] sm:$0xff] }
 0x2ad   :  { %v2105_v58 = vmul.f32 2.0, %v2073_v42  ;;  %v1767_v14 = vadd.f32 1.0, %v7316_v54  ;;  %vm7326_vm4 = vcmp.lt.f32.partialorder %v1746_v5, 0.0004427343  ;;  %v1560_v57 = vmul.f32 1.442695, %v1505_v28 }
 0x2ae   :  { %3468 = vst.msk [vmem:[%s7907_s13 + $0x68] sm:$0xff] %vm2348_vm5, %v3435_v12  ;;  %v2108_v19 = vmul.f32 2.0, %v2076_v17  ;;  %v1757_v36 = vsel %vm7312_vm3, %v1754_v34, %v1751_v21  ;;  %v1745_v46 = vmul.f32 %v7263_v33, %v1744_v1  ;;  %v1770_v32 = vmul.f32 -0.5, %v7316_v54  ;;  %v7377_v17 = vld [vmem:[%s7904_s10 + $0xc8] sm:$0xff] }
 0x2af   :  { %v2266_v11 = vadd.f32 %v2234_v45, %v2105_v58  ;;  %v1885_v59 = vadd.f32 %v1757_v36, %v1437_v0  ;;  %4220 = vlog2.f32 %v1767_v14  ;;  %v1472_v33 = vand.u32 2147483647, %v7333_v44 }
 0x2b0   :  { %v2269_v10 = vadd.f32 %v2237_v3, %v2108_v19  ;;  %v4215_v56 = vpop.eup %4214  ;;  %v2236_v4 = vmul.f32 %v6085_v25, %v2203_v40  ;;  %v1983_v3 = vsub.f32 %v1919_v27, %v1951_v35  ;;  %v2142_v55 = vmul.f32 %v1981_v39, %v1981_v39  ;;  %v3370_v39 = vpop.xlane.xlu0 %3369 }
 0x2b1   :  { %v3306_v60 = vld [vmem:[%s7907_s13 + $0x60] sm:$0xff]  ;;  %v3563_v63 = vadd.f32 -1.0, %v2266_v11  ;;  %v4217_v49 = vpop.eup %4216  ;;  %v2027_v43 = vmul.f32 0.6931472, %v4215_v56  ;;  %4222 = vlog2.f32 %v1885_v59  ;;  %v1771_v42 = vadd.f32 1.0, %v1770_v32 }
 0x2b2   :  { %v3434_v61 = vadd.f32 %v3364_v41, %v3306_v60  ;;  %v3566_v52 = vadd.f32 -1.0, %v2269_v10  ;;  %v1742_v0 = vmul.f32 0.6931472, %v4217_v49  ;;  %v7347_v2 = vpop.eup %4218  ;;  %4224 = vpow2.f32 %v1560_v57  ;;  %v3379_v41 = vpop.xlane.xlu1 %3378 }
 0x2b3   :  { %v2330_v20 = vmul.f32 0.5, %v3563_v63  ;;  %v3309_v37 = vld [vmem:[%s7907_s13 + $0x78] sm:$0xff]  ;;  %v2075_v9 = vsub.f32 %v6080_v13, %v2027_v43  ;;  %v1758_v23 = vadd.f32 1.0, %v7347_v2  ;;  %v2174_v48 = vmul.f32 %v1885_v59, %v1885_v59 }
 0x2b4   :  { %3467 = vst.msk [vmem:[%s7907_s13 + $0x60] sm:$0xff] %vm2348_vm5, %v3434_v61  ;;  %v2333_v24 = vmul.f32 0.5, %v3566_v52  ;;  %v3437_v45 = vadd.f32 %v3373_v30, %v3309_v37  ;;  %v1748_v6 = vsel %vm7326_vm4, %v1745_v46, %v1742_v0  ;;  %v1773_v34 = vand.u32 2147483647, %v7316_v54 }
 0x2b5   :  { %2363 = vst.msk [vmem:[%s7907_s13 + $0x70] sm:$0xff] %vm2348_vm5, %v2330_v20  ;;  %v2107_v15 = vmul.f32 2.0, %v2075_v9  ;;  %v1884_v7 = vadd.f32 %v1748_v6, %v1436_v29  ;;  %4226 = vlog2.f32 %v1758_v23  ;;  %v1504_v12 = vsub.f32 0.0, %v1472_v33  ;;  %v7426_v33 = vld [vmem:[%s7904_s10 + $0xd8] sm:$0xff] }
 0x2b6   :  { %2366 = vst.msk [vmem:[%s7907_s13 + $0x88] sm:$0xff] %vm2348_vm5, %v2333_v24  ;;  %3470 = vst.msk [vmem:[%s7907_s13 + $0x78] sm:$0xff] %vm2348_vm5, %v3437_v45  ;;  %v1761_v8 = vmul.f32 -0.5, %v7347_v2  ;;  %v2141_v16 = vmul.f32 %v1980_v62, %v1980_v62  ;;  %v1439_v22 = vmax.f32 %v7189_v47, 0.0  ;;  %v7386_v58 = vmul.f32 %v1983_v3, %v1983_v3  ;;  %v1918_v47 = vld [vmem:[%s7903_s9 + $0xa0] sm:$0xff]  ;;  %v1953_v9 = vld [vmem:[%s7905_s11 + $0xb8] sm:$0xff] }
 0x2b7   :  { %v2268_v5 = vadd.f32 %v2236_v4, %v2107_v15  ;;  %4228 = vlog2.f32 %v1884_v7  ;;  %v1558_v51 = vmul.f32 1.442695, %v1504_v12  ;;  %v1772_v19 = vmul.f32 %v7316_v54, %v1771_v42  ;;  %v1950_v62 = vld [vmem:[%s7905_s11 + $0xa0] sm:$0xff]  ;;  %v1921_v4 = vld [vmem:[%s7903_s9 + $0xb8] sm:$0xff]  ;;  %v3376_v12 = vpop.xlane.xlu0 %3375 }
 0x2b8   :  { %v1438_v21 = vmax.f32 %v7230_v50, 0.0  ;;  %v1475_v29 = vand.u32 2147483647, %v7377_v17  ;;  %v2206_v11 = vadd.f32 %v2174_v48, %v2142_v55  ;;  %vm7391_vm6 = vcmp.lt.f32.partialorder %v1773_v34, 0.0004427343  ;;  %v1952_v55 = vld [vmem:[%s7905_s11 + $0xb0] sm:$0xff] }
 0x2b9   :  { %v3565_v1 = vadd.f32 -1.0, %v2268_v5  ;;  %v4221_v28 = vpop.eup %4220  ;;  %4230 = vpow2.f32 %v1558_v51  ;;  %v1474_v54 = vand.u32 2147483647, %v7383_v18  ;;  %v1762_v31 = vadd.f32 1.0, %v1761_v8 }
 0x2ba   :  { %v1769_v36 = vmul.f32 0.6931472, %v4221_v28  ;;  %v1507_v57 = vsub.f32 0.0, %v1475_v29  ;;  %v2173_v59 = vmul.f32 %v1884_v7, %v1884_v7  ;;  %v1764_v46 = vand.u32 2147483647, %v7347_v2 }
 0x2bb   :  { %v2332_v10 = vmul.f32 0.5, %v3565_v1  ;;  %v4223_v56 = vpop.eup %4222  ;;  %v1506_v49 = vsub.f32 0.0, %v1474_v54  ;;  %v2239_v27 = vmul.f32 %v6085_v25, %v2206_v11  ;;  %v1982_v20 = vsub.f32 %v1918_v47, %v1950_v62 }
 0x2bc   :  { %v3308_v14 = vld [vmem:[%s7907_s13 + $0x70] sm:$0xff]  ;;  %v7409_v61 = vpop.eup %4224  ;;  %v2033_v52 = vmul.f32 0.6931472, %v4223_v56  ;;  %v1775_v43 = vsel %vm7391_vm6, %v1772_v19, %v1769_v36  ;;  %v1564_v32 = vmul.f32 1.442695, %v1507_v57  ;;  %v1763_v24 = vmul.f32 %v7347_v2, %v1762_v31 }
 0x2bd   :  { %v3436_v60 = vadd.f32 %v3370_v39, %v3308_v14  ;;  %v3311_v63 = vld [vmem:[%s7907_s13 + $0x88] sm:$0xff]  ;;  %2365 = vst.msk [vmem:[%s7907_s13 + $0x80] sm:$0xff] %vm2348_vm5, %v2332_v10  ;;  %v1887_v35 = vadd.f32 %v1775_v43, %v1439_v22  ;;  %v1785_v0 = vadd.f32 1.0, %v7409_v61  ;;  %v1562_v45 = vmul.f32 1.442695, %v1506_v49  ;;  %v1920_v2 = vld [vmem:[%s7903_s9 + $0xb0] sm:$0xff] }
 0x2be   :  { %v3439_v30 = vadd.f32 %v3379_v41, %v3311_v63  ;;  %v2078_v37 = vsub.f32 %v6080_v13, %v2033_v52  ;;  %4232 = vpow2.f32 %v1564_v32  ;;  %v2205_v3 = vadd.f32 %v2173_v59, %v2141_v16  ;;  %v7469_v57 = vld [vmem:[%s7904_s10 + $0xd0] sm:$0xff] }
 0x2bf   :  { %3469 = vst.msk [vmem:[%s7907_s13 + $0x70] sm:$0xff] %vm2348_vm5, %v3436_v60  ;;  %v4227_v6 = vpop.eup %4226  ;;  %4234 = vlog2.f32 %v1887_v35  ;;  %vm7440_vm7 = vcmp.lt.f32.partialorder %v1764_v46, 0.0004427343  ;;  %v1788_v15 = vmul.f32 -0.5, %v7409_v61  ;;  %v1477_v34 = vand.u32 2147483647, %v7426_v33 }
 0x2c0   :  { %3472 = vst.msk [vmem:[%s7907_s13 + $0x88] sm:$0xff] %vm2348_vm5, %v3439_v30  ;;  %v2110_v42 = vmul.f32 2.0, %v2078_v37  ;;  %v1760_v48 = vmul.f32 0.6931472, %v4227_v6  ;;  %4236 = vlog2.f32 %v1785_v0  ;;  %v2143_v8 = vmul.f32 %v1982_v20, %v1982_v20 }
 0x2c1   :  { %v4229_v7 = vpop.eup %4228  ;;  %v1985_v16 = vsub.f32 %v1921_v4, %v1953_v9  ;;  %4238 = vpow2.f32 %v1562_v45  ;;  %v1984_v39 = vsub.f32 %v1920_v2, %v1952_v55  ;;  %v1509_v1 = vsub.f32 0.0, %v1477_v34  ;;  %v7506_v55 = vld [vmem:[%s7904_s10 + $0xe8] sm:$0xff] }
 0x2c2   :  { %v2031_v5 = vmul.f32 0.6931472, %v4229_v7  ;;  %v2271_v22 = vadd.f32 %v2239_v27, %v2110_v42  ;;  %v1766_v51 = vsel %vm7440_vm7, %v1763_v24, %v1760_v48  ;;  %v2238_v28 = vmul.f32 %v6085_v25, %v2205_v3  ;;  %v3385_v7 = vpop.xlane.xlu1 %3384 }
 0x2c3   :  { %v7454_v19 = vpop.eup %4230  ;;  %v2176_v11 = vmul.f32 %v1887_v35, %v1887_v35  ;;  %v1886_v40 = vadd.f32 %v1766_v51, %v1438_v21  ;;  %v1789_v54 = vadd.f32 1.0, %v1788_v15  ;;  %v1441_v36 = vmax.f32 %v7278_v53, 0.0  ;;  %v1923_v51 = vld [vmem:[%s7903_s9 + $0xc8] sm:$0xff] }
 0x2c4   :  { %v3310_v29 = vld [vmem:[%s7907_s13 + $0x80] sm:$0xff]  ;;  %v2077_v41 = vsub.f32 %v6080_v13, %v2031_v5  ;;  %v3568_v62 = vadd.f32 -1.0, %v2271_v22  ;;  %v1776_v14 = vadd.f32 1.0, %v7454_v19  ;;  %v1440_v31 = vmax.f32 %v7333_v44, 0.0 }
 0x2c5   :  { %v3438_v47 = vadd.f32 %v3376_v12, %v3310_v29  ;;  %4240 = vlog2.f32 %v1886_v40  ;;  %v1791_v21 = vand.u32 2147483647, %v7409_v61  ;;  %v1568_v56 = vmul.f32 1.442695, %v1509_v1 }
 0x2c6   :  { %v2109_v10 = vmul.f32 2.0, %v2077_v41  ;;  %v2335_v50 = vmul.f32 0.5, %v3568_v62  ;;  %4242 = vlog2.f32 %v1776_v14  ;;  %v7476_v63 = vmul.f32 %v1985_v16, %v1985_v16 }
 0x2c7   :  { %3471 = vst.msk [vmem:[%s7907_s13 + $0x80] sm:$0xff] %vm2348_vm5, %v3438_v47  ;;  %v1779_v53 = vmul.f32 -0.5, %v7454_v19  ;;  %v7479_v59 = vmul.f32 %v1984_v39, %v1984_v39  ;;  %v2208_v49 = vadd.f32 %v2176_v11, %v7386_v58  ;;  %v1790_v30 = vmul.f32 %v7409_v61, %v1789_v54  ;;  %v1955_v39 = vld [vmem:[%s7905_s11 + $0xc8] sm:$0xff] }
 0x2c8   :  { %v2270_v60 = vadd.f32 %v2238_v28, %v2109_v10  ;;  %v7481_v46 = vpop.eup %4232  ;;  %2368 = vst.msk [vmem:[%s7907_s13 + $0x98] sm:$0xff] %vm2348_vm5, %v2335_v50  ;;  %4244 = vpow2.f32 %v1568_v56  ;;  %v1476_v52 = vand.u32 2147483647, %v7469_v57  ;;  %v2175_v27 = vmul.f32 %v1886_v40, %v1886_v40 }
 0x2c9   :  { %v4235_v43 = vpop.eup %4234  ;;  %v1782_v35 = vand.u32 2147483647, %v7454_v19  ;;  %v1803_v20 = vadd.f32 1.0, %v7481_v46  ;;  %vm7492_vm8 = vcmp.lt.f32.partialorder %v1791_v21, 0.0004427343  ;;  %v1806_v58 = vmul.f32 -0.5, %v7481_v46 }
 0x2ca   :  { %v3567_v32 = vadd.f32 -1.0, %v2270_v60  ;;  %v4237_v0 = vpop.eup %4236  ;;  %v2037_v37 = vmul.f32 0.6931472, %v4235_v43  ;;  %v1508_v4 = vsub.f32 0.0, %v1476_v52  ;;  %v1780_v6 = vadd.f32 1.0, %v1779_v53 }
 0x2cb   :  { %v7497_v61 = vpop.eup %4238  ;;  %v1787_v45 = vmul.f32 0.6931472, %v4237_v0  ;;  %4246 = vlog2.f32 %v1803_v20  ;;  %v2241_v3 = vmul.f32 %v6085_v25, %v2208_v49  ;;  %v1443_v15 = vmax.f32 %v7377_v17, 0.0 }
 0x2cc   :  { %v2334_v9 = vmul.f32 0.5, %v3567_v32  ;;  %v2080_v23 = vsub.f32 %v6080_v13, %v2037_v37  ;;  %v1794_v2 = vadd.f32 1.0, %v7497_v61  ;;  %v2207_v42 = vadd.f32 %v2175_v27, %v2143_v8  ;;  %v1954_v37 = vld [vmem:[%s7905_s11 + $0xc0] sm:$0xff] }
 0x2cd   :  { %v1793_v48 = vsel %vm7492_vm8, %v1790_v30, %v1787_v45  ;;  %vm7514_vm9 = vcmp.lt.f32.partialorder %v1782_v35, 0.0004427343  ;;  %v1566_v12 = vmul.f32 1.442695, %v1508_v4  ;;  %v1807_v22 = vadd.f32 1.0, %v1806_v58 }
 0x2ce   :  { %2367 = vst.msk [vmem:[%s7907_s13 + $0x90] sm:$0xff] %vm2348_vm5, %v2334_v9  ;;  %v2112_v5 = vmul.f32 2.0, %v2080_v23  ;;  %v1889_v16 = vadd.f32 %v1793_v48, %v1441_v36  ;;  %4248 = vlog2.f32 %v1794_v2  ;;  %v1781_v29 = vmul.f32 %v7454_v19, %v1780_v6  ;;  %v3382_v19 = vpop.xlane.xlu0 %3381  ;;  %v7569_v6 = vld [vmem:[%s7904_s10 + $0xe0] sm:$0xff] }
 0x2cf   :  { %v4241_v8 = vpop.eup %4240  ;;  %v3313_v1 = vld [vmem:[%s7907_s13 + $0x98] sm:$0xff]  ;;  %v1797_v28 = vmul.f32 -0.5, %v7497_v61  ;;  %4250 = vpow2.f32 %v1566_v12  ;;  %v1479_v41 = vand.u32 2147483647, %v7506_v55  ;;  %v2240_v54 = vmul.f32 %v6085_v25, %v2207_v42 }
 0x2d0   :  { %v4243_v11 = vpop.eup %4242  ;;  %v3441_v40 = vadd.f32 %v3385_v7, %v3313_v1  ;;  %v2273_v47 = vadd.f32 %v2241_v3, %v2112_v5  ;;  %v2035_v62 = vmul.f32 0.6931472, %v4241_v8  ;;  %4252 = vlog2.f32 %v1889_v16 }
 0x2d1   :  { %v1778_v14 = vmul.f32 0.6931472, %v4243_v11  ;;  %v1809_v10 = vand.u32 2147483647, %v7481_v46  ;;  %v1987_v36 = vsub.f32 %v1923_v51, %v1955_v39  ;;  %v1808_v60 = vmul.f32 %v7481_v46, %v1807_v22  ;;  %v1922_v46 = vld [vmem:[%s7903_s9 + $0xc0] sm:$0xff] }
 0x2d2   :  { %v7532_v50 = vpop.eup %4244  ;;  %3474 = vst.msk [vmem:[%s7907_s13 + $0x98] sm:$0xff] %vm2348_vm5, %v3441_v40  ;;  %v3570_v21 = vadd.f32 -1.0, %v2273_v47  ;;  %v2079_v56 = vsub.f32 %v6080_v13, %v2035_v62  ;;  %v1800_v53 = vand.u32 2147483647, %v7497_v61  ;;  %v1798_v30 = vadd.f32 1.0, %v1797_v28  ;;  %v1925_v47 = vld [vmem:[%s7903_s9 + $0xd8] sm:$0xff] }
 0x2d3   :  { %v1784_v49 = vsel %vm7514_vm9, %v1781_v29, %v1778_v14  ;;  %v1821_v52 = vadd.f32 1.0, %v7532_v50  ;;  %v1511_v43 = vsub.f32 0.0, %v1479_v41  ;;  %v2178_v20 = vmul.f32 %v1889_v16, %v1889_v16  ;;  %v3391_v29 = vpop.xlane.xlu1 %3390  ;;  %v1957_v62 = vld [vmem:[%s7905_s11 + $0xd8] sm:$0xff] }
 0x2d4   :  { %v2337_v27 = vmul.f32 0.5, %v3570_v21  ;;  %v2111_v35 = vmul.f32 2.0, %v2079_v56  ;;  %v1888_v0 = vadd.f32 %v1784_v49, %v1440_v31  ;;  %vm7555_vm10 = vcmp.lt.f32.partialorder %v1809_v10, 0.0004427343 }
 0x2d5   :  { %v3312_v32 = vld [vmem:[%s7907_s13 + $0x90] sm:$0xff]  ;;  %v4247_v24 = vpop.eup %4246  ;;  %v7559_v9 = vmul.f32 %v1987_v36, %v1987_v36  ;;  %4254 = vlog2.f32 %v1821_v52  ;;  %v1824_v45 = vmul.f32 -0.5, %v7532_v50  ;;  %v1442_v3 = vmax.f32 %v7383_v18, 0.0 }
 0x2d6   :  { %v3440_v58 = vadd.f32 %v3382_v19, %v3312_v32  ;;  %2370 = vst.msk [vmem:[%s7907_s13 + $0xa8] sm:$0xff] %vm2348_vm5, %v2337_v27  ;;  %v2272_v44 = vadd.f32 %v2240_v54, %v2111_v35  ;;  %4256 = vlog2.f32 %v1888_v0  ;;  %v1805_v31 = vmul.f32 0.6931472, %v4247_v24  ;;  %v7613_v19 = vld [vmem:[%s7901_s7] sm:$0x3] }
 0x2d7   :  { %v1799_v23 = vmul.f32 %v7497_v61, %v1798_v30  ;;  %v1986_v2 = vsub.f32 %v1922_v46, %v1954_v37  ;;  %v1572_v7 = vmul.f32 1.442695, %v1511_v43  ;;  %v2210_v34 = vadd.f32 %v2178_v20, %v7476_v63  ;;  %v3388_v20 = vpop.xlane.xlu0 %3387 }
 0x2d8   :  { %3473 = vst.msk [vmem:[%s7907_s13 + $0x90] sm:$0xff] %vm2348_vm5, %v3440_v58  ;;  %v4249_v42 = vpop.eup %4248  ;;  %v3569_v48 = vadd.f32 -1.0, %v2272_v44  ;;  %v1811_v12 = vsel %vm7555_vm10, %v1808_v60, %v1805_v31  ;;  %vm7580_vm11 = vcmp.lt.f32.partialorder %v1800_v53, 0.0004427343  ;;  %v1478_v61 = vand.u32 2147483647, %v7569_v6 }
 0x2d9   :  { %v7584_v16 = vpop.eup %4250  ;;  %v1891_v18 = vadd.f32 %v1811_v12, %v1443_v15  ;;  %v1796_v22 = vmul.f32 0.6931472, %v4249_v42  ;;  %4258 = vpow2.f32 %v1572_v7  ;;  %v2177_v8 = vmul.f32 %v1888_v0, %v1888_v0 }
 0x2da   :  { %v4253_v51 = vpop.eup %4252  ;;  %v2336_v39 = vmul.f32 0.5, %v3569_v48  ;;  %v1825_v63 = vadd.f32 1.0, %v1824_v45  ;;  %v1812_v1 = vadd.f32 1.0, %v7584_v16  ;;  %v1827_v11 = vand.u32 2147483647, %v7532_v50 }
 0x2db   :  { %v2041_v28 = vmul.f32 0.6931472, %v4253_v51  ;;  %4260 = vlog2.f32 %v1891_v18  ;;  %v1802_v41 = vsel %vm7580_vm11, %v1799_v23, %v1796_v22  ;;  %v2147_v15 = vmul.f32 %v1986_v2, %v1986_v2  ;;  %v1956_v51 = vld [vmem:[%s7905_s11 + $0xd0] sm:$0xff] }
 0x2dc   :  { %2369 = vst.msk [vmem:[%s7907_s13 + $0xa0] sm:$0xff] %vm2348_vm5, %v2336_v39  ;;  %v1890_v17 = vadd.f32 %v1802_v41, %v1442_v3  ;;  %v1445_v40 = vmax.f32 %v7426_v33, 0.0  ;;  %4262 = vlog2.f32 %v1812_v1  ;;  %v2243_v14 = vmul.f32 %v6085_v25, %v2210_v34  ;;  %v7662_v41 = vld [vmem:[%s7904_s10 + $0xf8] sm:$0xff] }
 0x2dd   :  { %v3315_v54 = vld [vmem:[%s7907_s13 + $0xa8] sm:$0xff]  ;;  %v2082_v10 = vsub.f32 %v6080_v13, %v2041_v28  ;;  %v1815_v36 = vmul.f32 -0.5, %v7584_v16  ;;  %v1510_v33 = vsub.f32 0.0, %v1478_v61  ;;  %v2209_v56 = vadd.f32 %v2177_v8, %v7479_v59  ;;  %v1924_v61 = vld [vmem:[%s7903_s9 + $0xd0] sm:$0xff] }
 0x2de   :  { %v3443_v21 = vadd.f32 %v3391_v29, %v3315_v54  ;;  %4264 = vlog2.f32 %v1890_v17  ;;  %v1826_v60 = vmul.f32 %v7532_v50, %v1825_v63  ;;  %vm7617_vm12 = vcmp.lt.f32.partialorder %v1827_v11, 0.0004427343 }
 0x2df   :  { %v4255_v53 = vpop.eup %4254  ;;  %v2114_v49 = vmul.f32 2.0, %v2082_v10  ;;  %v1989_v52 = vsub.f32 %v1925_v47, %v1957_v62  ;;  %v1570_v43 = vmul.f32 1.442695, %v1510_v33  ;;  %v2180_v27 = vmul.f32 %v1891_v18, %v1891_v18 }
 0x2e0   :  { %v4257_v32 = vpop.eup %4256  ;;  %3476 = vst.msk [vmem:[%s7907_s13 + $0xa8] sm:$0xff] %vm2348_vm5, %v3443_v21  ;;  %v1823_v35 = vmul.f32 0.6931472, %v4255_v53  ;;  %v1444_v59 = vmax.f32 %v7469_v57, 0.0  ;;  %v3493_v50 = vand.u32 2147483647, %v7613_v19  ;;  %v2242_v24 = vmul.f32 %v6085_v25, %v2209_v56 }
 0x2e1   :  { %v2275_v0 = vadd.f32 %v2243_v14, %v2114_v49  ;;  %v2039_v46 = vmul.f32 0.6931472, %v4257_v32  ;;  %v1816_v37 = vadd.f32 1.0, %v1815_v36  ;;  %4266 = vpow2.f32 %v1570_v43 }
 0x2e2   :  { %v2179_v58 = vmul.f32 %v1890_v17, %v1890_v17  ;;  %v1829_v4 = vsel %vm7617_vm12, %v1826_v60, %v1823_v35  ;;  %v1818_v44 = vand.u32 2147483647, %v7584_v16  ;;  %v3494_v2 = vsub.f32 0.0, %v3493_v50 }
 0x2e3   :  { %v7631_v31 = vpop.eup %4258  ;;  %v3314_v57 = vld [vmem:[%s7907_s13 + $0xa0] sm:$0xff]  ;;  %v3572_v45 = vadd.f32 -1.0, %v2275_v0  ;;  %v2081_v3 = vsub.f32 %v6080_v13, %v2039_v46  ;;  %v1893_v23 = vadd.f32 %v1829_v4, %v1445_v40  ;;  %v2212_v42 = vadd.f32 %v2180_v27, %v7559_v9 }
 0x2e4   :  { %v3442_v7 = vadd.f32 %v3388_v20, %v3314_v57  ;;  %v2150_v48 = vmul.f32 %v1989_v52, %v1989_v52  ;;  %v1839_v34 = vadd.f32 1.0, %v7631_v31  ;;  %v1817_v22 = vmul.f32 %v7584_v16, %v1816_v37  ;;  %v3397_v52 = vpop.xlane.xlu1 %3396  ;;  %v7689_v37 = vld [vmem:[%s7904_s10 + $0xf0] sm:$0xff] }
 0x2e5   :  { %v4261_v12 = vpop.eup %4260  ;;  %v2339_v5 = vmul.f32 0.5, %v3572_v45  ;;  %v2113_v18 = vmul.f32 2.0, %v2081_v3  ;;  %4268 = vlog2.f32 %v1893_v23  ;;  %v2211_v8 = vadd.f32 %v2179_v58, %v2147_v15 }
 0x2e6   :  { %v4263_v39 = vpop.eup %4262  ;;  %3475 = vst.msk [vmem:[%s7907_s13 + $0xa0] sm:$0xff] %vm2348_vm5, %v3442_v7  ;;  %v2045_v9 = vmul.f32 0.6931472, %v4261_v12  ;;  %vm7650_vm13 = vcmp.lt.f32.partialorder %v1818_v44, 0.0004427343  ;;  %4270 = vlog2.f32 %v1839_v34  ;;  %v1842_v29 = vmul.f32 -0.5, %v7631_v31 }
 0x2e7   :  { %2372 = vst.msk [vmem:[%s7907_s13 + $0xb8] sm:$0xff] %vm2348_vm5, %v2339_v5  ;;  %v2274_v16 = vadd.f32 %v2242_v24, %v2113_v18  ;;  %v1814_v1 = vmul.f32 0.6931472, %v4263_v39  ;;  %v3495_v28 = vmul.f32 1.442695, %v3494_v2  ;;  %v2245_v17 = vmul.f32 %v6085_v25, %v2212_v42  ;;  %v3394_v5 = vpop.xlane.xlu0 %3393 }
 0x2e8   :  { %v4265_v11 = vpop.eup %4264  ;;  %v2084_v15 = vsub.f32 %v6080_v13, %v2045_v9  ;;  %v1988_v40 = vsub.f32 %v1924_v61, %v1956_v51  ;;  %v1845_v47 = vand.u32 2147483647, %v7631_v31  ;;  %v2182_v14 = vmul.f32 %v1893_v23, %v1893_v23  ;;  %v1927_v61 = vld [vmem:[%s7903_s9 + $0xe8] sm:$0xff] }
 0x2e9   :  { %v3571_v62 = vadd.f32 -1.0, %v2274_v16  ;;  %v2043_v54 = vmul.f32 0.6931472, %v4265_v11  ;;  %v1820_v10 = vsel %vm7650_vm13, %v1817_v22, %v1814_v1  ;;  %4272 = vpow2.f32 %v3495_v28  ;;  %v1959_v51 = vld [vmem:[%s7905_s11 + $0xe8] sm:$0xff] }
 0x2ea   :  { %v2116_v36 = vmul.f32 2.0, %v2084_v15  ;;  %v1892_v33 = vadd.f32 %v1820_v10, %v1444_v59  ;;  %v1481_v21 = vand.u32 2147483647, %v7662_v41  ;;  %v2244_v53 = vmul.f32 %v6085_v25, %v2211_v8 }
 0x2eb   :  { %v7670_v56 = vpop.eup %4266  ;;  %v2338_v60 = vmul.f32 0.5, %v3571_v62  ;;  %v2083_v49 = vsub.f32 %v6080_v13, %v2043_v54  ;;  %v1843_v30 = vadd.f32 1.0, %v1842_v29  ;;  %v2149_v35 = vmul.f32 %v1988_v40, %v1988_v40  ;;  %v3403_v54 = vpop.xlane.xlu1 %3402 }
 0x2ec   :  { %v2277_v43 = vadd.f32 %v2245_v17, %v2116_v36  ;;  %4274 = vlog2.f32 %v1892_v33  ;;  %v1830_v32 = vadd.f32 1.0, %v7670_v56  ;;  %v1513_v59 = vsub.f32 0.0, %v1481_v21 }
 0x2ed   :  { %2371 = vst.msk [vmem:[%s7907_s13 + $0xb0] sm:$0xff] %vm2348_vm5, %v2338_v60  ;;  %v2115_v27 = vmul.f32 2.0, %v2083_v49  ;;  %v2214_v0 = vadd.f32 %v2182_v14, %v2150_v48  ;;  %vm7682_vm14 = vcmp.lt.f32.partialorder %v1845_v47, 0.0004427343  ;;  %v1844_v44 = vmul.f32 %v7631_v31, %v1843_v30 }
 0x2ee   :  { %v3317_v50 = vld [vmem:[%s7907_s13 + $0xb8] sm:$0xff]  ;;  %v3574_v20 = vadd.f32 -1.0, %v2277_v43  ;;  %4276 = vlog2.f32 %v1830_v32  ;;  %v1833_v57 = vmul.f32 -0.5, %v7670_v56  ;;  %v1447_v2 = vmax.f32 %v7506_v55, 0.0  ;;  %v3400_v43 = vpop.xlane.xlu0 %3399 }
 0x2ef   :  { %v4269_v24 = vpop.eup %4268  ;;  %v3445_v58 = vadd.f32 %v3397_v52, %v3317_v50  ;;  %v2276_v4 = vadd.f32 %v2244_v53, %v2115_v27  ;;  %v1576_v7 = vmul.f32 1.442695, %v1513_v59  ;;  %v2181_v48 = vmul.f32 %v1892_v33, %v1892_v33 }
 0x2f0   :  { %v4271_v45 = vpop.eup %4270  ;;  %v2341_v3 = vmul.f32 0.5, %v3574_v20  ;;  %v2049_v23 = vmul.f32 0.6931472, %v4269_v24  ;;  %v1480_v12 = vand.u32 2147483647, %v7689_v37  ;;  %v2247_v31 = vmul.f32 %v6085_v25, %v2214_v0  ;;  %v1926_v20 = vld [vmem:[%s7903_s9 + $0xe0] sm:$0xff] }
 0x2f1   :  { %3478 = vst.msk [vmem:[%s7907_s13 + $0xb8] sm:$0xff] %vm2348_vm5, %v3445_v58  ;;  %v3573_v42 = vadd.f32 -1.0, %v2276_v4  ;;  %v1841_v34 = vmul.f32 0.6931472, %v4271_v45  ;;  %4278 = vpow2.f32 %v1576_v7  ;;  %v1834_v39 = vadd.f32 1.0, %v1833_v57  ;;  %v1958_v0 = vld [vmem:[%s7905_s11 + $0xe0] sm:$0xff] }
 0x2f2   :  { %2374 = vst.msk [vmem:[%s7907_s13 + $0xc8] sm:$0xff] %vm2348_vm5, %v2341_v3  ;;  %v2086_v55 = vsub.f32 %v6080_v13, %v2049_v23  ;;  %v1512_v9 = vsub.f32 0.0, %v1480_v12  ;;  %v1836_v29 = vand.u32 2147483647, %v7670_v56  ;;  %v2213_v11 = vadd.f32 %v2181_v48, %v2149_v35 }
 0x2f3   :  { %v2340_v18 = vmul.f32 0.5, %v3573_v42  ;;  %v1847_v22 = vsel %vm7682_vm14, %v1844_v44, %v1841_v34  ;;  %v7713_v8 = vpop.eup %4272  ;;  %v1991_v47 = vsub.f32 %v1927_v61, %v1959_v51  ;;  %v1446_v10 = vmax.f32 %v7569_v6, 0.0 }
 0x2f4   :  { %v3316_v63 = vld [vmem:[%s7907_s13 + $0xb0] sm:$0xff]  ;;  %v2118_v16 = vmul.f32 2.0, %v2086_v55  ;;  %v1895_v1 = vadd.f32 %v1847_v22, %v1447_v2  ;;  %v3497_v17 = vadd.f32 1.0, %v7713_v8  ;;  %v1574_v62 = vmul.f32 1.442695, %v1512_v9 }
 0x2f5   :  { %v3444_v28 = vadd.f32 %v3394_v5, %v3316_v63  ;;  %2373 = vst.msk [vmem:[%s7907_s13 + $0xc0] sm:$0xff] %vm2348_vm5, %v2340_v18  ;;  %v1835_v36 = vmul.f32 %v7670_v56, %v1834_v39  ;;  %vm7730_vm15 = vcmp.lt.f32.partialorder %v1836_v29, 0.0004427343  ;;  %v3500_v53 = vmul.f32 -0.5, %v7713_v8 }
 0x2f6   :  { %v4275_v15 = vpop.eup %4274  ;;  %v2279_v40 = vadd.f32 %v2247_v31, %v2118_v16  ;;  %4280 = vlog2.f32 %v1895_v1  ;;  %v2246_v30 = vmul.f32 %v6085_v25, %v2213_v11  ;;  %v2152_v35 = vmul.f32 %v1991_v47, %v1991_v47  ;;  %v3409_v31 = vpop.xlane.xlu1 %3408 }
 0x2f7   :  { %3477 = vst.msk [vmem:[%s7907_s13 + $0xb0] sm:$0xff] %vm2348_vm5, %v3444_v28  ;;  %v2047_v14 = vmul.f32 0.6931472, %v4275_v15  ;;  %4282 = vlog2.f32 %v3497_v17  ;;  %v2184_v59 = vmul.f32 %v1895_v1, %v1895_v1  ;;  %v3501_v4 = vadd.f32 1.0, %v3500_v53  ;;  %v3507_v17 = vld [vmem:[%s7902_s8] sm:$0x3]  ;;  %v3406_v53 = vpop.xlane.xlu0 %3405 }
 0x2f8   :  { %v4277_v33 = vpop.eup %4276  ;;  %v3576_v21 = vadd.f32 -1.0, %v2279_v40  ;;  %4284 = vpow2.f32 %v1574_v62  ;;  %v3503_v45 = vand.u32 2147483647, %v7713_v8  ;;  %v1990_v23 = vsub.f32 %v1926_v20, %v1958_v0 }
 0x2f9   :  { %v3319_v49 = vld [vmem:[%s7907_s13 + $0xc8] sm:$0xff]  ;;  %v2085_v6 = vsub.f32 %v6080_v13, %v2047_v14  ;;  %v1832_v52 = vmul.f32 0.6931472, %v4277_v33  ;;  %v2216_v7 = vadd.f32 %v2184_v59, %v2152_v35  ;;  %v3513_v42 = vlaneseq  ;;  %v3490_v14 = vld [vmem:[%s7900_s6] sm:$0x3] }
 0x2fa   :  { %v3447_v56 = vadd.f32 %v3403_v54, %v3319_v49  ;;  %v2343_v32 = vmul.f32 0.5, %v3576_v21  ;;  %v3502_v34 = vmul.f32 %v7713_v8, %v3501_v4  ;;  %v3492_v22 = vmax.f32 %v7613_v19, 0.0 }
 0x2fb   :  { %v2117_v27 = vmul.f32 2.0, %v2085_v6  ;;  %v1838_v50 = vsel %vm7730_vm15, %v1835_v36, %v1832_v52  ;;  %v4279_v46 = vpop.eup %4278  ;;  %vm7766_vm0 = vcmp.lt.f32.partialorder %v3503_v45, 0.0004427343  ;;  %v2151_v39 = vmul.f32 %v1990_v23, %v1990_v23  ;;  %v1929_v23 = vld [vmem:[%s7903_s9 + $0xf8] sm:$0xff] }
 0x2fc   :  { %3480 = vst.msk [vmem:[%s7907_s13 + $0xc8] sm:$0xff] %vm2348_vm5, %v3447_v56  ;;  %v3318_v24 = vld [vmem:[%s7907_s13 + $0xc0] sm:$0xff]  ;;  %2376 = vst.msk [vmem:[%s7907_s13 + $0xd8] sm:$0xff] %vm2348_vm5, %v2343_v32  ;;  %v1894_v58 = vadd.f32 %v1838_v50, %v1446_v10  ;;  %v1857_v3 = vadd.f32 1.0, %v4279_v46  ;;  %v1860_v12 = vmul.f32 -0.5, %v4279_v46  ;;  %v2249_v19 = vmul.f32 %v6085_v25, %v2216_v7 }
 0x2fd   :  { %v3446_v44 = vadd.f32 %v3400_v43, %v3318_v24  ;;  %v2278_v57 = vadd.f32 %v2246_v30, %v2117_v27  ;;  %v3514_v1 = vshrl.u32 %v3513_v42, 7  ;;  %v1863_v62 = vand.u32 2147483647, %v4279_v46 }
 0x2fe   :  { %4286 = vlog2.f32 %v1894_v58  ;;  %v2183_v9 = vmul.f32 %v1894_v58, %v1894_v58  ;;  %v1861_v15 = vadd.f32 1.0, %v1860_v12  ;;  %v1449_v30 = vmax.f32 %v7662_v41, 0.0 }
 0x2ff   :  { %3479 = vst.msk [vmem:[%s7907_s13 + $0xc0] sm:$0xff] %vm2348_vm5, %v3446_v44  ;;  %v3575_v2 = vadd.f32 -1.0, %v2278_v57  ;;  %4288 = vlog2.f32 %v1857_v3  ;;  %v3515_v21 = vsub.s32 0, %v3514_v1  ;;  %v3519_v49 = vsub.s32 1, %v3514_v1 }
 0x300   :  { %v4281_v48 = vpop.eup %4280  ;;  %v2215_v54 = vadd.f32 %v2183_v9, %v2151_v39  ;;  %v1862_v6 = vmul.f32 %v4279_v46, %v1861_v15  ;;  %vm7796_vm1 = vcmp.lt.f32.partialorder %v1863_v62, 0.0004427343 }
 0x301   :  { %v4283_v5 = vpop.eup %4282  ;;  %v2342_v55 = vmul.f32 0.5, %v3575_v2  ;;  %v2053_v18 = vmul.f32 0.6931472, %v4281_v48  ;;  %v1961_v2 = vld [vmem:[%s7905_s11 + $0xf8] sm:$0xff] }
 0x302   :  { %v7770_v51 = vpop.eup %4284  ;;  %v3499_v63 = vmul.f32 0.6931472, %v4283_v5  ;;  %v2248_v59 = vmul.f32 %v6085_v25, %v2215_v54  ;;  %v1993_v5 = vsub.f32 %v1929_v23, %v1961_v2 }
 0x303   :  { %v3321_v8 = vld [vmem:[%s7907_s13 + $0xd8] sm:$0xff]  ;;  %2375 = vst.msk [vmem:[%s7907_s13 + $0xd0] sm:$0xff] %vm2348_vm5, %v2342_v55  ;;  %v2088_v16 = vsub.f32 %v6080_v13, %v2053_v18  ;;  %v1848_v29 = vadd.f32 1.0, %v7770_v51  ;;  %v1851_v10 = vmul.f32 -0.5, %v7770_v51  ;;  %v1854_v0 = vand.u32 2147483647, %v7770_v51 }
 0x304   :  { %v3449_v28 = vadd.f32 %v3409_v31, %v3321_v8  ;;  %v3505_v11 = vsel %vm7766_vm0, %v3502_v34, %v3499_v63 }
 0x305   :  { %v2120_v40 = vmul.f32 2.0, %v2088_v16  ;;  %v3506_v47 = vadd.f32 %v3505_v11, %v3492_v22  ;;  %4290 = vlog2.f32 %v1848_v29  ;;  %v1852_v20 = vadd.f32 1.0, %v1851_v10 }
 0x306   :  { %3482 = vst.msk [vmem:[%s7907_s13 + $0xd8] sm:$0xff] %vm2348_vm5, %v3449_v28  ;;  %vm7826_vm2 = vcmp.lt.f32.partialorder %v1854_v0, 0.0004427343 }
 0x307   :  { %v2281_v36 = vadd.f32 %v2249_v19, %v2120_v40  ;;  %v3508_v33 = vmul.f32 %v3507_v17, %v3506_v47  ;;  %v1853_v42 = vmul.f32 %v7770_v51, %v1852_v20 }
 0x308   :  { %v4287_v60 = vpop.eup %4286 }
 0x309   :  { %v4289_v52 = vpop.eup %4288  ;;  %v3578_v56 = vadd.f32 -1.0, %v2281_v36  ;;  %v2051_v43 = vmul.f32 0.6931472, %v4287_v60  ;;  %v3509_v32 = vadd.f32 %v3508_v33, %v3490_v14 }
 0x30a   :  { %v3320_v35 = vld [vmem:[%s7907_s13 + $0xd0] sm:$0xff]  ;;  %v1859_v50 = vmul.f32 0.6931472, %v4289_v52 }
 0x30b   :  { %v3448_v41 = vadd.f32 %v3406_v53, %v3320_v35  ;;  %v2345_v46 = vmul.f32 0.5, %v3578_v56  ;;  %v2087_v24 = vsub.f32 %v6080_v13, %v2051_v43  ;;  %v3516_v58 = vrot.slane %v3509_v32, %v3515_v21 }
 0x30c   :  { %v3520_v4 = vrot.slane %v3509_v32, %v3519_v49  ;;  %v1865_v44 = vsel %vm7796_vm1, %v1862_v6, %v1859_v50 }
 0x30d   :  { %3481 = vst.msk [vmem:[%s7907_s13 + $0xd0] sm:$0xff] %vm2348_vm5, %v3448_v41  ;;  %2378 = vst.msk [vmem:[%s7907_s13 + $0xe8] sm:$0xff] %vm2348_vm5, %v2345_v46  ;;  %v2119_v57 = vmul.f32 2.0, %v2087_v24  ;;  %v3523_v45 = vadd.f32 %v3516_v58, %v7245_v38  ;;  %v1897_v3 = vadd.f32 %v1865_v44, %v1449_v30  ;;  %v1448_v38 = vmax.f32 %v7689_v37, 0.0 }
 0x30e   :  { %v3524_v7 = vadd.f32 %v3520_v4, %v7248_v26 }
 0x30f   :  { %v4291_v48 = vpop.eup %4290  ;;  %v2280_v34 = vadd.f32 %v2248_v59, %v2119_v57  ;;  %3525 = vst [vmem:[#allocation11] sm:$0xff] %v3523_v45  ;;  %4292 = vlog2.f32 %v1897_v3 }
 0x310   :  { %3526 = vst [vmem:[#allocation11 + $0x8] sm:$0xff] %v3524_v7  ;;  %v1850_v31 = vmul.f32 0.6931472, %v4291_v48 }
 0x311   :  { %v3577_v55 = vadd.f32 -1.0, %v2280_v34 }
 0x312   :  { %4388 = shalt.err (!%p4385_p5)
}
 0x313   :  { %s4389_s1 = scalar_lea.hbm %s7906_s12, 256 }
 0x314   :  { %p4390_p6 = scmp.ne.s32.totalorder %s7906_s12, %s4389_s1  ;;  %p4393_p7 = scmp.lt.u32.totalorder %s4389_s1, %s7906_s12 }
 0x316   :  { %p4395_p8 = pnand %p4393_p7, %p4390_p6 }
 0x318   :  { %4398 = shalt.err (!%p4395_p8)
}
 0x319   :  { %3536 = dma.vmem_to_hbm [thread:$0]  %s3534_s16, 256, %s7906_s12, [#allocation5]   ;;  %v3415_v26 = vpop.xlane.xlu1 %3414  ;;  %v1856_v37 = vsel %vm7826_vm2, %v1853_v42, %v1850_v31  ;;  %v2344_v18 = vmul.f32 0.5, %v3577_v55  ;;  %v1928_v61 = vld [vmem:[%s7903_s9 + $0xf0] sm:$0xff]  ;;  %v3323_v39 = vld [vmem:[%s7907_s13 + $0xe8] sm:$0xff]  ;;  %v2154_v9 = vmul.f32 %v1993_v5, %v1993_v5  ;;  %v2186_v63 = vmul.f32 %v1897_v3, %v1897_v3  ;;  %v4293_v1 = vpop.eup %4292 }
 0x31a   :  { %v1896_v22 = vadd.f32 %v1856_v37, %v1448_v38  ;;  %v1960_v51 = vld [vmem:[%s7905_s11 + $0xf0] sm:$0xff]  ;;  %v3451_v8 = vadd.f32 %v3415_v26, %v3323_v39  ;;  %v3412_v29 = vpop.xlane.xlu0 %3411  ;;  %v2057_v28 = vmul.f32 0.6931472, %v4293_v1 }
 0x31b   :  { %2377 = vst.msk [vmem:[%s7907_s13 + $0xe0] sm:$0xff] %vm2348_vm5, %v2344_v18  ;;  %v1992_v19 = vsub.f32 %v1928_v61, %v1960_v51  ;;  %v2218_v16 = vadd.f32 %v2186_v63, %v2154_v9 }
 0x31c   :  { %4294 = vlog2.f32 %v1896_v22  ;;  %3484 = vst.msk [vmem:[%s7907_s13 + $0xe8] sm:$0xff] %vm2348_vm5, %v3451_v8  ;;  %v2185_v17 = vmul.f32 %v1896_v22, %v1896_v22  ;;  %v2090_v47 = vsub.f32 %v6080_v13, %v2057_v28 }
 0x31d   :  { %v2153_v11 = vmul.f32 %v1992_v19, %v1992_v19  ;;  %v2251_v40 = vmul.f32 %v6085_v25, %v2218_v16  ;;  %v3421_v43 = vpop.xlane.xlu1 %3420 }
 0x31e   :  { %v2122_v54 = vmul.f32 2.0, %v2090_v47  ;;  %v3418_v32 = vpop.xlane.xlu0 %3417 }
 0x31f   :  { %v2217_v14 = vadd.f32 %v2185_v17, %v2153_v11 }
 0x320   :  { %v2283_v36 = vadd.f32 %v2251_v40, %v2122_v54 }
 0x321   :  { %v2250_v60 = vmul.f32 %v6085_v25, %v2217_v14 }
 0x322   :  { %v3322_v15 = vld [vmem:[%s7907_s13 + $0xe0] sm:$0xff]  ;;  %v3580_v21 = vadd.f32 -1.0, %v2283_v36 }
 0x323   :  { %v3450_v62 = vadd.f32 %v3412_v29, %v3322_v15 }
 0x324   :  { %v2347_v49 = vmul.f32 0.5, %v3580_v21 }
 0x325   :  { %3483 = vst.msk [vmem:[%s7907_s13 + $0xe0] sm:$0xff] %vm2348_vm5, %v3450_v62 }
 0x326   :  { %v4295_v10 = vpop.eup %4294  ;;  %2380 = vst.msk [vmem:[%s7907_s13 + $0xf8] sm:$0xff] %vm2348_vm5, %v2347_v49 }
 0x327   :  { %v2055_v33 = vmul.f32 0.6931472, %v4295_v10 }
 0x329   :  { %v2089_v53 = vsub.f32 %v6080_v13, %v2055_v33 }
 0x32b   :  { %v2121_v30 = vmul.f32 2.0, %v2089_v53 }
 0x32d   :  { %v2282_v6 = vadd.f32 %v2250_v60, %v2121_v30  ;;  %v3325_v13 = vld [vmem:[%s7907_s13 + $0xf8] sm:$0xff] }
 0x32e   :  { %v3453_v25 = vadd.f32 %v3421_v43, %v3325_v13 }
 0x32f   :  { %v3579_v52 = vadd.f32 -1.0, %v2282_v6 }
 0x330   :  { %3486 = vst.msk [vmem:[%s7907_s13 + $0xf8] sm:$0xff] %vm2348_vm5, %v3453_v25 }
 0x331   :  { %v2346_v56 = vmul.f32 0.5, %v3579_v52 }
 0x333   :  { %2379 = vst.msk [vmem:[%s7907_s13 + $0xf0] sm:$0xff] %vm2348_vm5, %v2346_v56 }
 0x33a   :  { %v3324_v27 = vld [vmem:[%s7907_s13 + $0xf0] sm:$0xff] }
 0x33b   :  { %v3452_v35 = vadd.f32 %v3418_v32, %v3324_v27 }
 0x33d   :  { %3485 = vst.msk [vmem:[%s7907_s13 + $0xf0] sm:$0xff] %vm2348_vm5, %v3452_v35 }
 0x33e   :  { %4405 = dma.done.wait [#allocation5], 256  }
 0x33f   :  { %4406 = vsyncadd [#allocation5], 4294967040 }
 0x340   :  { %3544 = vsyncpa [#allocation4], 1 }
 0x341   :  { %3545 = vsyncpa [#allocation9], 1 }
 0x342   :  { %3546 = vsyncpa [#allocation5], 1 }
 0x343   :  { %3547 = vsyncpa [#allocation6], 1 }

</bundles_post_ra>
